<compile_context>
chip_gen: v7x
topology: tpu7x:2x2x1
jax: 0.10.0
libtpu: 0.0.40
codegen_flags: <defaults>
</compile_context>

<pallas_src>
import functools

import jax
import jax.numpy as jnp
from jax import lax
from jax.experimental import pallas as pl
from jax.experimental.pallas import tpu as pltpu


def _attention_kernel(x_ref, wqkv_ref, bqkv_ref, wp_ref, bp_ref, o_ref,
                      *, num_heads, head_dim, seq_len):
    Np, C = x_ref.shape[1], x_ref.shape[2]
    H, hd = num_heads, head_dim

    x = x_ref[0]                                            # (Np, C) bf16

    # Fused QKV projection: one lane-full MXU matmul with f32 accumulation.
    # The softmax scale is pre-folded into the Q columns of wqkv / bqkv.
    qkv = jnp.dot(x, wqkv_ref[...], preferred_element_type=jnp.float32)
    qkv = (qkv + bqkv_ref[...]).astype(jnp.bfloat16)        # (Np, 3C)

    # (1, Np) additive key mask: 0 on valid keys, -1e30 on the padded tail.
    # (Row vector, not an (Np, Np) bool -> no big live mask across the loop.)
    if Np != seq_len:
        key_bias = jnp.where(
            lax.broadcasted_iota(jnp.int32, (1, Np), 1) < seq_len,
            jnp.float32(0.0), jnp.float32(-1e30))
    else:
        key_bias = None

    # Per-head attention.  Head outputs stay values and are concatenated along
    # the lane axis -> no masked hd-wide stores, no f32 scratch round trip.
    head_outs = []
    for h in range(H):
        q = qkv[:, h * hd:(h + 1) * hd]                     # (Np, hd) scaled
        k = qkv[:, C + h * hd:C + (h + 1) * hd]             # (Np, hd)
        v = qkv[:, 2 * C + h * hd:2 * C + (h + 1) * hd]     # (Np, hd)

        # scores = q @ k^T via contraction of the last dims (no transpose).
        s = lax.dot_general(q, k, dimension_numbers=(((1,), (1,)), ((), ())),
                            preferred_element_type=jnp.float32)   # (Np, Np)
        if key_bias is not None:
            s = s + key_bias

        # Numerically-stable softmax, all f32 (portable to v5e).
        m = jnp.max(s, axis=-1, keepdims=True)
        p = jnp.exp(s - m)
        l = jnp.sum(p, axis=-1, keepdims=True)

        o_h = jnp.dot(p.astype(jnp.bfloat16), v,
                      preferred_element_type=jnp.float32)          # (Np, hd)
        # Fold the softmax denominator into the head output (EUP reciprocal).
        head_outs.append(
            (o_h * pl.reciprocal(l, approx=True)).astype(jnp.bfloat16))

    attn_out = jnp.concatenate(head_outs, axis=-1)          # (Np, C) bf16

    # Single fused output projection (contraction depth C) plus bias.
    out = jnp.dot(attn_out, wp_ref[...], preferred_element_type=jnp.float32)
    o_ref[0] = (out + bp_ref[...]).astype(o_ref.dtype)


def pack_attention_weights(wq, wk, wv, wp, bp, *, num_heads,
                           bq=None, bk=None, bv=None):
    """One-time packing of torch-style Linear weights (out_features, in_features).

    Returns (wqkv, bqkv, wp_t, bp2).  Call once at init, not per forward."""
    C = wq.shape[0]
    hd = C // num_heads
    scale = float(hd) ** (-0.5)

    # torch Linear computes x @ W^T -> transpose once here; fold the softmax
    # scale into the Q projection (weight and bias).
    wqkv = jnp.concatenate([(wq * scale).T, wk.T, wv.T], axis=1)
    wqkv = wqkv.astype(jnp.bfloat16)                        # (C, 3C)

    zeros = jnp.zeros((C,), jnp.float32)
    bq = zeros if bq is None else bq.astype(jnp.float32) * scale
    bk = zeros if bk is None else bk.astype(jnp.float32)
    bv = zeros if bv is None else bv.astype(jnp.float32)
    bqkv = jnp.concatenate([bq, bk, bv]).reshape(1, 3 * C)  # (1, 3C) f32

    wp_t = wp.T.astype(jnp.bfloat16)                        # (C, C)
    bp2 = bp.reshape(1, C).astype(jnp.float32)              # (1, C)
    return wqkv, bqkv, wp_t, bp2


@functools.partial(jax.jit, static_argnames=("num_heads",))
def attention_forward(x, wqkv, bqkv, wp_t, bp2, *, num_heads):
    """x: (B, N, C); packed weights from pack_attention_weights."""
    B, N, C = x.shape
    H = num_heads
    hd = C // H

    # Pad the sequence to a multiple of 128 -> lane-dense score tiles / stores.
    Np = ((N + 127) // 128) * 128
    pad = Np - N
    x_p = jnp.pad(x, ((0, 0), (0, pad), (0, 0))) if pad else x
    x_bf = x_p.astype(jnp.bfloat16)

    # Explicit scoped-VMEM sizing: pipelined x/out blocks (x2), resident
    # weights (x1), in-kernel temporaries, plus slack; capped at v7x's 64 MiB.
    out_itemsize = jnp.dtype(x.dtype).itemsize
    x_blk = Np * C * 2
    o_blk = Np * C * out_itemsize
    weights = (C * 3 * C + C * C) * 2 + (3 * C + C) * 4
    temps = Np * 3 * C * (4 + 2) + 2 * Np * Np * 4 + Np * C * (2 + 4)
    est = 2 * (x_blk + o_blk) + weights + temps
    vmem_limit = int(min(64 * 1024 * 1024, max(2 * est, 16 * 1024 * 1024)))

    kernel = functools.partial(_attention_kernel,
                               num_heads=H, head_dim=hd, seq_len=N)

    # Projection weights / biases are fully VMEM-resident for the whole grid
    # (single buffer; their index never changes so pipelining/double-buffering
    # them would only double the footprint).
    resident = pl.BlockSpec(memory_space=pltpu.MemorySpace.VMEM)

    out = pl.pallas_call(
        kernel,
        out_shape=jax.ShapeDtypeStruct((B, Np, C), x.dtype),
        grid_spec=pltpu.PrefetchScalarGridSpec(
            num_scalar_prefetch=0,
            grid=(B,),
            in_specs=[
                pl.BlockSpec((1, Np, C), lambda b: (b, 0, 0)),   # x (per batch)
                resident,                                        # Wqkv   (C, 3C)
                resident,                                        # bqkv   (1, 3C)
                resident,                                        # Wp^T   (C, C)
                resident,                                        # proj b (1, C)
            ],
            out_specs=pl.BlockSpec((1, Np, C), lambda b: (b, 0, 0)),
        ),
        compiler_params=pltpu.CompilerParams(
            dimension_semantics=("parallel",),
            vmem_limit_bytes=vmem_limit),
    )(x_bf, wqkv, bqkv, wp_t, bp2)

    return out[:, :N, :] if pad else out


def attention_reference(x, wq, wk, wv, wp, bp, *, num_heads,
                        bq=None, bk=None, bv=None):
    """Pure-JAX f32 reference mirroring the PyTorch forward exactly."""
    B, N, C = x.shape
    H = num_heads
    hd = C // H
    scale = float(hd) ** (-0.5)

    q = x @ wq.T if bq is None else x @ wq.T + bq
    k = x @ wk.T if bk is None else x @ wk.T + bk
    v = x @ wv.T if bv is None else x @ wv.T + bv

    def shape_heads(t):
        return t.reshape(B, N, H, hd).transpose(0, 2, 1, 3).reshape(B * H, N, hd)

    qh, kh, vh = shape_heads(q), shape_heads(k), shape_heads(v)
    attn = jnp.einsum('bqd,bkd->bqk', qh, kh) * scale
    attn = jax.nn.softmax(attn, axis=-1)
    out = jnp.einsum('bqk,bkd->bqd', attn, vh)
    out = out.reshape(B, H, N, hd).transpose(0, 2, 1, 3).reshape(B, N, C)
    return out @ wp.T + bp


if __name__ == "__main__":
    B, N, C, H = 2, 8, 32, 8   # head_dim = 4

    key = jax.random.PRNGKey(0)
    kx, kq, kk, kv, kp, kb = jax.random.split(key, 6)

    x = jax.random.normal(kx, (B, N, C), dtype=jnp.float32)
    # torch Linear-style weights: (out_features, in_features); qkv_bias=False.
    wq = jax.random.normal(kq, (C, C), dtype=jnp.float32) * 0.05
    wk = jax.random.normal(kk, (C, C), dtype=jnp.float32) * 0.05
    wv = jax.random.normal(kv, (C, C), dtype=jnp.float32) * 0.05
    wp = jax.random.normal(kp, (C, C), dtype=jnp.float32) * 0.05
    bp = jax.random.normal(kb, (C,), dtype=jnp.float32) * 0.05

    packed = pack_attention_weights(wq, wk, wv, wp, bp, num_heads=H)
    out = attention_forward(x, *packed, num_heads=H)
    out = jax.block_until_ready(out)

    ref = attention_reference(x, wq, wk, wv, wp, bp, num_heads=H)
    assert out.shape == (B, N, C)
    # bf16 MXU inputs -> tolerance loosened accordingly (softmax math stays f32)
    assert jnp.allclose(out, ref, atol=3e-2, rtol=3e-2), (
        f"max abs err = {jnp.max(jnp.abs(out - ref))}")

    print("KERNEL_OK")
</pallas_src>

<mosaic_0001>
module attributes {stable_mosaic.version = 11 : i64} {
  func.func @_attention_kernel(%arg0: i32, %arg1: memref<1x128x32xbf16, #tpu.memory_space<vmem>>, %arg2: memref<32x96xbf16, #tpu.memory_space<vmem>>, %arg3: memref<1x96xf32, #tpu.memory_space<vmem>>, %arg4: memref<32x32xbf16, #tpu.memory_space<vmem>>, %arg5: memref<1x32xf32, #tpu.memory_space<vmem>>, %arg6: memref<1x128x32xf32, #tpu.memory_space<vmem>>) attributes {dimension_semantics = [#tpu.dimension_semantics<parallel>], iteration_bounds = array<i64: 2>, scalar_prefetch = 0 : i64, scratch_operands = 0 : i64, tpu.core_type = #tpu.core_type<tc>, window_params = [{transform_indices = @transform_0, window_bounds = array<i64: 1, 128, 32>}, {pipeline_mode = #tpu.pipeline_mode<synchronous>, transform_indices = @transform_1, window_bounds = array<i64: 32, 96>}, {pipeline_mode = #tpu.pipeline_mode<synchronous>, transform_indices = @transform_2, window_bounds = array<i64: 1, 96>}, {pipeline_mode = #tpu.pipeline_mode<synchronous>, transform_indices = @transform_3, window_bounds = array<i64: 32, 32>}, {pipeline_mode = #tpu.pipeline_mode<synchronous>, transform_indices = @transform_4, window_bounds = array<i64: 1, 32>}, {transform_indices = @transform_5, window_bounds = array<i64: 1, 128, 32>}]} {
    %c0 = arith.constant 0 : index
    %c0_0 = arith.constant 0 : index
    %c0_1 = arith.constant 0 : index
    %0 = vector.load %arg1[%c0, %c0_0, %c0_1] : memref<1x128x32xbf16, #tpu.memory_space<vmem>>, vector<1x128x32xbf16>
    %1 = vector.shape_cast %0 : vector<1x128x32xbf16> to vector<128x32xbf16>
    %c0_2 = arith.constant 0 : index
    %c0_3 = arith.constant 0 : index
    %2 = vector.load %arg2[%c0_2, %c0_3] : memref<32x96xbf16, #tpu.memory_space<vmem>>, vector<32x96xbf16>
    %cst = arith.constant dense<0.000000e+00> : vector<128x96xf32>
    %3 = tpu.matmul %1, %2, %cst {dimension_numbers = #tpu.dot_dimension_numbers<[1], [0], [0], [1], [0, 0, 1, 1], [], []>} : vector<128x32xbf16>, vector<32x96xbf16>, vector<128x96xf32> -> vector<128x96xf32>
    %c0_4 = arith.constant 0 : index
    %c0_5 = arith.constant 0 : index
    %4 = vector.load %arg3[%c0_4, %c0_5] : memref<1x96xf32, #tpu.memory_space<vmem>>, vector<1x96xf32>
    %5 = vector.broadcast %4 : vector<1x96xf32> to vector<128x96xf32>
    %6 = arith.addf %3, %5 : vector<128x96xf32>
    %7 = arith.truncf %6 : vector<128x96xf32> to vector<128x96xbf16>
    %8 = tpu.iota {dimensions = array<i32: 1>} : vector<1x128xi32>
    %c8_i32 = arith.constant 8 : i32
    %9 = vector.broadcast %c8_i32 : i32 to vector<1x128xi32>
    %10 = arith.cmpi slt, %8, %9 : vector<1x128xi32>
    %cst_6 = arith.constant 0.000000e+00 : f32
    %cst_7 = arith.constant -1.000000e+30 : f32
    %11 = vector.broadcast %cst_6 : f32 to vector<1x128xf32>
    %12 = vector.broadcast %cst_7 : f32 to vector<1x128xf32>
    %13 = arith.select %10, %11, %12 : vector<1x128xi1>, vector<1x128xf32>
    %14 = vector.extract_strided_slice %7 {offsets = [0, 0], sizes = [128, 4], strides = [1, 1]} : vector<128x96xbf16> to vector<128x4xbf16>
    %15 = vector.extract_strided_slice %7 {offsets = [0, 32], sizes = [128, 4], strides = [1, 1]} : vector<128x96xbf16> to vector<128x4xbf16>
    %16 = vector.extract_strided_slice %7 {offsets = [0, 64], sizes = [128, 4], strides = [1, 1]} : vector<128x96xbf16> to vector<128x4xbf16>
    %cst_8 = arith.constant dense<0.000000e+00> : vector<128x128xf32>
    %17 = tpu.matmul %14, %15, %cst_8 {dimension_numbers = #tpu.dot_dimension_numbers<[1], [1], [0], [0], [0, 0, 1, 0], [], []>} : vector<128x4xbf16>, vector<128x4xbf16>, vector<128x128xf32> -> vector<128x128xf32>
    %18 = vector.broadcast %13 : vector<1x128xf32> to vector<128x128xf32>
    %19 = arith.addf %17, %18 : vector<128x128xf32>
    %cst_9 = arith.constant dense<0xFF800000> : vector<128xf32>
    %20 = vector.multi_reduction <maximumf>, %19, %cst_9 [1] : vector<128x128xf32> to vector<128xf32>
    %21 = vector.shape_cast %20 : vector<128xf32> to vector<128x1xf32>
    %22 = vector.broadcast %21 : vector<128x1xf32> to vector<128x128xf32>
    %23 = arith.subf %19, %22 : vector<128x128xf32>
    %24 = math.exp %23 : vector<128x128xf32>
    %cst_10 = arith.constant dense<0.000000e+00> : vector<128xf32>
    %25 = vector.multi_reduction <add>, %24, %cst_10 [1] : vector<128x128xf32> to vector<128xf32>
    %26 = vector.shape_cast %25 : vector<128xf32> to vector<128x1xf32>
    %27 = arith.truncf %24 : vector<128x128xf32> to vector<128x128xbf16>
    %cst_11 = arith.constant dense<0.000000e+00> : vector<128x4xf32>
    %28 = tpu.matmul %27, %16, %cst_11 {dimension_numbers = #tpu.dot_dimension_numbers<[1], [0], [0], [1], [0, 0, 1, 1], [], []>} : vector<128x128xbf16>, vector<128x4xbf16>, vector<128x4xf32> -> vector<128x4xf32>
    %29 = tpu.reciprocal %26 {approx = true} : vector<128x1xf32> -> vector<128x1xf32>
    %30 = vector.broadcast %29 : vector<128x1xf32> to vector<128x4xf32>
    %31 = arith.mulf %28, %30 : vector<128x4xf32>
    %32 = arith.truncf %31 : vector<128x4xf32> to vector<128x4xbf16>
    %33 = vector.extract_strided_slice %7 {offsets = [0, 4], sizes = [128, 4], strides = [1, 1]} : vector<128x96xbf16> to vector<128x4xbf16>
    %34 = vector.extract_strided_slice %7 {offsets = [0, 36], sizes = [128, 4], strides = [1, 1]} : vector<128x96xbf16> to vector<128x4xbf16>
    %35 = vector.extract_strided_slice %7 {offsets = [0, 68], sizes = [128, 4], strides = [1, 1]} : vector<128x96xbf16> to vector<128x4xbf16>
    %cst_12 = arith.constant dense<0.000000e+00> : vector<128x128xf32>
    %36 = tpu.matmul %33, %34, %cst_12 {dimension_numbers = #tpu.dot_dimension_numbers<[1], [1], [0], [0], [0, 0, 1, 0], [], []>} : vector<128x4xbf16>, vector<128x4xbf16>, vector<128x128xf32> -> vector<128x128xf32>
    %37 = vector.broadcast %13 : vector<1x128xf32> to vector<128x128xf32>
    %38 = arith.addf %36, %37 : vector<128x128xf32>
    %cst_13 = arith.constant dense<0xFF800000> : vector<128xf32>
    %39 = vector.multi_reduction <maximumf>, %38, %cst_13 [1] : vector<128x128xf32> to vector<128xf32>
    %40 = vector.shape_cast %39 : vector<128xf32> to vector<128x1xf32>
    %41 = vector.broadcast %40 : vector<128x1xf32> to vector<128x128xf32>
    %42 = arith.subf %38, %41 : vector<128x128xf32>
    %43 = math.exp %42 : vector<128x128xf32>
    %cst_14 = arith.constant dense<0.000000e+00> : vector<128xf32>
    %44 = vector.multi_reduction <add>, %43, %cst_14 [1] : vector<128x128xf32> to vector<128xf32>
    %45 = vector.shape_cast %44 : vector<128xf32> to vector<128x1xf32>
    %46 = arith.truncf %43 : vector<128x128xf32> to vector<128x128xbf16>
    %cst_15 = arith.constant dense<0.000000e+00> : vector<128x4xf32>
    %47 = tpu.matmul %46, %35, %cst_15 {dimension_numbers = #tpu.dot_dimension_numbers<[1], [0], [0], [1], [0, 0, 1, 1], [], []>} : vector<128x128xbf16>, vector<128x4xbf16>, vector<128x4xf32> -> vector<128x4xf32>
    %48 = tpu.reciprocal %45 {approx = true} : vector<128x1xf32> -> vector<128x1xf32>
    %49 = vector.broadcast %48 : vector<128x1xf32> to vector<128x4xf32>
    %50 = arith.mulf %47, %49 : vector<128x4xf32>
    %51 = arith.truncf %50 : vector<128x4xf32> to vector<128x4xbf16>
    %52 = vector.extract_strided_slice %7 {offsets = [0, 8], sizes = [128, 4], strides = [1, 1]} : vector<128x96xbf16> to vector<128x4xbf16>
    %53 = vector.extract_strided_slice %7 {offsets = [0, 40], sizes = [128, 4], strides = [1, 1]} : vector<128x96xbf16> to vector<128x4xbf16>
    %54 = vector.extract_strided_slice %7 {offsets = [0, 72], sizes = [128, 4], strides = [1, 1]} : vector<128x96xbf16> to vector<128x4xbf16>
    %cst_16 = arith.constant dense<0.000000e+00> : vector<128x128xf32>
    %55 = tpu.matmul %52, %53, %cst_16 {dimension_numbers = #tpu.dot_dimension_numbers<[1], [1], [0], [0], [0, 0, 1, 0], [], []>} : vector<128x4xbf16>, vector<128x4xbf16>, vector<128x128xf32> -> vector<128x128xf32>
    %56 = vector.broadcast %13 : vector<1x128xf32> to vector<128x128xf32>
    %57 = arith.addf %55, %56 : vector<128x128xf32>
    %cst_17 = arith.constant dense<0xFF800000> : vector<128xf32>
    %58 = vector.multi_reduction <maximumf>, %57, %cst_17 [1] : vector<128x128xf32> to vector<128xf32>
    %59 = vector.shape_cast %58 : vector<128xf32> to vector<128x1xf32>
    %60 = vector.broadcast %59 : vector<128x1xf32> to vector<128x128xf32>
    %61 = arith.subf %57, %60 : vector<128x128xf32>
    %62 = math.exp %61 : vector<128x128xf32>
    %cst_18 = arith.constant dense<0.000000e+00> : vector<128xf32>
    %63 = vector.multi_reduction <add>, %62, %cst_18 [1] : vector<128x128xf32> to vector<128xf32>
    %64 = vector.shape_cast %63 : vector<128xf32> to vector<128x1xf32>
    %65 = arith.truncf %62 : vector<128x128xf32> to vector<128x128xbf16>
    %cst_19 = arith.constant dense<0.000000e+00> : vector<128x4xf32>
    %66 = tpu.matmul %65, %54, %cst_19 {dimension_numbers = #tpu.dot_dimension_numbers<[1], [0], [0], [1], [0, 0, 1, 1], [], []>} : vector<128x128xbf16>, vector<128x4xbf16>, vector<128x4xf32> -> vector<128x4xf32>
    %67 = tpu.reciprocal %64 {approx = true} : vector<128x1xf32> -> vector<128x1xf32>
    %68 = vector.broadcast %67 : vector<128x1xf32> to vector<128x4xf32>
    %69 = arith.mulf %66, %68 : vector<128x4xf32>
    %70 = arith.truncf %69 : vector<128x4xf32> to vector<128x4xbf16>
    %71 = vector.extract_strided_slice %7 {offsets = [0, 12], sizes = [128, 4], strides = [1, 1]} : vector<128x96xbf16> to vector<128x4xbf16>
    %72 = vector.extract_strided_slice %7 {offsets = [0, 44], sizes = [128, 4], strides = [1, 1]} : vector<128x96xbf16> to vector<128x4xbf16>
    %73 = vector.extract_strided_slice %7 {offsets = [0, 76], sizes = [128, 4], strides = [1, 1]} : vector<128x96xbf16> to vector<128x4xbf16>
    %cst_20 = arith.constant dense<0.000000e+00> : vector<128x128xf32>
    %74 = tpu.matmul %71, %72, %cst_20 {dimension_numbers = #tpu.dot_dimension_numbers<[1], [1], [0], [0], [0, 0, 1, 0], [], []>} : vector<128x4xbf16>, vector<128x4xbf16>, vector<128x128xf32> -> vector<128x128xf32>
    %75 = vector.broadcast %13 : vector<1x128xf32> to vector<128x128xf32>
    %76 = arith.addf %74, %75 : vector<128x128xf32>
    %cst_21 = arith.constant dense<0xFF800000> : vector<128xf32>
    %77 = vector.multi_reduction <maximumf>, %76, %cst_21 [1] : vector<128x128xf32> to vector<128xf32>
    %78 = vector.shape_cast %77 : vector<128xf32> to vector<128x1xf32>
    %79 = vector.broadcast %78 : vector<128x1xf32> to vector<128x128xf32>
    %80 = arith.subf %76, %79 : vector<128x128xf32>
    %81 = math.exp %80 : vector<128x128xf32>
    %cst_22 = arith.constant dense<0.000000e+00> : vector<128xf32>
    %82 = vector.multi_reduction <add>, %81, %cst_22 [1] : vector<128x128xf32> to vector<128xf32>
    %83 = vector.shape_cast %82 : vector<128xf32> to vector<128x1xf32>
    %84 = arith.truncf %81 : vector<128x128xf32> to vector<128x128xbf16>
    %cst_23 = arith.constant dense<0.000000e+00> : vector<128x4xf32>
    %85 = tpu.matmul %84, %73, %cst_23 {dimension_numbers = #tpu.dot_dimension_numbers<[1], [0], [0], [1], [0, 0, 1, 1], [], []>} : vector<128x128xbf16>, vector<128x4xbf16>, vector<128x4xf32> -> vector<128x4xf32>
    %86 = tpu.reciprocal %83 {approx = true} : vector<128x1xf32> -> vector<128x1xf32>
    %87 = vector.broadcast %86 : vector<128x1xf32> to vector<128x4xf32>
    %88 = arith.mulf %85, %87 : vector<128x4xf32>
    %89 = arith.truncf %88 : vector<128x4xf32> to vector<128x4xbf16>
    %90 = vector.extract_strided_slice %7 {offsets = [0, 16], sizes = [128, 4], strides = [1, 1]} : vector<128x96xbf16> to vector<128x4xbf16>
    %91 = vector.extract_strided_slice %7 {offsets = [0, 48], sizes = [128, 4], strides = [1, 1]} : vector<128x96xbf16> to vector<128x4xbf16>
    %92 = vector.extract_strided_slice %7 {offsets = [0, 80], sizes = [128, 4], strides = [1, 1]} : vector<128x96xbf16> to vector<128x4xbf16>
    %cst_24 = arith.constant dense<0.000000e+00> : vector<128x128xf32>
    %93 = tpu.matmul %90, %91, %cst_24 {dimension_numbers = #tpu.dot_dimension_numbers<[1], [1], [0], [0], [0, 0, 1, 0], [], []>} : vector<128x4xbf16>, vector<128x4xbf16>, vector<128x128xf32> -> vector<128x128xf32>
    %94 = vector.broadcast %13 : vector<1x128xf32> to vector<128x128xf32>
    %95 = arith.addf %93, %94 : vector<128x128xf32>
    %cst_25 = arith.constant dense<0xFF800000> : vector<128xf32>
    %96 = vector.multi_reduction <maximumf>, %95, %cst_25 [1] : vector<128x128xf32> to vector<128xf32>
    %97 = vector.shape_cast %96 : vector<128xf32> to vector<128x1xf32>
    %98 = vector.broadcast %97 : vector<128x1xf32> to vector<128x128xf32>
    %99 = arith.subf %95, %98 : vector<128x128xf32>
    %100 = math.exp %99 : vector<128x128xf32>
    %cst_26 = arith.constant dense<0.000000e+00> : vector<128xf32>
    %101 = vector.multi_reduction <add>, %100, %cst_26 [1] : vector<128x128xf32> to vector<128xf32>
    %102 = vector.shape_cast %101 : vector<128xf32> to vector<128x1xf32>
    %103 = arith.truncf %100 : vector<128x128xf32> to vector<128x128xbf16>
    %cst_27 = arith.constant dense<0.000000e+00> : vector<128x4xf32>
    %104 = tpu.matmul %103, %92, %cst_27 {dimension_numbers = #tpu.dot_dimension_numbers<[1], [0], [0], [1], [0, 0, 1, 1], [], []>} : vector<128x128xbf16>, vector<128x4xbf16>, vector<128x4xf32> -> vector<128x4xf32>
    %105 = tpu.reciprocal %102 {approx = true} : vector<128x1xf32> -> vector<128x1xf32>
    %106 = vector.broadcast %105 : vector<128x1xf32> to vector<128x4xf32>
    %107 = arith.mulf %104, %106 : vector<128x4xf32>
    %108 = arith.truncf %107 : vector<128x4xf32> to vector<128x4xbf16>
    %109 = vector.extract_strided_slice %7 {offsets = [0, 20], sizes = [128, 4], strides = [1, 1]} : vector<128x96xbf16> to vector<128x4xbf16>
    %110 = vector.extract_strided_slice %7 {offsets = [0, 52], sizes = [128, 4], strides = [1, 1]} : vector<128x96xbf16> to vector<128x4xbf16>
    %111 = vector.extract_strided_slice %7 {offsets = [0, 84], sizes = [128, 4], strides = [1, 1]} : vector<128x96xbf16> to vector<128x4xbf16>
    %cst_28 = arith.constant dense<0.000000e+00> : vector<128x128xf32>
    %112 = tpu.matmul %109, %110, %cst_28 {dimension_numbers = #tpu.dot_dimension_numbers<[1], [1], [0], [0], [0, 0, 1, 0], [], []>} : vector<128x4xbf16>, vector<128x4xbf16>, vector<128x128xf32> -> vector<128x128xf32>
    %113 = vector.broadcast %13 : vector<1x128xf32> to vector<128x128xf32>
    %114 = arith.addf %112, %113 : vector<128x128xf32>
    %cst_29 = arith.constant dense<0xFF800000> : vector<128xf32>
    %115 = vector.multi_reduction <maximumf>, %114, %cst_29 [1] : vector<128x128xf32> to vector<128xf32>
    %116 = vector.shape_cast %115 : vector<128xf32> to vector<128x1xf32>
    %117 = vector.broadcast %116 : vector<128x1xf32> to vector<128x128xf32>
    %118 = arith.subf %114, %117 : vector<128x128xf32>
    %119 = math.exp %118 : vector<128x128xf32>
    %cst_30 = arith.constant dense<0.000000e+00> : vector<128xf32>
    %120 = vector.multi_reduction <add>, %119, %cst_30 [1] : vector<128x128xf32> to vector<128xf32>
    %121 = vector.shape_cast %120 : vector<128xf32> to vector<128x1xf32>
    %122 = arith.truncf %119 : vector<128x128xf32> to vector<128x128xbf16>
    %cst_31 = arith.constant dense<0.000000e+00> : vector<128x4xf32>
    %123 = tpu.matmul %122, %111, %cst_31 {dimension_numbers = #tpu.dot_dimension_numbers<[1], [0], [0], [1], [0, 0, 1, 1], [], []>} : vector<128x128xbf16>, vector<128x4xbf16>, vector<128x4xf32> -> vector<128x4xf32>
    %124 = tpu.reciprocal %121 {approx = true} : vector<128x1xf32> -> vector<128x1xf32>
    %125 = vector.broadcast %124 : vector<128x1xf32> to vector<128x4xf32>
    %126 = arith.mulf %123, %125 : vector<128x4xf32>
    %127 = arith.truncf %126 : vector<128x4xf32> to vector<128x4xbf16>
    %128 = vector.extract_strided_slice %7 {offsets = [0, 24], sizes = [128, 4], strides = [1, 1]} : vector<128x96xbf16> to vector<128x4xbf16>
    %129 = vector.extract_strided_slice %7 {offsets = [0, 56], sizes = [128, 4], strides = [1, 1]} : vector<128x96xbf16> to vector<128x4xbf16>
    %130 = vector.extract_strided_slice %7 {offsets = [0, 88], sizes = [128, 4], strides = [1, 1]} : vector<128x96xbf16> to vector<128x4xbf16>
    %cst_32 = arith.constant dense<0.000000e+00> : vector<128x128xf32>
    %131 = tpu.matmul %128, %129, %cst_32 {dimension_numbers = #tpu.dot_dimension_numbers<[1], [1], [0], [0], [0, 0, 1, 0], [], []>} : vector<128x4xbf16>, vector<128x4xbf16>, vector<128x128xf32> -> vector<128x128xf32>
    %132 = vector.broadcast %13 : vector<1x128xf32> to vector<128x128xf32>
    %133 = arith.addf %131, %132 : vector<128x128xf32>
    %cst_33 = arith.constant dense<0xFF800000> : vector<128xf32>
    %134 = vector.multi_reduction <maximumf>, %133, %cst_33 [1] : vector<128x128xf32> to vector<128xf32>
    %135 = vector.shape_cast %134 : vector<128xf32> to vector<128x1xf32>
    %136 = vector.broadcast %135 : vector<128x1xf32> to vector<128x128xf32>
    %137 = arith.subf %133, %136 : vector<128x128xf32>
    %138 = math.exp %137 : vector<128x128xf32>
    %cst_34 = arith.constant dense<0.000000e+00> : vector<128xf32>
    %139 = vector.multi_reduction <add>, %138, %cst_34 [1] : vector<128x128xf32> to vector<128xf32>
    %140 = vector.shape_cast %139 : vector<128xf32> to vector<128x1xf32>
    %141 = arith.truncf %138 : vector<128x128xf32> to vector<128x128xbf16>
    %cst_35 = arith.constant dense<0.000000e+00> : vector<128x4xf32>
    %142 = tpu.matmul %141, %130, %cst_35 {dimension_numbers = #tpu.dot_dimension_numbers<[1], [0], [0], [1], [0, 0, 1, 1], [], []>} : vector<128x128xbf16>, vector<128x4xbf16>, vector<128x4xf32> -> vector<128x4xf32>
    %143 = tpu.reciprocal %140 {approx = true} : vector<128x1xf32> -> vector<128x1xf32>
    %144 = vector.broadcast %143 : vector<128x1xf32> to vector<128x4xf32>
    %145 = arith.mulf %142, %144 : vector<128x4xf32>
    %146 = arith.truncf %145 : vector<128x4xf32> to vector<128x4xbf16>
    %147 = vector.extract_strided_slice %7 {offsets = [0, 28], sizes = [128, 4], strides = [1, 1]} : vector<128x96xbf16> to vector<128x4xbf16>
    %148 = vector.extract_strided_slice %7 {offsets = [0, 60], sizes = [128, 4], strides = [1, 1]} : vector<128x96xbf16> to vector<128x4xbf16>
    %149 = vector.extract_strided_slice %7 {offsets = [0, 92], sizes = [128, 4], strides = [1, 1]} : vector<128x96xbf16> to vector<128x4xbf16>
    %cst_36 = arith.constant dense<0.000000e+00> : vector<128x128xf32>
    %150 = tpu.matmul %147, %148, %cst_36 {dimension_numbers = #tpu.dot_dimension_numbers<[1], [1], [0], [0], [0, 0, 1, 0], [], []>} : vector<128x4xbf16>, vector<128x4xbf16>, vector<128x128xf32> -> vector<128x128xf32>
    %151 = vector.broadcast %13 : vector<1x128xf32> to vector<128x128xf32>
    %152 = arith.addf %150, %151 : vector<128x128xf32>
    %cst_37 = arith.constant dense<0xFF800000> : vector<128xf32>
    %153 = vector.multi_reduction <maximumf>, %152, %cst_37 [1] : vector<128x128xf32> to vector<128xf32>
    %154 = vector.shape_cast %153 : vector<128xf32> to vector<128x1xf32>
    %155 = vector.broadcast %154 : vector<128x1xf32> to vector<128x128xf32>
    %156 = arith.subf %152, %155 : vector<128x128xf32>
    %157 = math.exp %156 : vector<128x128xf32>
    %cst_38 = arith.constant dense<0.000000e+00> : vector<128xf32>
    %158 = vector.multi_reduction <add>, %157, %cst_38 [1] : vector<128x128xf32> to vector<128xf32>
    %159 = vector.shape_cast %158 : vector<128xf32> to vector<128x1xf32>
    %160 = arith.truncf %157 : vector<128x128xf32> to vector<128x128xbf16>
    %cst_39 = arith.constant dense<0.000000e+00> : vector<128x4xf32>
    %161 = tpu.matmul %160, %149, %cst_39 {dimension_numbers = #tpu.dot_dimension_numbers<[1], [0], [0], [1], [0, 0, 1, 1], [], []>} : vector<128x128xbf16>, vector<128x4xbf16>, vector<128x4xf32> -> vector<128x4xf32>
    %162 = tpu.reciprocal %159 {approx = true} : vector<128x1xf32> -> vector<128x1xf32>
    %163 = vector.broadcast %162 : vector<128x1xf32> to vector<128x4xf32>
    %164 = arith.mulf %161, %163 : vector<128x4xf32>
    %165 = arith.truncf %164 : vector<128x4xf32> to vector<128x4xbf16>
    %166 = tpu.concatenate %32, %51, %70, %89, %108, %127, %146, %165 in 1 : vector<128x4xbf16>, vector<128x4xbf16>, vector<128x4xbf16>, vector<128x4xbf16>, vector<128x4xbf16>, vector<128x4xbf16>, vector<128x4xbf16>, vector<128x4xbf16> -> vector<128x32xbf16>
    %c0_40 = arith.constant 0 : index
    %c0_41 = arith.constant 0 : index
    %167 = vector.load %arg4[%c0_40, %c0_41] : memref<32x32xbf16, #tpu.memory_space<vmem>>, vector<32x32xbf16>
    %cst_42 = arith.constant dense<0.000000e+00> : vector<128x32xf32>
    %168 = tpu.matmul %166, %167, %cst_42 {dimension_numbers = #tpu.dot_dimension_numbers<[1], [0], [0], [1], [0, 0, 1, 1], [], []>} : vector<128x32xbf16>, vector<32x32xbf16>, vector<128x32xf32> -> vector<128x32xf32>
    %c0_43 = arith.constant 0 : index
    %c0_44 = arith.constant 0 : index
    %169 = vector.load %arg5[%c0_43, %c0_44] : memref<1x32xf32, #tpu.memory_space<vmem>>, vector<1x32xf32>
    %170 = vector.broadcast %169 : vector<1x32xf32> to vector<128x32xf32>
    %171 = arith.addf %168, %170 : vector<128x32xf32>
    %c0_45 = arith.constant 0 : index
    %c0_46 = arith.constant 0 : index
    %c0_47 = arith.constant 0 : index
    %172 = vector.load %arg6[%c0_45, %c0_46, %c0_47] : memref<1x128x32xf32, #tpu.memory_space<vmem>>, vector<1x128x32xf32>
    %173 = vector.shape_cast %172 : vector<1x128x32xf32> to vector<128x32xf32>
    %174 = vector.shape_cast %171 : vector<128x32xf32> to vector<1x128x32xf32>
    tpu.vector_store %arg6[%c0_45, %c0_46, %c0_47], %174 {strides = array<i32>} : memref<1x128x32xf32, #tpu.memory_space<vmem>>, vector<1x128x32xf32>,
    return
  }
  func.func @transform_0(%arg0: i32) -> (i32, i32, i32) {
    %c0_i32 = arith.constant 0 : i32
    %c0_i32_0 = arith.constant 0 : i32
    %c0_i32_1 = arith.constant 0 : i32
    return %arg0, %c0_i32, %c0_i32_0 : i32, i32, i32
  }
  func.func @transform_1(%arg0: i32) -> (i32, i32) {
    %c0_i32 = arith.constant 0 : i32
    %c0_i32_0 = arith.constant 0 : i32
    %c0_i32_1 = arith.constant 0 : i32
    return %c0_i32, %c0_i32_0 : i32, i32
  }
  func.func @transform_2(%arg0: i32) -> (i32, i32) {
    %c0_i32 = arith.constant 0 : i32
    %c0_i32_0 = arith.constant 0 : i32
    %c0_i32_1 = arith.constant 0 : i32
    return %c0_i32, %c0_i32_0 : i32, i32
  }
  func.func @transform_3(%arg0: i32) -> (i32, i32) {
    %c0_i32 = arith.constant 0 : i32
    %c0_i32_0 = arith.constant 0 : i32
    %c0_i32_1 = arith.constant 0 : i32
    return %c0_i32, %c0_i32_0 : i32, i32
  }
  func.func @transform_4(%arg0: i32) -> (i32, i32) {
    %c0_i32 = arith.constant 0 : i32
    %c0_i32_0 = arith.constant 0 : i32
    %c0_i32_1 = arith.constant 0 : i32
    return %c0_i32, %c0_i32_0 : i32, i32
  }
  func.func @transform_5(%arg0: i32) -> (i32, i32, i32) {
    %c0_i32 = arith.constant 0 : i32
    %c0_i32_0 = arith.constant 0 : i32
    %c0_i32_1 = arith.constant 0 : i32
    return %arg0, %c0_i32, %c0_i32_0 : i32, i32, i32
  }
}

</mosaic_0001>

<bundles_post_ra>
// kernel: attention_forward.1
= control target key start
LH: loop header
LB: loop body
LE: loop exit
PB: predicated region body
PF: predicated region fallthrough
CT: control target
= control target key end

     0   :  { %s6244_s18 = smov 0   ;;  %s9057_s0 = inlined_call_operand.vmem [shape: bf16[2,128,32], index: 0, kind: input, shape index: {}]   ;;  %s9058_s1 = inlined_call_operand.vmem [shape: bf16[32,96], index: 1, kind: input, shape index: {}]   ;;  %s9059_s2 = inlined_call_operand.vmem [shape: f32[1,96], index: 2, kind: input, shape index: {}]   ;;  %s9060_s3 = inlined_call_operand.vmem [shape: bf16[32,32], index: 3, kind: input, shape index: {}]   ;;  %s9061_s4 = inlined_call_operand.vmem [shape: f32[1,32], index: 4, kind: input, shape index: {}]   ;;  %s9062_s5 = inlined_call_operand.vmem [shape: f32[2,128,32], index: 5, kind: output, shape index: {}]  }
   0x1 LB: > { %s4597_s19 = sadd.s32 4294967295, %s6181_s18   ;;  %p4601_p0 = scmp.ge.s32.totalorder %s6181_s18, 1  ;;  %s6181_s18 = sphi %s6244_s18, %s15_s18  }
   0x2   : > { %p187_p1 = scmp.lt.s32.totalorder %s6181_s18, 3 }
   0x4   : > { %p188_p2 = pnand %p4601_p0, %p187_p1 }
   0x6   : > { %191 = sbr.rel (%p188_p2) target bundleno = 4615 (0x1207), region = 40 }
   0xd   : > { %v5651_v0 = vld [vmem:[%s9058_s1] sm:$0xff]   ;;  %p215_p3 = scmp.lt.s32.totalorder %s4597_s19, 1  ;;  %v5652_v1 = vld [vmem:[%s9058_s1 + $0x8] sm:$0xff]   ;;  %vm305_vm0 = vcmask 261120   ;;  %vm463_vm1 = vcmask 31744   ;;  %s6183_s30 = smov 96  }
   0xe   : > { %4980 = vmatprep.subr.bf16.mxu0 %v5651_v0  ;;  %v4606_v11 = vld [vmem:[%s9059_s2] ss:$0 sm:$0xff]  ;;  %s6184_s6 = smov 64   ;;  %s6185_s7 = smov 92   ;;  %vm4288_vm3 = vcmask 64512   ;;  %vm4305_vm4 = vcmask 97280  }
   0xf   : > { %s9599_s19 = smov (!%p215_p3, %s4597_s19), 1  ;;  %4981 = vmatpush3.bf16.msra.mxu0 %v5651_v0  ;;  %s6187_s8 = smov 124   ;;  %vm4322_vm5 = vcmask 130048   ;;  %vm4339_vm6 = vcmask 162816   ;;  %vm4356_vm7 = vcmask 195584   ;;  %vm4373_vm8 = vcmask 228352  }
  0x10   : > { %4982 = vmatprep.subr.bf16.mxu0 %v5652_v1  ;;  %s4702_s24 = sshll.u32 %s9599_s19, 6  ;;  %s6188_s9 = smov 60  }
  0x11   : > { %s219_s27 = scalar_lea.vmem %s9057_s0, %s4702_s24  ;;  %s6189_s10 = smov 88  }
  0x12   : > { %v5653_v2 = vld [vmem:[%s219_s27] sm:$0xff]   ;;  %v5654_v3 = vld [vmem:[%s219_s27 + $0x8] sm:$0xff]   ;;  %v5655_v4 = vld [vmem:[%s219_s27 + $0x10] sm:$0xff]   ;;  %s6190_s11 = smov 120   ;;  %s6191_s12 = smov 56  }
  0x13   : > { %4983 = vmatpush3.bf16.msra.mxu0 %v5652_v1  ;;  %4984 = vmatprep.mubr.msk.bf16.mxu0 %vm305_vm0, %v5653_v2  ;;  %v5656_v5 = vld [vmem:[%s219_s27 + $0x18] sm:$0xff]   ;;  %v5657_v6 = vld [vmem:[%s219_s27 + $0x20] sm:$0xff]   ;;  %v5658_v7 = vld [vmem:[%s219_s27 + $0x28] sm:$0xff]   ;;  %s6192_s13 = smov 84   ;;  %s6193_s14 = smov 116  }
  0x14   : > { %v5659_v8 = vld [vmem:[%s219_s27 + $0x30] sm:$0xff]   ;;  %v5660_v9 = vld [vmem:[%s219_s27 + $0x38] sm:$0xff]   ;;  %s6194_s15 = smov 52   ;;  %s6195_s16 = smov 80  }
  0x15   : > { %s6196_s17 = smov 112   ;;  %s6197_s20 = smov 48  }
  0x16   : > { %4985 = vmatmul.mubr.msk.bf16.vlgmr.msra.gmra.mrb[0].mxu0 %vm305_vm0, %v5654_v3  ;;  %s6198_s21 = smov 76   ;;  %s6199_s22 = smov 108  }
  0x17   : > { %4988 = vmatprep.mubr.msk.bf16.mxu0 %vm305_vm0, %v5655_v4  ;;  %s6200_s23 = smov 44   ;;  %s6201_s24 = smov 72  }
  0x18   : > { %s6202_s25 = smov 104   ;;  %s6203_s26 = smov 40  }
  0x19   : > { %s6204_s27 = smov 68   ;;  %s6205_s28 = smov 100  }
  0x1a   : > { %s6206_s29 = smov 36  }
  0x1e   : > { %4989 = vmatmul.mubr.msk.bf16.gmra.mrb[4].mxu0 %vm305_vm0, %v5656_v5 }
  0x1f   : > { %4992 = vmatprep.mubr.msk.bf16.mxu0 %vm305_vm0, %v5657_v6 }
  0x26   : > { %4993 = vmatmul.mubr.msk.bf16.gmra.mrb[8].mxu0 %vm305_vm0, %v5658_v7 }
  0x27   : > { %4996 = vmatprep.mubr.msk.bf16.mxu0 %vm305_vm0, %v5659_v8 }
  0x2e   : > { %4997 = vmatmul.mubr.msk.bf16.gmra.mrb[12].mxu0 %vm305_vm0, %v5660_v9 }
  0xe9   : > { %v4986_v10 = vpop.f32.mrb[0].mxu0 }
  0xea   : > { %v364_v12 = vpop.f32.mrb[1].mxu0  ;;  %v373_v14 = vadd.f32 %v4986_v10, %v4606_v11 }
  0xeb   : > { %v4987_v13 = vpop.f32.mrb[2].mxu0  ;;  %v365_v17 = vadd.f32 %v4606_v11, %v364_v12 }
  0xec   : > { %v376_v15 = vadd.f32 %v4987_v13, %v4606_v11  ;;  %v367_v16 = vpop.f32.mrb[3].mxu0 }
  0xed   : > { %v368_v18 = vadd.f32 %v4606_v11, %v367_v16  ;;  %v6186_v16 = vmov -1e+30  }
  0xee   : > { %v6275_v19 = vpack.c.bf16 %v376_v15, %v373_v14  ;;  %v435_v14 = vlaneseq }
  0xef   : > { %v6277_v20 = vpack.c.bf16 %v368_v18, %v365_v17 }
  0xf0   : > { %v436_v15 = vand.u32 127, %v435_v14 }
  0xf1   : > { %447 = vrot.lane.b32.xlu0 %v6277_v20, %s6183_s30  ;;  %5016 = vmatprep.mubr.msk.bf16.mxu1 %vm463_vm1, %v6277_v20  ;;  %v4990_v21 = vpop.f32.mrb[4].mxu0 }
  0xf2   : > { %v389_v22 = vadd.f32 %v4990_v21, %v4606_v11  ;;  %v380_v23 = vpop.f32.mrb[5].mxu0  ;;  %vm437_vm2 = vcmp.lt.s32.totalorder %v436_v15, 8 }
  0xf3   : > { %v381_v24 = vadd.f32 %v4606_v11, %v380_v23  ;;  %v4991_v25 = vpop.f32.mrb[6].mxu0  ;;  %v6363_v17 = vsel %vm437_vm2, 0.0, %v6186_v16 }
  0xf4   : > { %v392_v26 = vadd.f32 %v4991_v25, %v4606_v11  ;;  %v383_v27 = vpop.f32.mrb[7].mxu0 }
  0xf5   : > { %v384_v28 = vadd.f32 %v4606_v11, %v383_v27  ;;  %449 = vrot.lane.b32.xlu0 %v6275_v19, %s6183_s30 }
  0xf6   : > { %v6285_v29 = vpack.c.bf16 %v392_v26, %v389_v22 }
  0xf7   : > { %v6287_v30 = vpack.c.bf16 %v384_v28, %v381_v24 }
  0xf9   : > { %451 = vrot.lane.b32.xlu1 %v6287_v30, %s6183_s30  ;;  %v4994_v31 = vpop.f32.mrb[8].mxu0 }
  0xfa   : > { %v405_v32 = vadd.f32 %v4994_v31, %v4606_v11  ;;  %v396_v33 = vpop.f32.mrb[9].mxu0 }
  0xfb   : > { %v397_v34 = vadd.f32 %v4606_v11, %v396_v33  ;;  %v4995_v35 = vpop.f32.mrb[10].mxu0 }
  0xfc   : > { %v408_v36 = vadd.f32 %v4995_v35, %v4606_v11  ;;  %v399_v37 = vpop.f32.mrb[11].mxu0 }
  0xfd   : > { %453 = vrot.lane.b32.xlu1 %v6285_v29, %s6183_s30  ;;  %v400_v38 = vadd.f32 %v4606_v11, %v399_v37 }
  0xfe   : > { %v6293_v39 = vpack.c.bf16 %v408_v36, %v405_v32 }
  0xff   : > { %v6295_v40 = vpack.c.bf16 %v400_v38, %v397_v34 }
 0x101   : > { %v4998_v41 = vpop.f32.mrb[12].mxu0  ;;  %457 = vrot.lane.b32.xlu1 %v6293_v39, %s6183_s30  ;;  %455 = vrot.lane.b32.xlu0 %v6295_v40, %s6183_s30 }
 0x102   : > { %v421_v42 = vadd.f32 %v4998_v41, %v4606_v11  ;;  %v412_v43 = vpop.f32.mrb[13].mxu0 }
 0x103   : > { %v413_v44 = vadd.f32 %v4606_v11, %v412_v43  ;;  %v4999_v45 = vpop.f32.mrb[14].mxu0 }
 0x104   : > { %v424_v46 = vadd.f32 %v4999_v45, %v4606_v11  ;;  %v415_v47 = vpop.f32.mrb[15].mxu0 }
 0x105   : > { %v416_v48 = vadd.f32 %v4606_v11, %v415_v47 }
 0x106   : > { %v6301_v49 = vpack.c.bf16 %v424_v46, %v421_v42 }
 0x107   : > { %v6303_v50 = vpack.c.bf16 %v416_v48, %v413_v44 }
 0x108   : > { %461 = vrot.lane.b32.xlu1 %v6301_v49, %s6183_s30 }
 0x109   : > { %459 = vrot.lane.b32.xlu0 %v6303_v50, %s6183_s30  ;;  %s6207_s30 = smov 4  }
 0x10c   : > { %731 = vrot.lane.b32.xlu1 %v6275_v19, %s6184_s6 }
 0x10d   : > { %729 = vrot.lane.b32.xlu0 %v6277_v20, %s6184_s6 }
 0x110   : > { %733 = vrot.lane.b32.xlu1 %v6287_v30, %s6184_s6 }
 0x111   : > { %735 = vrot.lane.b32.xlu0 %v6285_v29, %s6184_s6 }
 0x114   : > { %737 = vrot.lane.b32.xlu1 %v6295_v40, %s6184_s6 }
 0x115   : > { %906 = vrot.lane.b32.xlu0 %v6277_v20, %s6185_s7 }
 0x118   : > { %739 = vrot.lane.b32.xlu1 %v6293_v39, %s6184_s6 }
 0x119   : > { %908 = vrot.lane.b32.xlu0 %v6275_v19, %s6185_s7 }
 0x11c   : > { %743 = vrot.lane.b32.xlu1 %v6301_v49, %s6184_s6 }
 0x11d   : > { %912 = vrot.lane.b32.xlu0 %v6285_v29, %s6185_s7 }
 0x120   : > { %910 = vrot.lane.b32.xlu1 %v6287_v30, %s6185_s7 }
 0x121   : > { %741 = vrot.lane.b32.xlu0 %v6303_v50, %s6184_s6  ;;  %s6208_s6 = smov 12  }
 0x163   : > { %v448_v51 = vpop.permute.xlu0 %447 }
 0x164   : > { %5548 = vmatprep.subr.msk.bf16.mxu1 %vm463_vm1, %v448_v51  ;;  %v489_v52 = vsel %vm463_vm1, %v448_v51, 0 }
 0x165   : > { %5001 = vmatpush3.bf16.xpose.msra.mxu1 %v489_v52 }
 0x167   : > { %v450_v53 = vpop.permute.xlu0 %449 }
 0x168   : > { %5549 = vmatprep.subr.msk.bf16.mxu1 %vm463_vm1, %v450_v53  ;;  %v492_v55 = vsel %vm463_vm1, %v450_v53, 0 }
 0x16b   : > { %v452_v54 = vpop.permute.xlu1 %451 }
 0x16c   : > { %v495_v57 = vsel %vm463_vm1, %v452_v54, 0 }
 0x16d   : > { %5003 = vmatpush3.bf16.xpose.msra.mxu1 %v492_v55 }
 0x16e   : > { %5550 = vmatprep.subr.msk.bf16.mxu1 %vm463_vm1, %v452_v54 }
 0x16f   : > { %v454_v56 = vpop.permute.xlu1 %453 }
 0x170   : > { %v498_v62 = vsel %vm463_vm1, %v454_v56, 0 }
 0x173   : > { %v458_v58 = vpop.permute.xlu1 %457  ;;  %v456_v59 = vpop.permute.xlu0 %455 }
 0x174   : > { %v501_v2 = vsel %vm463_vm1, %v456_v59, 0  ;;  %v504_v7 = vsel %vm463_vm1, %v458_v58, 0 }
 0x175   : > { %5005 = vmatpush3.bf16.xpose.msra.mxu1 %v495_v57 }
 0x176   : > { %5551 = vmatprep.subr.msk.bf16.mxu1 %vm463_vm1, %v454_v56 }
 0x17a   : > { %v462_v60 = vpop.permute.xlu1 %461 }
 0x17b   : > { %v460_v61 = vpop.permute.xlu0 %459  ;;  %v510_v13 = vsel %vm463_vm1, %v462_v60, 0 }
 0x17c   : > { %v507_v10 = vsel %vm463_vm1, %v460_v61, 0 }
 0x17d   : > { %5007 = vmatpush3.bf16.xpose.msra.mxu1 %v498_v62 }
 0x17e   : > { %5552 = vmatprep.subr.msk.bf16.mxu1 %vm463_vm1, %v456_v59  ;;  %v732_v63 = vpop.permute.xlu1 %731 }
 0x17f   : > { %v730_v0 = vpop.permute.xlu0 %729 }
 0x180   : > { %5032 = vmatprep.subr.bf16.mxu0 %v730_v0 }
 0x181   : > { %5033 = vmatpush3.bf16.msra.mxu0 %v730_v0 }
 0x182   : > { %5034 = vmatprep.subr.bf16.mxu0 %v732_v63  ;;  %v734_v3 = vpop.permute.xlu1 %733 }
 0x183   : > { %v736_v1 = vpop.permute.xlu0 %735 }
 0x185   : > { %5009 = vmatpush3.bf16.xpose.msra.mxu1 %v501_v2  ;;  %5035 = vmatpush3.bf16.msra.mxu0 %v732_v63 }
 0x186   : > { %5553 = vmatprep.subr.msk.bf16.mxu1 %vm463_vm1, %v458_v58  ;;  %5036 = vmatprep.subr.bf16.mxu0 %v734_v3  ;;  %v738_v5 = vpop.permute.xlu1 %737 }
 0x187   : > { %v6336_v4 = vpop.permute.xlu0 %906 }
 0x189   : > { %5037 = vmatpush3.bf16.msra.mxu0 %v734_v3 }
 0x18a   : > { %5038 = vmatprep.subr.bf16.mxu0 %v736_v1  ;;  %v740_v9 = vpop.permute.xlu1 %739 }
 0x18b   : > { %v6338_v6 = vpop.permute.xlu0 %908 }
 0x18d   : > { %5011 = vmatpush3.bf16.xpose.msra.mxu1 %v504_v7  ;;  %5039 = vmatpush3.bf16.msra.mxu0 %v736_v1 }
 0x18e   : > { %5040 = vmatprep.subr.bf16.mxu0 %v738_v5  ;;  %5554 = vmatprep.subr.msk.bf16.mxu1 %vm463_vm1, %v460_v61  ;;  %v744_v12 = vpop.permute.xlu1 %743 }
 0x18f   : > { %v6342_v8 = vpop.permute.xlu0 %912 }
 0x191   : > { %5041 = vmatpush3.bf16.msra.mxu0 %v738_v5 }
 0x192   : > { %5042 = vmatprep.subr.bf16.mxu0 %v740_v9  ;;  %v6457_v58 = vpop.permute.xlu1 %910 }
 0x193   : > { %v742_v11 = vpop.permute.xlu0 %741 }
 0x195   : > { %5013 = vmatpush3.bf16.xpose.msra.mxu1 %v507_v10  ;;  %5043 = vmatpush3.bf16.msra.mxu0 %v740_v9 }
 0x196   : > { %5555 = vmatprep.subr.msk.bf16.mxu1 %vm463_vm1, %v462_v60  ;;  %5044 = vmatprep.subr.bf16.mxu0 %v742_v11 }
 0x199   : > { %5045 = vmatpush3.bf16.msra.mxu0 %v742_v11 }
 0x19a   : > { %5046 = vmatprep.subr.bf16.mxu0 %v744_v12 }
 0x19d   : > { %5015 = vmatpush3.bf16.xpose.msra.mxu1 %v510_v13  ;;  %5047 = vmatpush3.bf16.msra.mxu0 %v744_v12 }
 0x19e   : > { %5556 = vmatprep.subr.msk.bf16.mxu0 %vm463_vm1, %v6336_v4 }
 0x1a4   : > { %5017 = vmatmul.mubr.msk.bf16.vlgmr.msra.gmra.mrb[0].mxu1 %vm463_vm1, %v6275_v19 }
 0x1a5   : > { %5020 = vmatprep.mubr.msk.bf16.mxu1 %vm463_vm1, %v6287_v30 }
 0x1ac   : > { %5021 = vmatmul.mubr.msk.bf16.gmra.mrb[4].mxu1 %vm463_vm1, %v6285_v29 }
 0x1ad   : > { %5024 = vmatprep.mubr.msk.bf16.mxu1 %vm463_vm1, %v6295_v40 }
 0x1b4   : > { %5025 = vmatmul.mubr.msk.bf16.gmra.mrb[8].mxu1 %vm463_vm1, %v6293_v39 }
 0x1b5   : > { %5028 = vmatprep.mubr.msk.bf16.mxu1 %vm463_vm1, %v6303_v50 }
 0x1bc   : > { %5029 = vmatmul.mubr.msk.bf16.gmra.mrb[12].mxu1 %vm463_vm1, %v6301_v49 }
 0x277   : > { %v5018_v18 = vpop.f32.mrb[0].mxu1 }
 0x278   : > { %v6366_v21 = vadd.f32 %v5018_v18, %v6363_v17  ;;  %v546_v22 = vpop.f32.mrb[1].mxu1 }
 0x279   : > { %v5019_v23 = vpop.f32.mrb[2].mxu1  ;;  %v6373_v26 = vadd.f32 %v546_v22, %v6363_v17 }
 0x27a   : > { %613 = vmax.xlane.f32.xlu0 %v6366_v21  ;;  %v549_v24 = vpop.f32.mrb[3].mxu1  ;;  %v6378_v28 = vadd.f32 %v5019_v23, %v6363_v17 }
 0x27b   : > { %v6370_v25 = vadd.f32 %v549_v24, %v6363_v17 }
 0x27d   : > { %611 = vmax.xlane.f32.xlu1 %v6370_v25 }
 0x27e   : > { %609 = vmax.xlane.f32.xlu0 %v6373_v26 }
 0x27f   : > { %v5022_v27 = vpop.f32.mrb[4].mxu1 }
 0x280   : > { %v6381_v31 = vadd.f32 %v5022_v27, %v6363_v17  ;;  %v562_v32 = vpop.f32.mrb[5].mxu1 }
 0x281   : > { %v5023_v33 = vpop.f32.mrb[6].mxu1  ;;  %v6389_v36 = vadd.f32 %v562_v32, %v6363_v17 }
 0x282   : > { %v565_v34 = vpop.f32.mrb[7].mxu1  ;;  %621 = vmax.xlane.f32.xlu1 %v6381_v31  ;;  %615 = vmax.xlane.f32.xlu0 %v6378_v28  ;;  %v6394_v38 = vadd.f32 %v5023_v33, %v6363_v17 }
 0x283   : > { %v6386_v35 = vadd.f32 %v565_v34, %v6363_v17 }
 0x286   : > { %617 = vmax.xlane.f32.xlu1 %v6389_v36  ;;  %619 = vmax.xlane.f32.xlu0 %v6386_v35 }
 0x287   : > { %v5026_v37 = vpop.f32.mrb[8].mxu1 }
 0x288   : > { %v6397_v41 = vadd.f32 %v5026_v37, %v6363_v17  ;;  %v578_v42 = vpop.f32.mrb[9].mxu1 }
 0x289   : > { %v5027_v43 = vpop.f32.mrb[10].mxu1  ;;  %v6402_v45 = vadd.f32 %v578_v42, %v6363_v17 }
 0x28a   : > { %v581_v44 = vpop.f32.mrb[11].mxu1  ;;  %623 = vmax.xlane.f32.xlu1 %v6394_v38  ;;  %629 = vmax.xlane.f32.xlu0 %v6397_v41  ;;  %v6406_v47 = vadd.f32 %v5027_v43, %v6363_v17 }
 0x28b   : > { %v6414_v54 = vadd.f32 %v581_v44, %v6363_v17  ;;  %v947_v44 = vsel %vm463_vm1, %v6336_v4, 0 }
 0x28e   : > { %625 = vmax.xlane.f32.xlu1 %v6402_v45 }
 0x28f   : > { %v5030_v46 = vpop.f32.mrb[12].mxu1 }
 0x290   : > { %v594_v48 = vpop.f32.mrb[13].mxu1  ;;  %v6418_v55 = vadd.f32 %v5030_v46, %v6363_v17 }
 0x291   : > { %v6409_v51 = vadd.f32 %v594_v48, %v6363_v17  ;;  %v5031_v52 = vpop.f32.mrb[14].mxu1 }
 0x292   : > { %v597_v53 = vpop.f32.mrb[15].mxu1  ;;  %631 = vmax.xlane.f32.xlu1 %v6406_v47  ;;  %v6422_v56 = vadd.f32 %v5031_v52, %v6363_v17 }
 0x293   : > { %633 = vmax.xlane.f32.xlu0 %v6409_v51  ;;  %v6435_v57 = vadd.f32 %v597_v53, %v6363_v17 }
 0x296   : > { %627 = vmax.xlane.f32.xlu1 %v6414_v54 }
 0x29a   : > { %637 = vmax.xlane.f32.xlu1 %v6418_v55 }
 0x29e   : > { %639 = vmax.xlane.f32.xlu1 %v6422_v56 }
 0x2a9   : > { %916 = vrot.lane.b32.xlu0 %v6293_v39, %s6185_s7 }
 0x2af   : > { %914 = vrot.lane.b32.xlu1 %v6295_v40, %s6185_s7 }
 0x2b3   : > { %892 = vrot.lane.b32.xlu1 %v6275_v19, %s6187_s8 }
 0x2b7   : > { %896 = vrot.lane.b32.xlu1 %v6285_v29, %s6187_s8 }
 0x2bb   : > { %900 = vrot.lane.b32.xlu1 %v6293_v39, %s6187_s8 }
 0x2bf   : > { %904 = vrot.lane.b32.xlu1 %v6301_v49, %s6187_s8 }
 0x2c3   : > { %1189 = vrot.lane.b32.xlu1 %v6275_v19, %s6188_s9 }
 0x2c7   : > { %1191 = vrot.lane.b32.xlu1 %v6287_v30, %s6188_s9 }
 0x2c8   : > { %635 = vmax.xlane.f32.xlu0 %v6435_v57 }
 0x2cb   : > { %1195 = vrot.lane.b32.xlu1 %v6295_v40, %s6188_s9 }
 0x2cf   : > { %1197 = vrot.lane.b32.xlu1 %v6293_v39, %s6188_s9 }
 0x2d3   : > { %1201 = vrot.lane.b32.xlu1 %v6301_v49, %s6188_s9 }
 0x2d7   : > { %1368 = vrot.lane.b32.xlu1 %v6287_v30, %s6189_s10 }
 0x2de   : > { %918 = vrot.lane.b32.xlu0 %v6303_v50, %s6185_s7 }
 0x2e2   : > { %920 = vrot.lane.b32.xlu0 %v6301_v49, %s6185_s7  ;;  %s6209_s7 = smov 8  }
 0x2e6   : > { %890 = vrot.lane.b32.xlu0 %v6277_v20, %s6187_s8 }
 0x2ea   : > { %894 = vrot.lane.b32.xlu0 %v6287_v30, %s6187_s8 }
 0x2ee   : > { %898 = vrot.lane.b32.xlu0 %v6295_v40, %s6187_s8 }
 0x2f2   : > { %902 = vrot.lane.b32.xlu0 %v6303_v50, %s6187_s8  ;;  %s6210_s8 = smov 16  }
 0x2f6   : > { %1187 = vrot.lane.b32.xlu0 %v6277_v20, %s6188_s9 }
 0x2fa   : > { %1193 = vrot.lane.b32.xlu0 %v6285_v29, %s6188_s9 }
 0x2fe   : > { %1199 = vrot.lane.b32.xlu0 %v6303_v50, %s6188_s9  ;;  %s6211_s9 = smov 20  }
 0x302   : > { %1364 = vrot.lane.b32.xlu0 %v6277_v20, %s6189_s10 }
 0x306   : > { %1366 = vrot.lane.b32.xlu0 %v6275_v19, %s6189_s10 }
 0x307   : > { %v614_v59 = vpop.xlane.xlu0 %613 }
 0x308   : > { %v643_v63 = vsub.f32 %v6366_v21, %v614_v59 }
 0x30a   : > { %v612_v60 = vpop.xlane.xlu1 %611  ;;  %1370 = vrot.lane.b32.xlu0 %v6285_v29, %s6189_s10  ;;  %v661_v7 = vmul.f32 1.442695, %v643_v63 }
 0x30b   : > { %v642_v61 = vsub.f32 %v6370_v25, %v612_v60  ;;  %v610_v62 = vpop.xlane.xlu0 %609 }
 0x30c   : > { %v641_v0 = vsub.f32 %v6373_v26, %v610_v62 }
 0x30d   : > { %v659_v1 = vmul.f32 1.442695, %v642_v61 }
 0x30e   : > { %v657_v2 = vmul.f32 1.442695, %v641_v0 }
 0x30f   : > { %5663 = vpow2.f32 %v659_v1  ;;  %v622_v3 = vpop.xlane.xlu1 %621  ;;  %v616_v5 = vpop.xlane.xlu0 %615  ;;  %v953_v1 = vsel %vm463_vm1, %v6457_v58, 0 }
 0x310   : > { %5665 = vpow2.f32 %v657_v2  ;;  %v644_v9 = vsub.f32 %v6378_v28, %v616_v5  ;;  %v647_v11 = vsub.f32 %v6381_v31, %v622_v3 }
 0x311   : > { %5667 = vpow2.f32 %v661_v7  ;;  %v956_v7 = vsel %vm463_vm1, %v6342_v8, 0 }
 0x312   : > { %v663_v10 = vmul.f32 1.442695, %v644_v9  ;;  %v669_v21 = vmul.f32 1.442695, %v647_v11 }
 0x313   : > { %v618_v12 = vpop.xlane.xlu1 %617  ;;  %v620_v13 = vpop.xlane.xlu0 %619 }
 0x314   : > { %v645_v14 = vsub.f32 %v6389_v36, %v618_v12  ;;  %v646_v15 = vsub.f32 %v6386_v35, %v620_v13  ;;  %5669 = vpow2.f32 %v663_v10 }
 0x316   : > { %v665_v16 = vmul.f32 1.442695, %v645_v14  ;;  %v667_v18 = vmul.f32 1.442695, %v646_v15 }
 0x317   : > { %v624_v22 = vpop.xlane.xlu1 %623  ;;  %v630_v32 = vpop.xlane.xlu0 %629 }
 0x318   : > { %5671 = vpow2.f32 %v665_v16  ;;  %v648_v23 = vsub.f32 %v6394_v38, %v624_v22  ;;  %v651_v38 = vsub.f32 %v6397_v41, %v630_v32 }
 0x319   : > { %v6471_v24 = vpop.eup %5663  ;;  %5673 = vpow2.f32 %v667_v18 }
 0x31a   : > { %9161 = vst [vmem:[#allocation2_spill] sm:$0xff] %v6471_v24  ;;  %v6473_v25 = vpop.eup %5665  ;;  %v671_v26 = vmul.f32 1.442695, %v648_v23  ;;  %5675 = vpow2.f32 %v669_v21  ;;  %v677_v53 = vmul.f32 1.442695, %v651_v38 }
 0x31b   : > { %9162 = vst [vmem:[#allocation3_spill] sm:$0xff] %v6473_v25  ;;  %v626_v27 = vpop.xlane.xlu1 %625  ;;  %v721_v28 = vpack.c.bf16 %v6471_v24, %v6473_v25  ;;  %v6477_v31 = vpop.eup %5667 }
 0x31c   : > { %5677 = vpow2.f32 %v671_v26  ;;  %9163 = vst [vmem:[#allocation4_spill] sm:$0xff] %v6477_v31  ;;  %v649_v33 = vsub.f32 %v6402_v45, %v626_v27 }
 0x31d   : > { %5048 = vmatprep.mubr.bf16.mxu0 %v721_v28 }
 0x31e   : > { %v6480_v34 = vpop.eup %5669  ;;  %v673_v43 = vmul.f32 1.442695, %v649_v33 }
 0x31f   : > { %9164 = vst [vmem:[#allocation5_spill] sm:$0xff] %v6480_v34  ;;  %v632_v35 = vpop.xlane.xlu1 %631  ;;  %v722_v37 = vpack.c.bf16 %v6480_v34, %v6477_v31 }
 0x320   : > { %v652_v36 = vsub.f32 %v6406_v47, %v632_v35  ;;  %5679 = vpow2.f32 %v673_v43 }
 0x321   : > { %5049 = vmatmul.mubr.bf16.vlgmr.msra.gmra.mrb[16].mxu0 %v722_v37 }
 0x322   : > { %v6486_v42 = vpop.eup %5671  ;;  %v679_v45 = vmul.f32 1.442695, %v652_v36  ;;  %5065 = vmatpush3.bf16.xpose.msra.mxu0 %v947_v44 }
 0x323   : > { %9165 = vst [vmem:[#allocation6_spill] sm:$0xff] %v6486_v42  ;;  %v6490_v46 = vpop.eup %5673  ;;  %v628_v48 = vpop.xlane.xlu1 %627  ;;  %5557 = vmatprep.subr.msk.bf16.mxu0 %vm463_vm1, %v6338_v6 }
 0x324   : > { %9166 = vst [vmem:[#allocation7_spill] sm:$0xff] %v6490_v46  ;;  %v650_v47 = vsub.f32 %v6414_v54, %v628_v48  ;;  %v723_v41 = vpack.c.bf16 %v6490_v46, %v6486_v42  ;;  %v6497_v52 = vpop.eup %5675  ;;  %5681 = vpow2.f32 %v679_v45  ;;  %v950_v54 = vsel %vm463_vm1, %v6338_v6, 0 }
 0x325   : > { %9167 = vst [vmem:[#allocation8_spill] sm:$0xff] %v6497_v52 }
 0x326   : > { %v6499_v59 = vpop.eup %5677  ;;  %v675_v4 = vmul.f32 1.442695, %v650_v47  ;;  %5052 = vmatprep.mubr.bf16.mxu0 %v723_v41 }
 0x327   : > { %9168 = vst [vmem:[#allocation9_spill] sm:$0xff] %v6499_v59  ;;  %v724_v60 = vpack.c.bf16 %v6499_v59, %v6497_v52  ;;  %v638_v61 = vpop.xlane.xlu1 %637 }
 0x328   : > { %5683 = vpow2.f32 %v675_v4 }
 0x329   : > { %5685 = vpow2.f32 %v677_v53  ;;  %5053 = vmatmul.mubr.bf16.gmra.mrb[20].mxu0 %v724_v60 }
 0x32a   : > { %5067 = vmatpush3.bf16.xpose.msra.mxu0 %v950_v54  ;;  %v6507_v62 = vpop.eup %5679 }
 0x32b   : > { %5558 = vmatprep.subr.msk.bf16.mxu0 %vm463_vm1, %v6457_v58  ;;  %9169 = vst [vmem:[#allocation10_spill] sm:$0xff] %v6507_v62  ;;  %v640_v5 = vpop.xlane.xlu1 %639  ;;  %v634_v58 = vpop.xlane.xlu0 %633 }
 0x32c   : > { %v653_v13 = vsub.f32 %v6409_v51, %v634_v58  ;;  %v656_v14 = vsub.f32 %v6422_v56, %v640_v5 }
 0x32e   : > { %v6509_v63 = vpop.eup %5681  ;;  %v681_v15 = vmul.f32 1.442695, %v653_v13  ;;  %v687_v16 = vmul.f32 1.442695, %v656_v14 }
 0x32f   : > { %9170 = vst [vmem:[#allocation11_spill] sm:$0xff] %v6509_v63  ;;  %v915_v9 = vpop.permute.xlu1 %914  ;;  %v917_v11 = vpop.permute.xlu0 %916 }
 0x330   : > { %v959_v10 = vsel %vm463_vm1, %v915_v9, 0  ;;  %v962_v12 = vsel %vm463_vm1, %v917_v11, 0  ;;  %5687 = vpow2.f32 %v681_v15 }
 0x331   : > { %5689 = vpow2.f32 %v687_v16 }
 0x332   : > { %v6511_v0 = vpop.eup %5683  ;;  %5069 = vmatpush3.bf16.xpose.msra.mxu0 %v953_v1 }
 0x333   : > { %9171 = vst [vmem:[#allocation12_spill] sm:$0xff] %v6511_v0  ;;  %v6515_v2 = vpop.eup %5685  ;;  %v725_v6 = vpack.c.bf16 %v6511_v0, %v6507_v62  ;;  %5559 = vmatprep.subr.msk.bf16.mxu0 %vm463_vm1, %v6342_v8  ;;  %v655_v8 = vsub.f32 %v6418_v55, %v638_v61  ;;  %v893_v26 = vpop.permute.xlu1 %892 }
 0x334   : > { %9172 = vst [vmem:[#allocation13_spill] sm:$0xff] %v6515_v2  ;;  %v726_v3 = vpack.c.bf16 %v6509_v63, %v6515_v2 }
 0x335   : > { %5056 = vmatprep.mubr.bf16.mxu0 %v725_v6  ;;  %v685_v22 = vmul.f32 1.442695, %v655_v8 }
 0x336   : > { %5057 = vmatmul.mubr.bf16.gmra.mrb[24].mxu0 %v726_v3 }
 0x337   : > { %v897_v55 = vpop.permute.xlu1 %896 }
 0x33a   : > { %5071 = vmatpush3.bf16.xpose.msra.mxu0 %v956_v7  ;;  %v6536_v32 = vpop.eup %5687 }
 0x33b   : > { %5560 = vmatprep.subr.msk.bf16.mxu0 %vm463_vm1, %v915_v9  ;;  %9173 = vst [vmem:[#allocation14_spill] sm:$0xff] %v6536_v32  ;;  %v6539_v33 = vpop.eup %5689  ;;  %v901_v37 = vpop.permute.xlu1 %900 }
 0x33c   : > { %9174 = vst [vmem:[#allocation15_spill] sm:$0xff] %v6539_v33 }
 0x33f   : > { %v905_v48 = vpop.permute.xlu1 %904 }
 0x342   : > { %5073 = vmatpush3.bf16.xpose.msra.mxu0 %v959_v10 }
 0x343   : > { %5561 = vmatprep.subr.msk.bf16.mxu0 %vm463_vm1, %v917_v11  ;;  %v1190_v41 = vpop.permute.xlu1 %1189 }
 0x347   : > { %v1192_v4 = vpop.permute.xlu1 %1191 }
 0x34a   : > { %5075 = vmatpush3.bf16.xpose.msra.mxu0 %v962_v12 }
 0x34b   : > { %v1196_v54 = vpop.permute.xlu1 %1195 }
 0x34f   : > { %v1198_v61 = vpop.permute.xlu1 %1197 }
 0x353   : > { %v1202_v6 = vpop.permute.xlu1 %1201 }
 0x355   : > { %v636_v18 = vpop.xlane.xlu0 %635 }
 0x356   : > { %v654_v21 = vsub.f32 %v6435_v57, %v636_v18 }
 0x358   : > { %v683_v23 = vmul.f32 1.442695, %v654_v21 }
 0x359   : > { %v919_v27 = vpop.permute.xlu0 %918 }
 0x35a   : > { %5691 = vpow2.f32 %v683_v23  ;;  %5562 = vmatprep.subr.msk.bf16.mxu0 %vm463_vm1, %v919_v27  ;;  %v965_v51 = vsel %vm463_vm1, %v919_v27, 0 }
 0x35b   : > { %5693 = vpow2.f32 %v685_v22  ;;  %5077 = vmatpush3.bf16.xpose.msra.mxu0 %v965_v51 }
 0x35d   : > { %v921_v56 = vpop.permute.xlu0 %920 }
 0x35e   : > { %5563 = vmatprep.subr.msk.bf16.mxu0 %vm463_vm1, %v921_v56  ;;  %v968_v57 = vsel %vm463_vm1, %v921_v56, 0 }
 0x361   : > { %v891_v28 = vpop.permute.xlu0 %890 }
 0x363   : > { %5079 = vmatpush3.bf16.xpose.msra.mxu0 %v968_v57 }
 0x364   : > { %v6541_v35 = vpop.eup %5691 }
 0x365   : > { %9175 = vst [vmem:[#allocation16_spill] sm:$0xff] %v6541_v35  ;;  %v6543_v36 = vpop.eup %5693  ;;  %v895_v38 = vpop.permute.xlu0 %894  ;;  %v727_v43 = vpack.c.bf16 %v6541_v35, %v6536_v32 }
 0x366   : > { %9176 = vst [vmem:[#allocation17_spill] sm:$0xff] %v6543_v36  ;;  %v728_v44 = vpack.c.bf16 %v6539_v33, %v6543_v36 }
 0x367   : > { %5060 = vmatprep.mubr.bf16.mxu0 %v727_v43 }
 0x368   : > { %5061 = vmatmul.mubr.bf16.gmra.mrb[28].mxu0 %v728_v44 }
 0x369   : > { %5080 = vmatprep.mubr.msk.bf16.mxu0 %vm463_vm1, %v891_v28  ;;  %v899_v45 = vpop.permute.xlu0 %898 }
 0x36d   : > { %v903_v47 = vpop.permute.xlu0 %902 }
 0x370   : > { %5081 = vmatmul.mubr.msk.bf16.vlgmr.msra.gmra.mrb[32].mxu0 %vm463_vm1, %v893_v26 }
 0x371   : > { %5084 = vmatprep.mubr.msk.bf16.mxu0 %vm463_vm1, %v895_v38  ;;  %v1188_v53 = vpop.permute.xlu0 %1187 }
 0x372   : > { %5096 = vmatprep.subr.bf16.mxu1 %v1188_v53 }
 0x373   : > { %5097 = vmatpush3.bf16.msra.mxu1 %v1188_v53 }
 0x374   : > { %5098 = vmatprep.subr.bf16.mxu1 %v1190_v41 }
 0x375   : > { %v1194_v60 = vpop.permute.xlu0 %1193 }
 0x377   : > { %5099 = vmatpush3.bf16.msra.mxu1 %v1190_v41 }
 0x378   : > { %5085 = vmatmul.mubr.msk.bf16.gmra.mrb[36].mxu0 %vm463_vm1, %v897_v55  ;;  %5100 = vmatprep.subr.bf16.mxu1 %v1192_v4 }
 0x379   : > { %5088 = vmatprep.mubr.msk.bf16.mxu0 %vm463_vm1, %v899_v45  ;;  %v1200_v1 = vpop.permute.xlu0 %1199 }
 0x37b   : > { %5101 = vmatpush3.bf16.msra.mxu1 %v1192_v4 }
 0x37c   : > { %5102 = vmatprep.subr.bf16.mxu1 %v1194_v60 }
 0x37d   : > { %v6557_v3 = vpop.permute.xlu0 %1364 }
 0x37f   : > { %5103 = vmatpush3.bf16.msra.mxu1 %v1194_v60 }
 0x380   : > { %5089 = vmatmul.mubr.msk.bf16.gmra.mrb[40].mxu0 %vm463_vm1, %v901_v37  ;;  %5104 = vmatprep.subr.bf16.mxu1 %v1196_v54 }
 0x381   : > { %5092 = vmatprep.mubr.msk.bf16.mxu0 %vm463_vm1, %v903_v47 }
 0x383   : > { %5105 = vmatpush3.bf16.msra.mxu1 %v1196_v54 }
 0x384   : > { %5106 = vmatprep.subr.bf16.mxu1 %v1198_v61 }
 0x387   : > { %5107 = vmatpush3.bf16.msra.mxu1 %v1198_v61 }
 0x388   : > { %5093 = vmatmul.mubr.msk.bf16.gmra.mrb[44].mxu0 %vm463_vm1, %v905_v48  ;;  %5108 = vmatprep.subr.bf16.mxu1 %v1200_v1 }
 0x38b   : > { %5109 = vmatpush3.bf16.msra.mxu1 %v1200_v1 }
 0x38c   : > { %5110 = vmatprep.subr.bf16.mxu1 %v1202_v6 }
 0x38f   : > { %5111 = vmatpush3.bf16.msra.mxu1 %v1202_v6 }
 0x390   : > { %5564 = vmatprep.subr.msk.bf16.mxu1 %vm463_vm1, %v6557_v3 }
 0x3f4   : > { %v6561_v5 = vpop.f32.mrb[16].mxu0 }
 0x3f5   : > { %9177 = vst [vmem:[#allocation18_spill] sm:$0xff] %v6561_v5  ;;  %v6563_v7 = vpop.f32.mrb[17].mxu0 }
 0x3f6   : > { %9178 = vst [vmem:[#allocation19_spill] sm:$0xff] %v6563_v7  ;;  %v6565_v9 = vpop.f32.mrb[18].mxu0 }
 0x3f7   : > { %9179 = vst [vmem:[#allocation20_spill] sm:$0xff] %v6565_v9  ;;  %v6567_v58 = vpop.f32.mrb[19].mxu0 }
 0x3f8   : > { %9180 = vst [vmem:[#allocation21_spill] sm:$0xff] %v6567_v58 }
 0x3fc   : > { %v6569_v10 = vpop.f32.mrb[20].mxu0 }
 0x3fd   : > { %9181 = vst [vmem:[#allocation22_spill] sm:$0xff] %v6569_v10  ;;  %v6571_v11 = vpop.f32.mrb[21].mxu0 }
 0x3fe   : > { %9182 = vst [vmem:[#allocation23_spill] sm:$0xff] %v6571_v11  ;;  %v6573_v12 = vpop.f32.mrb[22].mxu0 }
 0x3ff   : > { %9183 = vst [vmem:[#allocation24_spill] sm:$0xff] %v6573_v12  ;;  %v6575_v13 = vpop.f32.mrb[23].mxu0 }
 0x400   : > { %9184 = vst [vmem:[#allocation25_spill] sm:$0xff] %v6575_v13 }
 0x409   : > { %v6577_v14 = vpop.f32.mrb[24].mxu0 }
 0x40a   : > { %9185 = vst [vmem:[#allocation26_spill] sm:$0xff] %v6577_v14  ;;  %v6579_v8 = vpop.f32.mrb[25].mxu0 }
 0x40b   : > { %9186 = vst [vmem:[#allocation27_spill] sm:$0xff] %v6579_v8  ;;  %v6581_v15 = vpop.f32.mrb[26].mxu0 }
 0x40c   : > { %9187 = vst [vmem:[#allocation28_spill] sm:$0xff] %v6581_v15  ;;  %v6583_v16 = vpop.f32.mrb[27].mxu0 }
 0x40d   : > { %9188 = vst [vmem:[#allocation29_spill] sm:$0xff] %v6583_v16 }
 0x43b   : > { %v6585_v18 = vpop.f32.mrb[28].mxu0 }
 0x43c   : > { %9189 = vst [vmem:[#allocation30_spill] sm:$0xff] %v6585_v18  ;;  %v6587_v21 = vpop.f32.mrb[29].mxu0 }
 0x43d   : > { %9190 = vst [vmem:[#allocation31_spill] sm:$0xff] %v6587_v21  ;;  %v6589_v22 = vpop.f32.mrb[30].mxu0 }
 0x43e   : > { %9191 = vst [vmem:[#allocation32_spill] sm:$0xff] %v6589_v22  ;;  %v6591_v23 = vpop.f32.mrb[31].mxu0 }
 0x43f   : > { %9192 = vst [vmem:[#allocation33_spill] sm:$0xff] %v6591_v23 }
 0x443   : > { %v5082_v26 = vpop.f32.mrb[32].mxu0 }
 0x444   : > { %v6594_v27 = vadd.f32 %v5082_v26, %v6363_v17  ;;  %v1004_v51 = vpop.f32.mrb[33].mxu0 }
 0x445   : > { %v5083_v56 = vpop.f32.mrb[34].mxu0  ;;  %v6601_v57 = vadd.f32 %v1004_v51, %v6363_v17 }
 0x446   : > { %1071 = vmax.xlane.f32.xlu0 %v6594_v27  ;;  %v1007_v55 = vpop.f32.mrb[35].mxu0  ;;  %v6606_v38 = vadd.f32 %v5083_v56, %v6363_v17 }
 0x447   : > { %v6598_v28 = vadd.f32 %v1007_v55, %v6363_v17 }
 0x449   : > { %1069 = vmax.xlane.f32.xlu1 %v6598_v28 }
 0x44a   : > { %1067 = vmax.xlane.f32.xlu0 %v6601_v57 }
 0x44b   : > { %v5086_v37 = vpop.f32.mrb[36].mxu0 }
 0x44c   : > { %v6609_v43 = vadd.f32 %v5086_v37, %v6363_v17  ;;  %v1020_v44 = vpop.f32.mrb[37].mxu0 }
 0x44d   : > { %v5087_v45 = vpop.f32.mrb[38].mxu0  ;;  %v6617_v41 = vadd.f32 %v1020_v44, %v6363_v17 }
 0x44e   : > { %1073 = vmax.xlane.f32.xlu0 %v6606_v38  ;;  %1079 = vmax.xlane.f32.xlu1 %v6609_v43  ;;  %v1023_v48 = vpop.f32.mrb[39].mxu0  ;;  %v6622_v4 = vadd.f32 %v5087_v45, %v6363_v17 }
 0x44f   : > { %v6614_v47 = vadd.f32 %v1023_v48, %v6363_v17 }
 0x452   : > { %1077 = vmax.xlane.f32.xlu0 %v6614_v47  ;;  %1075 = vmax.xlane.f32.xlu1 %v6617_v41 }
 0x453   : > { %v5090_v53 = vpop.f32.mrb[40].mxu0 }
 0x454   : > { %v6625_v60 = vadd.f32 %v5090_v53, %v6363_v17  ;;  %v1036_v54 = vpop.f32.mrb[41].mxu0 }
 0x455   : > { %v5091_v61 = vpop.f32.mrb[42].mxu0  ;;  %v6630_v6 = vadd.f32 %v1036_v54, %v6363_v17 }
 0x456   : > { %1081 = vmax.xlane.f32.xlu1 %v6622_v4  ;;  %1087 = vmax.xlane.f32.xlu0 %v6625_v60  ;;  %v1039_v1 = vpop.f32.mrb[43].mxu0  ;;  %v6634_v51 = vadd.f32 %v5091_v61, %v6363_v17  ;;  %v6682_v61 = vpop.permute.xlu0 %1366 }
 0x457   : > { %v6642_v45 = vadd.f32 %v1039_v1, %v6363_v17 }
 0x45a   : > { %1083 = vmax.xlane.f32.xlu1 %v6630_v6  ;;  %v6687_v1 = vpop.permute.xlu0 %1370 }
 0x45b   : > { %v5094_v26 = vpop.f32.mrb[44].mxu0 }
 0x45c   : > { %v1052_v56 = vpop.f32.mrb[45].mxu0  ;;  %v6646_v48 = vadd.f32 %v5094_v26, %v6363_v17  ;;  %v6689_v26 = vpop.permute.xlu1 %1368 }
 0x45d   : > { %v6637_v55 = vadd.f32 %v1052_v56, %v6363_v17  ;;  %v5095_v37 = vpop.f32.mrb[46].mxu0 }
 0x45e   : > { %1089 = vmax.xlane.f32.xlu1 %v6634_v51  ;;  %v1055_v44 = vpop.f32.mrb[47].mxu0  ;;  %v6650_v53 = vadd.f32 %v5095_v37, %v6363_v17 }
 0x45f   : > { %1091 = vmax.xlane.f32.xlu0 %v6637_v55  ;;  %v6663_v54 = vadd.f32 %v1055_v44, %v6363_v17 }
 0x462   : > { %1085 = vmax.xlane.f32.xlu1 %v6642_v45 }
 0x466   : > { %1095 = vmax.xlane.f32.xlu1 %v6646_v48 }
 0x46a   : > { %1097 = vmax.xlane.f32.xlu1 %v6650_v53 }
 0x475   : > { %1374 = vrot.lane.b32.xlu0 %v6293_v39, %s6189_s10 }
 0x47b   : > { %1372 = vrot.lane.b32.xlu1 %v6295_v40, %s6189_s10 }
 0x47f   : > { %1350 = vrot.lane.b32.xlu1 %v6275_v19, %s6190_s11 }
 0x483   : > { %1354 = vrot.lane.b32.xlu1 %v6285_v29, %s6190_s11 }
 0x487   : > { %1358 = vrot.lane.b32.xlu1 %v6293_v39, %s6190_s11 }
 0x48b   : > { %1362 = vrot.lane.b32.xlu1 %v6301_v49, %s6190_s11 }
 0x48f   : > { %1647 = vrot.lane.b32.xlu1 %v6275_v19, %s6191_s12 }
 0x493   : > { %1649 = vrot.lane.b32.xlu1 %v6287_v30, %s6191_s12 }
 0x494   : > { %1093 = vmax.xlane.f32.xlu0 %v6663_v54 }
 0x497   : > { %1653 = vrot.lane.b32.xlu1 %v6295_v40, %s6191_s12 }
 0x49b   : > { %1655 = vrot.lane.b32.xlu1 %v6293_v39, %s6191_s12 }
 0x49f   : > { %1659 = vrot.lane.b32.xlu1 %v6301_v49, %s6191_s12 }
 0x4a3   : > { %1826 = vrot.lane.b32.xlu1 %v6287_v30, %s6192_s13 }
 0x4aa   : > { %1376 = vrot.lane.b32.xlu0 %v6303_v50, %s6189_s10 }
 0x4ae   : > { %1378 = vrot.lane.b32.xlu0 %v6301_v49, %s6189_s10  ;;  %s6212_s10 = smov 24  }
 0x4b2   : > { %1348 = vrot.lane.b32.xlu0 %v6277_v20, %s6190_s11 }
 0x4b6   : > { %1352 = vrot.lane.b32.xlu0 %v6287_v30, %s6190_s11 }
 0x4ba   : > { %1356 = vrot.lane.b32.xlu0 %v6295_v40, %s6190_s11 }
 0x4be   : > { %1360 = vrot.lane.b32.xlu0 %v6303_v50, %s6190_s11 }
 0x4c2   : > { %1645 = vrot.lane.b32.xlu0 %v6277_v20, %s6191_s12 }
 0x4c6   : > { %1651 = vrot.lane.b32.xlu0 %v6285_v29, %s6191_s12 }
 0x4ca   : > { %1657 = vrot.lane.b32.xlu0 %v6303_v50, %s6191_s12 }
 0x4ce   : > { %1822 = vrot.lane.b32.xlu0 %v6277_v20, %s6192_s13 }
 0x4d2   : > { %1824 = vrot.lane.b32.xlu0 %v6275_v19, %s6192_s13 }
 0x4d3   : > { %v1072_v56 = vpop.xlane.xlu0 %1071 }
 0x4d4   : > { %v1101_v21 = vsub.f32 %v6594_v27, %v1072_v56 }
 0x4d6   : > { %v1070_v37 = vpop.xlane.xlu1 %1069  ;;  %1828 = vrot.lane.b32.xlu0 %v6285_v29, %s6192_s13  ;;  %v1119_v10 = vmul.f32 1.442695, %v1101_v21 }
 0x4d7   : > { %v1100_v44 = vsub.f32 %v6598_v28, %v1070_v37  ;;  %v1068_v18 = vpop.xlane.xlu0 %1067  ;;  %v1405_v37 = vsel %vm463_vm1, %v6557_v3, 0 }
 0x4d8   : > { %v1099_v22 = vsub.f32 %v6601_v57, %v1068_v18 }
 0x4d9   : > { %v1117_v14 = vmul.f32 1.442695, %v1100_v44 }
 0x4da   : > { %v1115_v23 = vmul.f32 1.442695, %v1099_v22 }
 0x4db   : > { %5695 = vpow2.f32 %v1117_v14  ;;  %v1080_v8 = vpop.xlane.xlu1 %1079  ;;  %v1074_v15 = vpop.xlane.xlu0 %1073 }
 0x4dc   : > { %5697 = vpow2.f32 %v1115_v23  ;;  %v1102_v16 = vsub.f32 %v6606_v38, %v1074_v15  ;;  %v1105_v12 = vsub.f32 %v6609_v43, %v1080_v8 }
 0x4dd   : > { %5699 = vpow2.f32 %v1119_v10 }
 0x4de   : > { %v1121_v11 = vmul.f32 1.442695, %v1102_v16  ;;  %v1127_v14 = vmul.f32 1.442695, %v1105_v12 }
 0x4df   : > { %v1076_v5 = vpop.xlane.xlu1 %1075  ;;  %v1078_v13 = vpop.xlane.xlu0 %1077 }
 0x4e0   : > { %v1103_v28 = vsub.f32 %v6617_v41, %v1076_v5  ;;  %v1104_v27 = vsub.f32 %v6614_v47, %v1078_v13  ;;  %5701 = vpow2.f32 %v1121_v11 }
 0x4e2   : > { %v1123_v18 = vmul.f32 1.442695, %v1103_v28  ;;  %v1125_v22 = vmul.f32 1.442695, %v1104_v27 }
 0x4e3   : > { %v1082_v57 = vpop.xlane.xlu1 %1081  ;;  %v1088_v12 = vpop.xlane.xlu0 %1087 }
 0x4e4   : > { %5703 = vpow2.f32 %v1123_v18  ;;  %v1106_v21 = vsub.f32 %v6622_v4, %v1082_v57  ;;  %v1109_v41 = vsub.f32 %v6625_v60, %v1088_v12 }
 0x4e5   : > { %v6703_v23 = vpop.eup %5695  ;;  %5705 = vpow2.f32 %v1125_v22 }
 0x4e6   : > { %v6705_v15 = vpop.eup %5697  ;;  %v1129_v8 = vmul.f32 1.442695, %v1106_v21  ;;  %5707 = vpow2.f32 %v1127_v14  ;;  %v1135_v18 = vmul.f32 1.442695, %v1109_v41 }
 0x4e7   : > { %v1084_v10 = vpop.xlane.xlu1 %1083  ;;  %v1179_v5 = vpack.c.bf16 %v6703_v23, %v6705_v15  ;;  %v6709_v11 = vpop.eup %5699 }
 0x4e8   : > { %5709 = vpow2.f32 %v1129_v8  ;;  %v1107_v13 = vsub.f32 %v6630_v6, %v1084_v10 }
 0x4e9   : > { %5112 = vmatprep.mubr.bf16.mxu1 %v1179_v5  ;;  %v1411_v5 = vsel %vm463_vm1, %v6689_v26, 0 }
 0x4ea   : > { %v6712_v16 = vpop.eup %5701  ;;  %v1131_v56 = vmul.f32 1.442695, %v1107_v13 }
 0x4eb   : > { %v1090_v38 = vpop.xlane.xlu1 %1089  ;;  %v1180_v47 = vpack.c.bf16 %v6712_v16, %v6709_v11 }
 0x4ec   : > { %v1110_v43 = vsub.f32 %v6634_v51, %v1090_v38  ;;  %5711 = vpow2.f32 %v1131_v56 }
 0x4ed   : > { %5113 = vmatmul.mubr.bf16.vlgmr.msra.gmra.mrb[16].mxu1 %v1180_v47 }
 0x4ee   : > { %v6718_v4 = vpop.eup %5703  ;;  %v1137_v6 = vmul.f32 1.442695, %v1110_v43  ;;  %5129 = vmatpush3.bf16.xpose.msra.mxu1 %v1405_v37  ;;  %v1414_v43 = vsel %vm463_vm1, %v6687_v1, 0 }
 0x4ef   : > { %v6722_v44 = vpop.eup %5705  ;;  %v1086_v28 = vpop.xlane.xlu1 %1085  ;;  %5565 = vmatprep.subr.msk.bf16.mxu1 %vm463_vm1, %v6682_v61 }
 0x4f0   : > { %9193 = vst [vmem:[#allocation34_spill] sm:$0xff] %v6722_v44  ;;  %v1108_v51 = vsub.f32 %v6642_v45, %v1086_v28  ;;  %v1181_v60 = vpack.c.bf16 %v6722_v44, %v6718_v4  ;;  %v6729_v27 = vpop.eup %5707  ;;  %5713 = vpow2.f32 %v1137_v6  ;;  %v1408_v45 = vsel %vm463_vm1, %v6682_v61, 0 }
 0x4f2   : > { %v6731_v22 = vpop.eup %5709  ;;  %v1133_v3 = vmul.f32 1.442695, %v1108_v51  ;;  %5116 = vmatprep.mubr.bf16.mxu1 %v1181_v60 }
 0x4f3   : > { %9194 = vst [vmem:[#allocation35_spill] sm:$0xff] %v6731_v22  ;;  %v1182_v14 = vpack.c.bf16 %v6731_v22, %v6729_v27  ;;  %v1096_v57 = vpop.xlane.xlu1 %1095 }
 0x4f4   : > { %5715 = vpow2.f32 %v1133_v3 }
 0x4f5   : > { %5717 = vpow2.f32 %v1135_v18  ;;  %5117 = vmatmul.mubr.bf16.gmra.mrb[20].mxu1 %v1182_v14 }
 0x4f6   : > { %5131 = vmatpush3.bf16.xpose.msra.mxu1 %v1408_v45  ;;  %v6739_v21 = vpop.eup %5711 }
 0x4f7   : > { %5566 = vmatprep.subr.msk.bf16.mxu1 %vm463_vm1, %v6689_v26  ;;  %9195 = vst [vmem:[#allocation36_spill] sm:$0xff] %v6739_v21  ;;  %v1098_v38 = vpop.xlane.xlu1 %1097  ;;  %v1092_v26 = vpop.xlane.xlu0 %1091 }
 0x4f8   : > { %v1111_v6 = vsub.f32 %v6637_v55, %v1092_v26  ;;  %v1114_v28 = vsub.f32 %v6650_v53, %v1098_v38 }
 0x4fa   : > { %v6741_v8 = vpop.eup %5713  ;;  %v1139_v51 = vmul.f32 1.442695, %v1111_v6  ;;  %v1145_v60 = vmul.f32 1.442695, %v1114_v28 }
 0x4fb   : > { %9196 = vst [vmem:[#allocation37_spill] sm:$0xff] %v6741_v8  ;;  %v1373_v47 = vpop.permute.xlu1 %1372  ;;  %v1375_v56 = vpop.permute.xlu0 %1374 }
 0x4fc   : > { %v1417_v41 = vsel %vm463_vm1, %v1373_v47, 0  ;;  %v1420_v37 = vsel %vm463_vm1, %v1375_v56, 0  ;;  %5719 = vpow2.f32 %v1139_v51 }
 0x4fd   : > { %5721 = vpow2.f32 %v1145_v60 }
 0x4fe   : > { %v6743_v10 = vpop.eup %5715  ;;  %5133 = vmatpush3.bf16.xpose.msra.mxu1 %v1411_v5 }
 0x4ff   : > { %9197 = vst [vmem:[#allocation38_spill] sm:$0xff] %v6743_v10  ;;  %v6747_v12 = vpop.eup %5717  ;;  %v1183_v61 = vpack.c.bf16 %v6743_v10, %v6739_v21  ;;  %5567 = vmatprep.subr.msk.bf16.mxu1 %vm463_vm1, %v6687_v1  ;;  %v1113_v1 = vsub.f32 %v6646_v48, %v1096_v57  ;;  %v1351_v5 = vpop.permute.xlu1 %1350 }
 0x500   : > { %9198 = vst [vmem:[#allocation39_spill] sm:$0xff] %v6747_v12  ;;  %v1184_v13 = vpack.c.bf16 %v6741_v8, %v6747_v12 }
 0x501   : > { %5120 = vmatprep.mubr.bf16.mxu1 %v1183_v61  ;;  %v1143_v14 = vmul.f32 1.442695, %v1113_v1 }
 0x502   : > { %5121 = vmatmul.mubr.bf16.gmra.mrb[24].mxu1 %v1184_v13 }
 0x503   : > { %v1355_v48 = vpop.permute.xlu1 %1354 }
 0x506   : > { %5135 = vmatpush3.bf16.xpose.msra.mxu1 %v1414_v43  ;;  %v6768_v13 = vpop.eup %5719 }
 0x507   : > { %5568 = vmatprep.subr.msk.bf16.mxu1 %vm463_vm1, %v1373_v47  ;;  %9199 = vst [vmem:[#allocation40_spill] sm:$0xff] %v6768_v13  ;;  %v6771_v38 = vpop.eup %5721  ;;  %v1359_v26 = vpop.permute.xlu1 %1358 }
 0x508   : > { %9200 = vst [vmem:[#allocation41_spill] sm:$0xff] %v6771_v38 }
 0x50b   : > { %v1363_v28 = vpop.permute.xlu1 %1362 }
 0x50e   : > { %5137 = vmatpush3.bf16.xpose.msra.mxu1 %v1417_v41 }
 0x50f   : > { %5569 = vmatprep.subr.msk.bf16.mxu1 %vm463_vm1, %v1375_v56  ;;  %v1648_v51 = vpop.permute.xlu1 %1647 }
 0x516   : > { %5139 = vmatpush3.bf16.xpose.msra.mxu1 %v1420_v37 }
 0x521   : > { %v1094_v18 = vpop.xlane.xlu0 %1093 }
 0x522   : > { %v1112_v3 = vsub.f32 %v6663_v54, %v1094_v18  ;;  %v1650_v18 = vpop.permute.xlu1 %1649 }
 0x524   : > { %v1141_v45 = vmul.f32 1.442695, %v1112_v3 }
 0x525   : > { %v1377_v61 = vpop.permute.xlu0 %1376 }
 0x526   : > { %5723 = vpow2.f32 %v1141_v45  ;;  %5570 = vmatprep.subr.msk.bf16.mxu1 %vm463_vm1, %v1377_v61  ;;  %v1423_v55 = vsel %vm463_vm1, %v1377_v61, 0 }
 0x527   : > { %5725 = vpow2.f32 %v1143_v14  ;;  %5141 = vmatpush3.bf16.xpose.msra.mxu1 %v1423_v55  ;;  %v1654_v14 = vpop.permute.xlu1 %1653 }
 0x529   : > { %v1379_v53 = vpop.permute.xlu0 %1378 }
 0x52a   : > { %5571 = vmatprep.subr.msk.bf16.mxu1 %vm463_vm1, %v1379_v53  ;;  %v1426_v54 = vsel %vm463_vm1, %v1379_v53, 0 }
 0x52b   : > { %v1656_v45 = vpop.permute.xlu1 %1655 }
 0x52d   : > { %v1349_v57 = vpop.permute.xlu0 %1348 }
 0x52f   : > { %5143 = vmatpush3.bf16.xpose.msra.mxu1 %v1426_v54  ;;  %v1660_v61 = vpop.permute.xlu1 %1659 }
 0x530   : > { %v6773_v43 = vpop.eup %5723 }
 0x531   : > { %9201 = vst [vmem:[#allocation42_spill] sm:$0xff] %v6773_v43  ;;  %v6775_v47 = vpop.eup %5725  ;;  %v1353_v41 = vpop.permute.xlu0 %1352  ;;  %v1185_v56 = vpack.c.bf16 %v6773_v43, %v6768_v13 }
 0x532   : > { %9202 = vst [vmem:[#allocation43_spill] sm:$0xff] %v6775_v47  ;;  %v1186_v37 = vpack.c.bf16 %v6771_v38, %v6775_v47 }
 0x533   : > { %5124 = vmatprep.mubr.bf16.mxu1 %v1185_v56 }
 0x534   : > { %5125 = vmatmul.mubr.bf16.gmra.mrb[28].mxu1 %v1186_v37 }
 0x535   : > { %5144 = vmatprep.mubr.msk.bf16.mxu1 %vm463_vm1, %v1349_v57  ;;  %v1357_v6 = vpop.permute.xlu0 %1356 }
 0x539   : > { %v1361_v1 = vpop.permute.xlu0 %1360 }
 0x53c   : > { %5145 = vmatmul.mubr.msk.bf16.vlgmr.msra.gmra.mrb[32].mxu1 %vm463_vm1, %v1351_v5 }
 0x53d   : > { %5148 = vmatprep.mubr.msk.bf16.mxu1 %vm463_vm1, %v1353_v41  ;;  %v1646_v60 = vpop.permute.xlu0 %1645 }
 0x53e   : > { %5160 = vmatprep.subr.bf16.mxu0 %v1646_v60 }
 0x53f   : > { %5161 = vmatpush3.bf16.msra.mxu0 %v1646_v60 }
 0x540   : > { %5162 = vmatprep.subr.bf16.mxu0 %v1648_v51 }
 0x541   : > { %v1652_v3 = vpop.permute.xlu0 %1651 }
 0x543   : > { %5163 = vmatpush3.bf16.msra.mxu0 %v1648_v51 }
 0x544   : > { %5149 = vmatmul.mubr.msk.bf16.gmra.mrb[36].mxu1 %vm463_vm1, %v1355_v48  ;;  %5164 = vmatprep.subr.bf16.mxu0 %v1650_v18 }
 0x545   : > { %5152 = vmatprep.mubr.msk.bf16.mxu1 %vm463_vm1, %v1357_v6  ;;  %v1658_v5 = vpop.permute.xlu0 %1657 }
 0x547   : > { %5165 = vmatpush3.bf16.msra.mxu0 %v1650_v18 }
 0x548   : > { %5166 = vmatprep.subr.bf16.mxu0 %v1652_v3 }
 0x549   : > { %v6789_v55 = vpop.permute.xlu0 %1822 }
 0x54b   : > { %5167 = vmatpush3.bf16.msra.mxu0 %v1652_v3 }
 0x54c   : > { %5153 = vmatmul.mubr.msk.bf16.gmra.mrb[40].mxu1 %vm463_vm1, %v1359_v26  ;;  %5168 = vmatprep.subr.bf16.mxu0 %v1654_v14 }
 0x54d   : > { %5156 = vmatprep.mubr.msk.bf16.mxu1 %vm463_vm1, %v1361_v1 }
 0x54f   : > { %5169 = vmatpush3.bf16.msra.mxu0 %v1654_v14 }
 0x550   : > { %5170 = vmatprep.subr.bf16.mxu0 %v1656_v45 }
 0x553   : > { %5171 = vmatpush3.bf16.msra.mxu0 %v1656_v45 }
 0x554   : > { %5157 = vmatmul.mubr.msk.bf16.gmra.mrb[44].mxu1 %vm463_vm1, %v1363_v28  ;;  %5172 = vmatprep.subr.bf16.mxu0 %v1658_v5 }
 0x557   : > { %5173 = vmatpush3.bf16.msra.mxu0 %v1658_v5 }
 0x558   : > { %5174 = vmatprep.subr.bf16.mxu0 %v1660_v61 }
 0x55b   : > { %5175 = vmatpush3.bf16.msra.mxu0 %v1660_v61 }
 0x55c   : > { %5572 = vmatprep.subr.msk.bf16.mxu0 %vm463_vm1, %v6789_v55 }
 0x5c0   : > { %v6793_v53 = vpop.f32.mrb[16].mxu1 }
 0x5c1   : > { %9203 = vst [vmem:[#allocation44_spill] sm:$0xff] %v6793_v53  ;;  %v6795_v48 = vpop.f32.mrb[17].mxu1 }
 0x5c2   : > { %9204 = vst [vmem:[#allocation45_spill] sm:$0xff] %v6795_v48  ;;  %v6797_v57 = vpop.f32.mrb[18].mxu1 }
 0x5c3   : > { %9205 = vst [vmem:[#allocation46_spill] sm:$0xff] %v6797_v57  ;;  %v6799_v54 = vpop.f32.mrb[19].mxu1 }
 0x5c4   : > { %9206 = vst [vmem:[#allocation47_spill] sm:$0xff] %v6799_v54 }
 0x5c8   : > { %v6801_v26 = vpop.f32.mrb[20].mxu1 }
 0x5c9   : > { %9207 = vst [vmem:[#allocation48_spill] sm:$0xff] %v6801_v26  ;;  %v6803_v41 = vpop.f32.mrb[21].mxu1 }
 0x5ca   : > { %9208 = vst [vmem:[#allocation49_spill] sm:$0xff] %v6803_v41  ;;  %v6805_v56 = vpop.f32.mrb[22].mxu1 }
 0x5cb   : > { %9209 = vst [vmem:[#allocation50_spill] sm:$0xff] %v6805_v56  ;;  %v6807_v37 = vpop.f32.mrb[23].mxu1 }
 0x5cc   : > { %9210 = vst [vmem:[#allocation51_spill] sm:$0xff] %v6807_v37 }
 0x5d5   : > { %v6809_v6 = vpop.f32.mrb[24].mxu1 }
 0x5d6   : > { %9211 = vst [vmem:[#allocation52_spill] sm:$0xff] %v6809_v6  ;;  %v6811_v28 = vpop.f32.mrb[25].mxu1 }
 0x5d7   : > { %9212 = vst [vmem:[#allocation53_spill] sm:$0xff] %v6811_v28  ;;  %v6813_v1 = vpop.f32.mrb[26].mxu1 }
 0x5d8   : > { %9213 = vst [vmem:[#allocation54_spill] sm:$0xff] %v6813_v1  ;;  %v6815_v51 = vpop.f32.mrb[27].mxu1 }
 0x5d9   : > { %9214 = vst [vmem:[#allocation55_spill] sm:$0xff] %v6815_v51 }
 0x607   : > { %v6817_v60 = vpop.f32.mrb[28].mxu1 }
 0x608   : > { %9215 = vst [vmem:[#allocation56_spill] sm:$0xff] %v6817_v60  ;;  %v6819_v18 = vpop.f32.mrb[29].mxu1 }
 0x609   : > { %9216 = vst [vmem:[#allocation57_spill] sm:$0xff] %v6819_v18  ;;  %v6821_v3 = vpop.f32.mrb[30].mxu1 }
 0x60a   : > { %9217 = vst [vmem:[#allocation58_spill] sm:$0xff] %v6821_v3  ;;  %v6823_v14 = vpop.f32.mrb[31].mxu1 }
 0x60b   : > { %9218 = vst [vmem:[#allocation59_spill] sm:$0xff] %v6823_v14 }
 0x60f   : > { %v5146_v45 = vpop.f32.mrb[32].mxu1 }
 0x610   : > { %v6826_v5 = vadd.f32 %v5146_v45, %v6363_v17  ;;  %v1462_v61 = vpop.f32.mrb[33].mxu1 }
 0x611   : > { %v5147_v7 = vpop.f32.mrb[34].mxu1  ;;  %v6833_v60 = vadd.f32 %v1462_v61, %v6363_v17 }
 0x612   : > { %1529 = vmax.xlane.f32.xlu0 %v6826_v5  ;;  %v1465_v9 = vpop.f32.mrb[35].mxu1  ;;  %v6838_v14 = vadd.f32 %v5147_v7, %v6363_v17 }
 0x613   : > { %v6830_v58 = vadd.f32 %v1465_v9, %v6363_v17 }
 0x615   : > { %1527 = vmax.xlane.f32.xlu1 %v6830_v58 }
 0x616   : > { %1525 = vmax.xlane.f32.xlu0 %v6833_v60 }
 0x617   : > { %v5150_v3 = vpop.f32.mrb[36].mxu1 }
 0x618   : > { %v6841_v45 = vadd.f32 %v5150_v3, %v6363_v17  ;;  %v1478_v18 = vpop.f32.mrb[37].mxu1 }
 0x619   : > { %v5151_v36 = vpop.f32.mrb[38].mxu1  ;;  %v6849_v32 = vadd.f32 %v1478_v18, %v6363_v17 }
 0x61a   : > { %1531 = vmax.xlane.f32.xlu0 %v6838_v14  ;;  %1537 = vmax.xlane.f32.xlu1 %v6841_v45  ;;  %v1481_v9 = vpop.f32.mrb[39].mxu1  ;;  %v6854_v3 = vadd.f32 %v5151_v36, %v6363_v17 }
 0x61b   : > { %v6846_v61 = vadd.f32 %v1481_v9, %v6363_v17 }
 0x61e   : > { %1535 = vmax.xlane.f32.xlu0 %v6846_v61  ;;  %1533 = vmax.xlane.f32.xlu1 %v6849_v32 }
 0x61f   : > { %v5154_v7 = vpop.f32.mrb[40].mxu1 }
 0x620   : > { %v6857_v33 = vadd.f32 %v5154_v7, %v6363_v17  ;;  %v1494_v2 = vpop.f32.mrb[41].mxu1 }
 0x621   : > { %v5155_v35 = vpop.f32.mrb[42].mxu1  ;;  %v6862_v18 = vadd.f32 %v1494_v2, %v6363_v17 }
 0x622   : > { %1539 = vmax.xlane.f32.xlu1 %v6854_v3  ;;  %1545 = vmax.xlane.f32.xlu0 %v6857_v33  ;;  %v1497_v9 = vpop.f32.mrb[43].mxu1  ;;  %v6866_v63 = vadd.f32 %v5155_v35, %v6363_v17 }
 0x623   : > { %v6874_v42 = vadd.f32 %v1497_v9, %v6363_v17  ;;  %v6921_v9 = vpop.permute.xlu1 %1826 }
 0x626   : > { %1541 = vmax.xlane.f32.xlu1 %v6862_v18 }
 0x627   : > { %v5158_v62 = vpop.f32.mrb[44].mxu1 }
 0x628   : > { %v1510_v36 = vpop.f32.mrb[45].mxu1  ;;  %v6878_v2 = vadd.f32 %v5158_v62, %v6363_v17  ;;  %v6914_v62 = vpop.permute.xlu0 %1824 }
 0x629   : > { %v6869_v7 = vadd.f32 %v1510_v36, %v6363_v17  ;;  %v5159_v52 = vpop.f32.mrb[46].mxu1 }
 0x62a   : > { %1547 = vmax.xlane.f32.xlu1 %v6866_v63  ;;  %v1513_v0 = vpop.f32.mrb[47].mxu1  ;;  %v6882_v35 = vadd.f32 %v5159_v52, %v6363_v17 }
 0x62b   : > { %1549 = vmax.xlane.f32.xlu0 %v6869_v7  ;;  %v6895_v52 = vadd.f32 %v1513_v0, %v6363_v17 }
 0x62c   : > { %v6919_v0 = vpop.permute.xlu0 %1828 }
 0x62e   : > { %1543 = vmax.xlane.f32.xlu1 %v6874_v42 }
 0x632   : > { %1553 = vmax.xlane.f32.xlu1 %v6878_v2 }
 0x636   : > { %1555 = vmax.xlane.f32.xlu1 %v6882_v35 }
 0x641   : > { %1832 = vrot.lane.b32.xlu0 %v6293_v39, %s6192_s13 }
 0x647   : > { %1830 = vrot.lane.b32.xlu1 %v6295_v40, %s6192_s13 }
 0x64b   : > { %1808 = vrot.lane.b32.xlu1 %v6275_v19, %s6193_s14 }
 0x64f   : > { %1812 = vrot.lane.b32.xlu1 %v6285_v29, %s6193_s14 }
 0x653   : > { %1816 = vrot.lane.b32.xlu1 %v6293_v39, %s6193_s14 }
 0x657   : > { %1820 = vrot.lane.b32.xlu1 %v6301_v49, %s6193_s14 }
 0x65b   : > { %2105 = vrot.lane.b32.xlu1 %v6275_v19, %s6194_s15 }
 0x65f   : > { %2107 = vrot.lane.b32.xlu1 %v6287_v30, %s6194_s15 }
 0x660   : > { %1551 = vmax.xlane.f32.xlu0 %v6895_v52 }
 0x663   : > { %2111 = vrot.lane.b32.xlu1 %v6295_v40, %s6194_s15 }
 0x667   : > { %2113 = vrot.lane.b32.xlu1 %v6293_v39, %s6194_s15 }
 0x66b   : > { %2117 = vrot.lane.b32.xlu1 %v6301_v49, %s6194_s15 }
 0x66f   : > { %2284 = vrot.lane.b32.xlu1 %v6287_v30, %s6195_s16 }
 0x676   : > { %1834 = vrot.lane.b32.xlu0 %v6303_v50, %s6192_s13 }
 0x67a   : > { %1836 = vrot.lane.b32.xlu0 %v6301_v49, %s6192_s13 }
 0x67e   : > { %1806 = vrot.lane.b32.xlu0 %v6277_v20, %s6193_s14 }
 0x682   : > { %1810 = vrot.lane.b32.xlu0 %v6287_v30, %s6193_s14 }
 0x686   : > { %1814 = vrot.lane.b32.xlu0 %v6295_v40, %s6193_s14 }
 0x68a   : > { %1818 = vrot.lane.b32.xlu0 %v6303_v50, %s6193_s14 }
 0x68e   : > { %2103 = vrot.lane.b32.xlu0 %v6277_v20, %s6194_s15 }
 0x692   : > { %2109 = vrot.lane.b32.xlu0 %v6285_v29, %s6194_s15 }
 0x696   : > { %2115 = vrot.lane.b32.xlu0 %v6303_v50, %s6194_s15  ;;  %s6213_s15 = smov 28  }
 0x69a   : > { %2280 = vrot.lane.b32.xlu0 %v6277_v20, %s6195_s16 }
 0x69e   : > { %2282 = vrot.lane.b32.xlu0 %v6275_v19, %s6195_s16 }
 0x69f   : > { %v1530_v36 = vpop.xlane.xlu0 %1529 }
 0x6a0   : > { %v1559_v25 = vsub.f32 %v6826_v5, %v1530_v36 }
 0x6a2   : > { %v1528_v59 = vpop.xlane.xlu1 %1527  ;;  %2286 = vrot.lane.b32.xlu0 %v6285_v29, %s6195_s16  ;;  %v1577_v43 = vmul.f32 1.442695, %v1559_v25 }
 0x6a3   : > { %v1558_v31 = vsub.f32 %v6830_v58, %v1528_v59  ;;  %v1526_v46 = vpop.xlane.xlu0 %1525 }
 0x6a4   : > { %v1557_v34 = vsub.f32 %v6833_v60, %v1526_v46 }
 0x6a5   : > { %v1575_v24 = vmul.f32 1.442695, %v1558_v31 }
 0x6a6   : > { %v1573_v47 = vmul.f32 1.442695, %v1557_v34 }
 0x6a7   : > { %5727 = vpow2.f32 %v1575_v24  ;;  %v1538_v13 = vpop.xlane.xlu1 %1537  ;;  %v1532_v38 = vpop.xlane.xlu0 %1531 }
 0x6a8   : > { %5729 = vpow2.f32 %v1573_v47  ;;  %v1560_v1 = vsub.f32 %v6838_v14, %v1532_v38  ;;  %v1563_v51 = vsub.f32 %v6841_v45, %v1538_v13 }
 0x6a9   : > { %5731 = vpow2.f32 %v1577_v43 }
 0x6aa   : > { %v1579_v6 = vmul.f32 1.442695, %v1560_v1  ;;  %v1585_v24 = vmul.f32 1.442695, %v1563_v51 }
 0x6ab   : > { %v1534_v28 = vpop.xlane.xlu1 %1533  ;;  %v1536_v56 = vpop.xlane.xlu0 %1535 }
 0x6ac   : > { %v1561_v59 = vsub.f32 %v6849_v32, %v1534_v28  ;;  %v1562_v58 = vsub.f32 %v6846_v61, %v1536_v56  ;;  %5733 = vpow2.f32 %v1579_v6 }
 0x6ae   : > { %v1581_v31 = vmul.f32 1.442695, %v1561_v59  ;;  %v1583_v34 = vmul.f32 1.442695, %v1562_v58 }
 0x6af   : > { %v1540_v46 = vpop.xlane.xlu1 %1539  ;;  %v1546_v6 = vpop.xlane.xlu0 %1545 }
 0x6b0   : > { %5735 = vpow2.f32 %v1581_v31  ;;  %v1564_v25 = vsub.f32 %v6854_v3, %v1540_v46  ;;  %v1567_v5 = vsub.f32 %v6857_v33, %v1546_v6  ;;  %v1863_v3 = vsel %vm463_vm1, %v6789_v55, 0 }
 0x6b1   : > { %v6935_v47 = vpop.eup %5727  ;;  %5737 = vpow2.f32 %v1583_v34 }
 0x6b2   : > { %v6937_v38 = vpop.eup %5729  ;;  %v1587_v13 = vmul.f32 1.442695, %v1564_v25  ;;  %5739 = vpow2.f32 %v1585_v24  ;;  %v1593_v31 = vmul.f32 1.442695, %v1567_v5 }
 0x6b3   : > { %v1542_v43 = vpop.xlane.xlu1 %1541  ;;  %v1637_v32 = vpack.c.bf16 %v6935_v47, %v6937_v38  ;;  %v6941_v56 = vpop.eup %5731 }
 0x6b4   : > { %5741 = vpow2.f32 %v1587_v13  ;;  %v1565_v28 = vsub.f32 %v6862_v18, %v1542_v43 }
 0x6b5   : > { %5176 = vmatprep.mubr.bf16.mxu0 %v1637_v32  ;;  %v1869_v32 = vsel %vm463_vm1, %v6921_v9, 0 }
 0x6b6   : > { %v6944_v1 = vpop.eup %5733  ;;  %v1589_v61 = vmul.f32 1.442695, %v1565_v28 }
 0x6b7   : > { %9219 = vst [vmem:[#allocation60_spill] sm:$0xff] %v6944_v1  ;;  %v1548_v51 = vpop.xlane.xlu1 %1547  ;;  %v1638_v14 = vpack.c.bf16 %v6944_v1, %v6941_v56 }
 0x6b8   : > { %v1568_v60 = vsub.f32 %v6866_v63, %v1548_v51  ;;  %5743 = vpow2.f32 %v1589_v61 }
 0x6b9   : > { %5177 = vmatmul.mubr.bf16.vlgmr.msra.gmra.mrb[48].mxu0 %v1638_v14 }
 0x6ba   : > { %v6950_v45 = vpop.eup %5735  ;;  %v1595_v18 = vmul.f32 1.442695, %v1568_v60  ;;  %5193 = vmatpush3.bf16.xpose.msra.mxu0 %v1863_v3  ;;  %v1872_v60 = vsel %vm463_vm1, %v6919_v0, 0 }
 0x6bb   : > { %v6954_v36 = vpop.eup %5737  ;;  %v1544_v59 = vpop.xlane.xlu1 %1543  ;;  %5573 = vmatprep.subr.msk.bf16.mxu0 %vm463_vm1, %v6914_v62 }
 0x6bc   : > { %9220 = vst [vmem:[#allocation61_spill] sm:$0xff] %v6954_v36  ;;  %v1566_v63 = vsub.f32 %v6874_v42, %v1544_v59  ;;  %v1639_v33 = vpack.c.bf16 %v6954_v36, %v6950_v45  ;;  %v6961_v58 = vpop.eup %5739  ;;  %5745 = vpow2.f32 %v1595_v18  ;;  %v1866_v42 = vsel %vm463_vm1, %v6914_v62, 0 }
 0x6be   : > { %v6963_v34 = vpop.eup %5741  ;;  %v1591_v55 = vmul.f32 1.442695, %v1566_v63  ;;  %5180 = vmatprep.mubr.bf16.mxu0 %v1639_v33 }
 0x6bf   : > { %9221 = vst [vmem:[#allocation62_spill] sm:$0xff] %v6963_v34  ;;  %v1640_v24 = vpack.c.bf16 %v6963_v34, %v6961_v58  ;;  %v1554_v46 = vpop.xlane.xlu1 %1553 }
 0x6c0   : > { %5747 = vpow2.f32 %v1591_v55 }
 0x6c1   : > { %5749 = vpow2.f32 %v1593_v31  ;;  %5181 = vmatmul.mubr.bf16.gmra.mrb[52].mxu0 %v1640_v24 }
 0x6c2   : > { %5195 = vmatpush3.bf16.xpose.msra.mxu0 %v1866_v42  ;;  %v6971_v25 = vpop.eup %5743 }
 0x6c3   : > { %5574 = vmatprep.subr.msk.bf16.mxu0 %vm463_vm1, %v6921_v9  ;;  %9222 = vst [vmem:[#allocation63_spill] sm:$0xff] %v6971_v25  ;;  %v1556_v51 = vpop.xlane.xlu1 %1555  ;;  %v1550_v9 = vpop.xlane.xlu0 %1549 }
 0x6c4   : > { %v1569_v18 = vsub.f32 %v6869_v7, %v1550_v9  ;;  %v1572_v59 = vsub.f32 %v6882_v35, %v1556_v51 }
 0x6c6   : > { %v6973_v13 = vpop.eup %5745  ;;  %v1597_v63 = vmul.f32 1.442695, %v1569_v18  ;;  %v1603_v33 = vmul.f32 1.442695, %v1572_v59 }
 0x6c7   : > { %9223 = vst [vmem:[#allocation64_spill] sm:$0xff] %v6973_v13  ;;  %v1831_v14 = vpop.permute.xlu1 %1830  ;;  %v1833_v61 = vpop.permute.xlu0 %1832 }
 0x6c8   : > { %v1875_v5 = vsel %vm463_vm1, %v1831_v14, 0  ;;  %v1878_v3 = vsel %vm463_vm1, %v1833_v61, 0  ;;  %5751 = vpow2.f32 %v1597_v63 }
 0x6c9   : > { %5753 = vpow2.f32 %v1603_v33 }
 0x6ca   : > { %v6975_v43 = vpop.eup %5747  ;;  %5197 = vmatpush3.bf16.xpose.msra.mxu0 %v1869_v32 }
 0x6cb   : > { %9224 = vst [vmem:[#allocation65_spill] sm:$0xff] %v6975_v43  ;;  %v6979_v6 = vpop.eup %5749  ;;  %v1641_v62 = vpack.c.bf16 %v6975_v43, %v6971_v25  ;;  %5575 = vmatprep.subr.msk.bf16.mxu0 %vm463_vm1, %v6919_v0  ;;  %v1571_v0 = vsub.f32 %v6878_v2, %v1554_v46  ;;  %v1809_v32 = vpop.permute.xlu1 %1808 }
 0x6cc   : > { %9225 = vst [vmem:[#allocation66_spill] sm:$0xff] %v6979_v6  ;;  %v1642_v28 = vpack.c.bf16 %v6973_v13, %v6979_v6 }
 0x6cd   : > { %5184 = vmatprep.mubr.bf16.mxu0 %v1641_v62  ;;  %v1601_v24 = vmul.f32 1.442695, %v1571_v0 }
 0x6ce   : > { %5185 = vmatmul.mubr.bf16.gmra.mrb[56].mxu0 %v1642_v28 }
 0x6cf   : > { %v1813_v2 = vpop.permute.xlu1 %1812 }
 0x6d2   : > { %5199 = vmatpush3.bf16.xpose.msra.mxu0 %v1872_v60  ;;  %v7000_v28 = vpop.eup %5751 }
 0x6d3   : > { %5576 = vmatprep.subr.msk.bf16.mxu0 %vm463_vm1, %v1831_v14  ;;  %9226 = vst [vmem:[#allocation67_spill] sm:$0xff] %v7000_v28  ;;  %v7003_v51 = vpop.eup %5753  ;;  %v1817_v9 = vpop.permute.xlu1 %1816 }
 0x6d4   : > { %9227 = vst [vmem:[#allocation68_spill] sm:$0xff] %v7003_v51 }
 0x6d7   : > { %v1821_v59 = vpop.permute.xlu1 %1820 }
 0x6da   : > { %5201 = vmatpush3.bf16.xpose.msra.mxu0 %v1875_v5 }
 0x6db   : > { %5577 = vmatprep.subr.msk.bf16.mxu0 %vm463_vm1, %v1833_v61  ;;  %v2106_v63 = vpop.permute.xlu1 %2105 }
 0x6e2   : > { %5203 = vmatpush3.bf16.xpose.msra.mxu0 %v1878_v3 }
 0x6ed   : > { %v1552_v31 = vpop.xlane.xlu0 %1551 }
 0x6ee   : > { %v1570_v55 = vsub.f32 %v6895_v52, %v1552_v31  ;;  %v2108_v31 = vpop.permute.xlu1 %2107 }
 0x6f0   : > { %v1599_v42 = vmul.f32 1.442695, %v1570_v55 }
 0x6f1   : > { %v1835_v62 = vpop.permute.xlu0 %1834 }
 0x6f2   : > { %5755 = vpow2.f32 %v1599_v42  ;;  %5578 = vmatprep.subr.msk.bf16.mxu0 %vm463_vm1, %v1835_v62  ;;  %v1881_v7 = vsel %vm463_vm1, %v1835_v62, 0 }
 0x6f3   : > { %5757 = vpow2.f32 %v1601_v24  ;;  %5205 = vmatpush3.bf16.xpose.msra.mxu0 %v1881_v7  ;;  %v2112_v24 = vpop.permute.xlu1 %2111 }
 0x6f5   : > { %v1837_v35 = vpop.permute.xlu0 %1836 }
 0x6f6   : > { %5579 = vmatprep.subr.msk.bf16.mxu0 %vm463_vm1, %v1837_v35  ;;  %v1884_v52 = vsel %vm463_vm1, %v1837_v35, 0 }
 0x6f7   : > { %v2114_v42 = vpop.permute.xlu1 %2113 }
 0x6f9   : > { %v1807_v46 = vpop.permute.xlu0 %1806 }
 0x6fb   : > { %5207 = vmatpush3.bf16.xpose.msra.mxu0 %v1884_v52  ;;  %v2118_v62 = vpop.permute.xlu1 %2117 }
 0x6fc   : > { %v7005_v60 = vpop.eup %5755 }
 0x6fd   : > { %9228 = vst [vmem:[#allocation69_spill] sm:$0xff] %v7005_v60  ;;  %v7007_v14 = vpop.eup %5757  ;;  %v1811_v5 = vpop.permute.xlu0 %1810  ;;  %v1643_v61 = vpack.c.bf16 %v7005_v60, %v7000_v28 }
 0x6fe   : > { %9229 = vst [vmem:[#allocation70_spill] sm:$0xff] %v7007_v14  ;;  %v1644_v3 = vpack.c.bf16 %v7003_v51, %v7007_v14 }
 0x6ff   : > { %5188 = vmatprep.mubr.bf16.mxu0 %v1643_v61 }
 0x700   : > { %5189 = vmatmul.mubr.bf16.gmra.mrb[60].mxu0 %v1644_v3 }
 0x701   : > { %5208 = vmatprep.mubr.msk.bf16.mxu0 %vm463_vm1, %v1807_v46  ;;  %v1815_v18 = vpop.permute.xlu0 %1814 }
 0x705   : > { %v1819_v0 = vpop.permute.xlu0 %1818 }
 0x708   : > { %5209 = vmatmul.mubr.msk.bf16.vlgmr.msra.gmra.mrb[64].mxu0 %vm463_vm1, %v1809_v32 }
 0x709   : > { %5212 = vmatprep.mubr.msk.bf16.mxu0 %vm463_vm1, %v1811_v5  ;;  %v2104_v33 = vpop.permute.xlu0 %2103 }
 0x70a   : > { %5224 = vmatprep.subr.bf16.mxu1 %v2104_v33 }
 0x70b   : > { %5225 = vmatpush3.bf16.msra.mxu1 %v2104_v33 }
 0x70c   : > { %5226 = vmatprep.subr.bf16.mxu1 %v2106_v63 }
 0x70d   : > { %v2110_v55 = vpop.permute.xlu0 %2109 }
 0x70f   : > { %5227 = vmatpush3.bf16.msra.mxu1 %v2106_v63 }
 0x710   : > { %5213 = vmatmul.mubr.msk.bf16.gmra.mrb[68].mxu0 %vm463_vm1, %v1813_v2  ;;  %5228 = vmatprep.subr.bf16.mxu1 %v2108_v31 }
 0x711   : > { %5216 = vmatprep.mubr.msk.bf16.mxu0 %vm463_vm1, %v1815_v18  ;;  %v2116_v32 = vpop.permute.xlu0 %2115 }
 0x713   : > { %5229 = vmatpush3.bf16.msra.mxu1 %v2108_v31 }
 0x714   : > { %5230 = vmatprep.subr.bf16.mxu1 %v2110_v55 }
 0x715   : > { %v7021_v7 = vpop.permute.xlu0 %2280 }
 0x717   : > { %5231 = vmatpush3.bf16.msra.mxu1 %v2110_v55 }
 0x718   : > { %5217 = vmatmul.mubr.msk.bf16.gmra.mrb[72].mxu0 %vm463_vm1, %v1817_v9  ;;  %5232 = vmatprep.subr.bf16.mxu1 %v2112_v24 }
 0x719   : > { %5220 = vmatprep.mubr.msk.bf16.mxu0 %vm463_vm1, %v1819_v0 }
 0x71b   : > { %5233 = vmatpush3.bf16.msra.mxu1 %v2112_v24 }
 0x71c   : > { %5234 = vmatprep.subr.bf16.mxu1 %v2114_v42 }
 0x71f   : > { %5235 = vmatpush3.bf16.msra.mxu1 %v2114_v42 }
 0x720   : > { %5221 = vmatmul.mubr.msk.bf16.gmra.mrb[76].mxu0 %vm463_vm1, %v1821_v59  ;;  %5236 = vmatprep.subr.bf16.mxu1 %v2116_v32 }
 0x723   : > { %5237 = vmatpush3.bf16.msra.mxu1 %v2116_v32 }
 0x724   : > { %5238 = vmatprep.subr.bf16.mxu1 %v2118_v62 }
 0x727   : > { %5239 = vmatpush3.bf16.msra.mxu1 %v2118_v62 }
 0x728   : > { %5580 = vmatprep.subr.msk.bf16.mxu1 %vm463_vm1, %v7021_v7 }
 0x78c   : > { %v7025_v35 = vpop.f32.mrb[48].mxu0 }
 0x78d   : > { %9230 = vst [vmem:[#allocation71_spill] sm:$0xff] %v7025_v35  ;;  %v7027_v2 = vpop.f32.mrb[49].mxu0 }
 0x78e   : > { %9231 = vst [vmem:[#allocation72_spill] sm:$0xff] %v7027_v2  ;;  %v7029_v46 = vpop.f32.mrb[50].mxu0 }
 0x78f   : > { %9232 = vst [vmem:[#allocation73_spill] sm:$0xff] %v7029_v46  ;;  %v7031_v52 = vpop.f32.mrb[51].mxu0 }
 0x790   : > { %9233 = vst [vmem:[#allocation74_spill] sm:$0xff] %v7031_v52 }
 0x794   : > { %v7033_v9 = vpop.f32.mrb[52].mxu0 }
 0x795   : > { %9234 = vst [vmem:[#allocation75_spill] sm:$0xff] %v7033_v9  ;;  %v7035_v5 = vpop.f32.mrb[53].mxu0 }
 0x796   : > { %9235 = vst [vmem:[#allocation76_spill] sm:$0xff] %v7035_v5  ;;  %v7037_v61 = vpop.f32.mrb[54].mxu0 }
 0x797   : > { %9236 = vst [vmem:[#allocation77_spill] sm:$0xff] %v7037_v61  ;;  %v7039_v3 = vpop.f32.mrb[55].mxu0 }
 0x798   : > { %9237 = vst [vmem:[#allocation78_spill] sm:$0xff] %v7039_v3 }
 0x7a1   : > { %v7041_v18 = vpop.f32.mrb[56].mxu0 }
 0x7a2   : > { %9238 = vst [vmem:[#allocation79_spill] sm:$0xff] %v7041_v18  ;;  %v7043_v59 = vpop.f32.mrb[57].mxu0 }
 0x7a3   : > { %9239 = vst [vmem:[#allocation80_spill] sm:$0xff] %v7043_v59  ;;  %v7045_v0 = vpop.f32.mrb[58].mxu0 }
 0x7a4   : > { %9240 = vst [vmem:[#allocation81_spill] sm:$0xff] %v7045_v0  ;;  %v7047_v63 = vpop.f32.mrb[59].mxu0 }
 0x7a5   : > { %9241 = vst [vmem:[#allocation82_spill] sm:$0xff] %v7047_v63 }
 0x7d3   : > { %v7049_v33 = vpop.f32.mrb[60].mxu0 }
 0x7d4   : > { %9242 = vst [vmem:[#allocation83_spill] sm:$0xff] %v7049_v33  ;;  %v7051_v31 = vpop.f32.mrb[61].mxu0 }
 0x7d5   : > { %9243 = vst [vmem:[#allocation84_spill] sm:$0xff] %v7051_v31  ;;  %v7053_v55 = vpop.f32.mrb[62].mxu0 }
 0x7d6   : > { %9244 = vst [vmem:[#allocation85_spill] sm:$0xff] %v7053_v55  ;;  %v7055_v24 = vpop.f32.mrb[63].mxu0 }
 0x7d7   : > { %9245 = vst [vmem:[#allocation86_spill] sm:$0xff] %v7055_v24 }
 0x7db   : > { %v5210_v42 = vpop.f32.mrb[64].mxu0 }
 0x7dc   : > { %v7058_v32 = vadd.f32 %v5210_v42, %v6363_v17  ;;  %v1920_v62 = vpop.f32.mrb[65].mxu0 }
 0x7dd   : > { %v5211_v14 = vpop.f32.mrb[66].mxu0  ;;  %v7065_v33 = vadd.f32 %v1920_v62, %v6363_v17 }
 0x7de   : > { %1987 = vmax.xlane.f32.xlu0 %v7058_v32  ;;  %v1923_v28 = vpop.f32.mrb[67].mxu0  ;;  %v7070_v24 = vadd.f32 %v5211_v14, %v6363_v17 }
 0x7df   : > { %v7062_v51 = vadd.f32 %v1923_v28, %v6363_v17 }
 0x7e1   : > { %1985 = vmax.xlane.f32.xlu1 %v7062_v51 }
 0x7e2   : > { %1983 = vmax.xlane.f32.xlu0 %v7065_v33 }
 0x7e3   : > { %v5214_v55 = vpop.f32.mrb[68].mxu0 }
 0x7e4   : > { %v7073_v42 = vadd.f32 %v5214_v55, %v6363_v17  ;;  %v1936_v31 = vpop.f32.mrb[69].mxu0 }
 0x7e5   : > { %v5215_v60 = vpop.f32.mrb[70].mxu0  ;;  %v7081_v0 = vadd.f32 %v1936_v31, %v6363_v17 }
 0x7e6   : > { %1989 = vmax.xlane.f32.xlu0 %v7070_v24  ;;  %1995 = vmax.xlane.f32.xlu1 %v7073_v42  ;;  %v1939_v28 = vpop.f32.mrb[71].mxu0  ;;  %v7086_v55 = vadd.f32 %v5215_v60, %v6363_v17 }
 0x7e7   : > { %v7078_v62 = vadd.f32 %v1939_v28, %v6363_v17 }
 0x7ea   : > { %1993 = vmax.xlane.f32.xlu0 %v7078_v62  ;;  %1991 = vmax.xlane.f32.xlu1 %v7081_v0 }
 0x7eb   : > { %v5218_v14 = vpop.f32.mrb[72].mxu0 }
 0x7ec   : > { %v7089_v18 = vadd.f32 %v5218_v14, %v6363_v17  ;;  %v1952_v63 = vpop.f32.mrb[73].mxu0 }
 0x7ed   : > { %v5219_v59 = vpop.f32.mrb[74].mxu0  ;;  %v7094_v31 = vadd.f32 %v1952_v63, %v6363_v17 }
 0x7ee   : > { %1997 = vmax.xlane.f32.xlu1 %v7086_v55  ;;  %2003 = vmax.xlane.f32.xlu0 %v7089_v18  ;;  %v1955_v28 = vpop.f32.mrb[75].mxu0  ;;  %v7098_v9 = vadd.f32 %v5219_v59, %v6363_v17 }
 0x7ef   : > { %v7106_v26 = vadd.f32 %v1955_v28, %v6363_v17  ;;  %v7153_v28 = vpop.permute.xlu1 %2284 }
 0x7f2   : > { %1999 = vmax.xlane.f32.xlu1 %v7094_v31 }
 0x7f3   : > { %v5222_v61 = vpop.f32.mrb[76].mxu0 }
 0x7f4   : > { %v1968_v60 = vpop.f32.mrb[77].mxu0  ;;  %v7110_v63 = vadd.f32 %v5222_v61, %v6363_v17 }
 0x7f5   : > { %v7101_v14 = vadd.f32 %v1968_v60, %v6363_v17  ;;  %v5223_v3 = vpop.f32.mrb[78].mxu0 }
 0x7f6   : > { %2005 = vmax.xlane.f32.xlu1 %v7098_v9  ;;  %v1971_v5 = vpop.f32.mrb[79].mxu0  ;;  %v7114_v59 = vadd.f32 %v5223_v3, %v6363_v17 }
 0x7f7   : > { %2007 = vmax.xlane.f32.xlu0 %v7101_v14  ;;  %v7127_v61 = vadd.f32 %v1971_v5, %v6363_v17  ;;  %v7146_v5 = vpop.permute.xlu0 %2282 }
 0x7fa   : > { %2001 = vmax.xlane.f32.xlu1 %v7106_v26 }
 0x7fb   : > { %v7151_v3 = vpop.permute.xlu0 %2286 }
 0x7fe   : > { %2011 = vmax.xlane.f32.xlu1 %v7110_v63 }
 0x802   : > { %2013 = vmax.xlane.f32.xlu1 %v7114_v59 }
 0x80d   : > { %2290 = vrot.lane.b32.xlu0 %v6293_v39, %s6195_s16 }
 0x813   : > { %2288 = vrot.lane.b32.xlu1 %v6295_v40, %s6195_s16 }
 0x817   : > { %2266 = vrot.lane.b32.xlu1 %v6275_v19, %s6196_s17 }
 0x81b   : > { %2270 = vrot.lane.b32.xlu1 %v6285_v29, %s6196_s17 }
 0x81f   : > { %2274 = vrot.lane.b32.xlu1 %v6293_v39, %s6196_s17 }
 0x823   : > { %2278 = vrot.lane.b32.xlu1 %v6301_v49, %s6196_s17 }
 0x827   : > { %2563 = vrot.lane.b32.xlu1 %v6275_v19, %s6197_s20 }
 0x82b   : > { %2565 = vrot.lane.b32.xlu1 %v6287_v30, %s6197_s20 }
 0x82c   : > { %2009 = vmax.xlane.f32.xlu0 %v7127_v61 }
 0x82f   : > { %2569 = vrot.lane.b32.xlu1 %v6295_v40, %s6197_s20 }
 0x833   : > { %2571 = vrot.lane.b32.xlu1 %v6293_v39, %s6197_s20 }
 0x837   : > { %2575 = vrot.lane.b32.xlu1 %v6301_v49, %s6197_s20 }
 0x83b   : > { %2742 = vrot.lane.b32.xlu1 %v6287_v30, %s6198_s21 }
 0x842   : > { %2292 = vrot.lane.b32.xlu0 %v6303_v50, %s6195_s16 }
 0x846   : > { %2294 = vrot.lane.b32.xlu0 %v6301_v49, %s6195_s16  ;;  %s4703_s16 = sshll.u32 %s9599_s19, 7 }
 0x84a   : > { %2264 = vrot.lane.b32.xlu0 %v6277_v20, %s6196_s17 }
 0x84e   : > { %2268 = vrot.lane.b32.xlu0 %v6287_v30, %s6196_s17 }
 0x852   : > { %2272 = vrot.lane.b32.xlu0 %v6295_v40, %s6196_s17 }
 0x856   : > { %2276 = vrot.lane.b32.xlu0 %v6303_v50, %s6196_s17 }
 0x85a   : > { %2561 = vrot.lane.b32.xlu0 %v6277_v20, %s6197_s20 }
 0x85e   : > { %2567 = vrot.lane.b32.xlu0 %v6285_v29, %s6197_s20 }
 0x862   : > { %2573 = vrot.lane.b32.xlu0 %v6303_v50, %s6197_s20 }
 0x866   : > { %2738 = vrot.lane.b32.xlu0 %v6277_v20, %s6198_s21 }
 0x86a   : > { %2740 = vrot.lane.b32.xlu0 %v6275_v19, %s6198_s21 }
 0x86b   : > { %v1988_v60 = vpop.xlane.xlu0 %1987 }
 0x86c   : > { %v2017_v35 = vsub.f32 %v7058_v32, %v1988_v60 }
 0x86e   : > { %v1986_v37 = vpop.xlane.xlu1 %1985  ;;  %2744 = vrot.lane.b32.xlu0 %v6285_v29, %s6198_s21  ;;  %v2035_v48 = vmul.f32 1.442695, %v2017_v35 }
 0x86f   : > { %v2016_v41 = vsub.f32 %v7062_v51, %v1986_v37  ;;  %v1984_v46 = vpop.xlane.xlu0 %1983 }
 0x870   : > { %v2015_v52 = vsub.f32 %v7065_v33, %v1984_v46 }
 0x871   : > { %v2033_v2 = vmul.f32 1.442695, %v2016_v41 }
 0x872   : > { %v2031_v57 = vmul.f32 1.442695, %v2015_v52 }
 0x873   : > { %5759 = vpow2.f32 %v2033_v2  ;;  %v1996_v53 = vpop.xlane.xlu1 %1995  ;;  %v1990_v54 = vpop.xlane.xlu0 %1989 }
 0x874   : > { %5761 = vpow2.f32 %v2031_v57  ;;  %v2018_v13 = vsub.f32 %v7070_v24, %v1990_v54  ;;  %v2021_v8 = vsub.f32 %v7073_v42, %v1996_v53 }
 0x875   : > { %5763 = vpow2.f32 %v2035_v48 }
 0x876   : > { %v2037_v43 = vmul.f32 1.442695, %v2018_v13  ;;  %v2043_v2 = vmul.f32 1.442695, %v2021_v8 }
 0x877   : > { %v1992_v10 = vpop.xlane.xlu1 %1991  ;;  %v1994_v34 = vpop.xlane.xlu0 %1993 }
 0x878   : > { %v2019_v37 = vsub.f32 %v7081_v0, %v1992_v10  ;;  %v2020_v51 = vsub.f32 %v7078_v62, %v1994_v34  ;;  %5765 = vpow2.f32 %v2037_v43 }
 0x87a   : > { %v2039_v41 = vmul.f32 1.442695, %v2019_v37  ;;  %v2041_v46 = vmul.f32 1.442695, %v2020_v51 }
 0x87b   : > { %v1998_v52 = vpop.xlane.xlu1 %1997  ;;  %v2004_v8 = vpop.xlane.xlu0 %2003 }
 0x87c   : > { %5767 = vpow2.f32 %v2039_v41  ;;  %v2022_v57 = vsub.f32 %v7086_v55, %v1998_v52  ;;  %v2025_v32 = vsub.f32 %v7089_v18, %v2004_v8  ;;  %v2321_v55 = vsel %vm463_vm1, %v7021_v7, 0 }
 0x87d   : > { %v7167_v35 = vpop.eup %5759  ;;  %5769 = vpow2.f32 %v2041_v46 }
 0x87e   : > { %9246 = vst [vmem:[#allocation87_spill] sm:$0xff] %v7167_v35  ;;  %v7169_v54 = vpop.eup %5761  ;;  %v2045_v53 = vmul.f32 1.442695, %v2022_v57  ;;  %5771 = vpow2.f32 %v2043_v2  ;;  %v2051_v41 = vmul.f32 1.442695, %v2025_v32 }
 0x87f   : > { %v2000_v48 = vpop.xlane.xlu1 %1999  ;;  %v2095_v10 = vpack.c.bf16 %v7167_v35, %v7169_v54  ;;  %v7173_v34 = vpop.eup %5763 }
 0x880   : > { %5773 = vpow2.f32 %v2045_v53  ;;  %v2023_v13 = vsub.f32 %v7094_v31, %v2000_v48 }
 0x881   : > { %5240 = vmatprep.mubr.bf16.mxu1 %v2095_v10  ;;  %v2327_v10 = vsel %vm463_vm1, %v7153_v28, 0 }
 0x882   : > { %v7176_v43 = vpop.eup %5765  ;;  %v2047_v62 = vmul.f32 1.442695, %v2023_v13 }
 0x883   : > { %9247 = vst [vmem:[#allocation88_spill] sm:$0xff] %v7176_v43  ;;  %v2006_v0 = vpop.xlane.xlu1 %2005  ;;  %v2096_v24 = vpack.c.bf16 %v7176_v43, %v7173_v34 }
 0x884   : > { %v2026_v33 = vsub.f32 %v7098_v9, %v2006_v0  ;;  %5775 = vpow2.f32 %v2047_v62 }
 0x885   : > { %5241 = vmatmul.mubr.bf16.vlgmr.msra.gmra.mrb[48].mxu1 %v2096_v24 }
 0x886   : > { %v7182_v42 = vpop.eup %5767  ;;  %v2053_v31 = vmul.f32 1.442695, %v2026_v33  ;;  %5257 = vmatpush3.bf16.xpose.msra.mxu1 %v2321_v55  ;;  %v2330_v33 = vsel %vm463_vm1, %v7151_v3, 0 }
 0x887   : > { %v7186_v60 = vpop.eup %5769  ;;  %v2002_v37 = vpop.xlane.xlu1 %2001  ;;  %5581 = vmatprep.subr.msk.bf16.mxu1 %vm463_vm1, %v7146_v5 }
 0x888   : > { %9248 = vst [vmem:[#allocation89_spill] sm:$0xff] %v7186_v60  ;;  %v2024_v9 = vsub.f32 %v7106_v26, %v2002_v37  ;;  %v2097_v18 = vpack.c.bf16 %v7186_v60, %v7182_v42  ;;  %v7193_v51 = vpop.eup %5771  ;;  %5777 = vpow2.f32 %v2053_v31  ;;  %v2324_v26 = vsel %vm463_vm1, %v7146_v5, 0 }
 0x88a   : > { %v7195_v46 = vpop.eup %5773  ;;  %v2049_v7 = vmul.f32 1.442695, %v2024_v9  ;;  %5244 = vmatprep.mubr.bf16.mxu1 %v2097_v18 }
 0x88b   : > { %9249 = vst [vmem:[#allocation90_spill] sm:$0xff] %v7195_v46  ;;  %v2098_v2 = vpack.c.bf16 %v7195_v46, %v7193_v51  ;;  %v2012_v52 = vpop.xlane.xlu1 %2011 }
 0x88c   : > { %5779 = vpow2.f32 %v2049_v7 }
 0x88d   : > { %5781 = vpow2.f32 %v2051_v41  ;;  %5245 = vmatmul.mubr.bf16.gmra.mrb[52].mxu1 %v2098_v2 }
 0x88e   : > { %5259 = vmatpush3.bf16.xpose.msra.mxu1 %v2324_v26  ;;  %v7203_v57 = vpop.eup %5775 }
 0x88f   : > { %5582 = vmatprep.subr.msk.bf16.mxu1 %vm463_vm1, %v7153_v28  ;;  %9250 = vst [vmem:[#allocation91_spill] sm:$0xff] %v7203_v57  ;;  %v2014_v0 = vpop.xlane.xlu1 %2013  ;;  %v2008_v28 = vpop.xlane.xlu0 %2007 }
 0x890   : > { %v2027_v31 = vsub.f32 %v7101_v14, %v2008_v28  ;;  %v2030_v37 = vsub.f32 %v7114_v59, %v2014_v0 }
 0x892   : > { %v7205_v53 = vpop.eup %5777  ;;  %v2055_v9 = vmul.f32 1.442695, %v2027_v31  ;;  %v2061_v18 = vmul.f32 1.442695, %v2030_v37 }
 0x893   : > { %9251 = vst [vmem:[#allocation92_spill] sm:$0xff] %v7205_v53  ;;  %v2289_v24 = vpop.permute.xlu1 %2288  ;;  %v2291_v62 = vpop.permute.xlu0 %2290 }
 0x894   : > { %v2333_v32 = vsel %vm463_vm1, %v2289_v24, 0  ;;  %v2336_v55 = vsel %vm463_vm1, %v2291_v62, 0  ;;  %5783 = vpow2.f32 %v2055_v9 }
 0x895   : > { %5785 = vpow2.f32 %v2061_v18 }
 0x896   : > { %v7207_v48 = vpop.eup %5779  ;;  %5261 = vmatpush3.bf16.xpose.msra.mxu1 %v2327_v10 }
 0x897   : > { %9252 = vst [vmem:[#allocation93_spill] sm:$0xff] %v7207_v48  ;;  %v7211_v8 = vpop.eup %5781  ;;  %v2099_v5 = vpack.c.bf16 %v7207_v48, %v7203_v57  ;;  %5583 = vmatprep.subr.msk.bf16.mxu1 %vm463_vm1, %v7151_v3  ;;  %v2029_v3 = vsub.f32 %v7110_v63, %v2012_v52  ;;  %v2267_v10 = vpop.permute.xlu1 %2266 }
 0x898   : > { %9253 = vst [vmem:[#allocation94_spill] sm:$0xff] %v7211_v8  ;;  %v2100_v13 = vpack.c.bf16 %v7205_v53, %v7211_v8 }
 0x899   : > { %5248 = vmatprep.mubr.bf16.mxu1 %v2099_v5  ;;  %v2059_v2 = vmul.f32 1.442695, %v2029_v3 }
 0x89a   : > { %5249 = vmatmul.mubr.bf16.gmra.mrb[56].mxu1 %v2100_v13 }
 0x89b   : > { %v2271_v63 = vpop.permute.xlu1 %2270 }
 0x89e   : > { %5263 = vmatpush3.bf16.xpose.msra.mxu1 %v2330_v33  ;;  %v7232_v13 = vpop.eup %5783 }
 0x89f   : > { %5584 = vmatprep.subr.msk.bf16.mxu1 %vm463_vm1, %v2289_v24  ;;  %9254 = vst [vmem:[#allocation95_spill] sm:$0xff] %v7232_v13  ;;  %v7235_v0 = vpop.eup %5785  ;;  %v2275_v28 = vpop.permute.xlu1 %2274 }
 0x8a0   : > { %9255 = vst [vmem:[#allocation96_spill] sm:$0xff] %v7235_v0 }
 0x8a3   : > { %v2279_v37 = vpop.permute.xlu1 %2278 }
 0x8a6   : > { %5265 = vmatpush3.bf16.xpose.msra.mxu1 %v2333_v32 }
 0x8a7   : > { %5585 = vmatprep.subr.msk.bf16.mxu1 %vm463_vm1, %v2291_v62  ;;  %v2564_v9 = vpop.permute.xlu1 %2563 }
 0x8ae   : > { %5267 = vmatpush3.bf16.xpose.msra.mxu1 %v2336_v55 }
 0x8b9   : > { %v2010_v41 = vpop.xlane.xlu0 %2009 }
 0x8ba   : > { %v2028_v7 = vsub.f32 %v7127_v61, %v2010_v41  ;;  %v2566_v41 = vpop.permute.xlu1 %2565 }
 0x8bc   : > { %v2057_v26 = vmul.f32 1.442695, %v2028_v7 }
 0x8bd   : > { %v2293_v5 = vpop.permute.xlu0 %2292 }
 0x8be   : > { %5787 = vpow2.f32 %v2057_v26  ;;  %5586 = vmatprep.subr.msk.bf16.mxu1 %vm463_vm1, %v2293_v5  ;;  %v2339_v14 = vsel %vm463_vm1, %v2293_v5, 0 }
 0x8bf   : > { %5789 = vpow2.f32 %v2059_v2  ;;  %5269 = vmatpush3.bf16.xpose.msra.mxu1 %v2339_v14  ;;  %v2570_v2 = vpop.permute.xlu1 %2569 }
 0x8c1   : > { %v2295_v59 = vpop.permute.xlu0 %2294 }
 0x8c2   : > { %5587 = vmatprep.subr.msk.bf16.mxu1 %vm463_vm1, %v2295_v59  ;;  %v2342_v61 = vsel %vm463_vm1, %v2295_v59, 0 }
 0x8c3   : > { %v2572_v26 = vpop.permute.xlu1 %2571 }
 0x8c5   : > { %v2265_v52 = vpop.permute.xlu0 %2264 }
 0x8c7   : > { %5271 = vmatpush3.bf16.xpose.msra.mxu1 %v2342_v61  ;;  %v2576_v5 = vpop.permute.xlu1 %2575 }
 0x8c8   : > { %v7237_v33 = vpop.eup %5787 }
 0x8c9   : > { %9256 = vst [vmem:[#allocation97_spill] sm:$0xff] %v7237_v33  ;;  %v7239_v24 = vpop.eup %5789  ;;  %v2269_v32 = vpop.permute.xlu0 %2268  ;;  %v2101_v62 = vpack.c.bf16 %v7237_v33, %v7232_v13 }
 0x8ca   : > { %9257 = vst [vmem:[#allocation98_spill] sm:$0xff] %v7239_v24  ;;  %v2102_v55 = vpack.c.bf16 %v7235_v0, %v7239_v24 }
 0x8cb   : > { %5252 = vmatprep.mubr.bf16.mxu1 %v2101_v62 }
 0x8cc   : > { %5253 = vmatmul.mubr.bf16.gmra.mrb[60].mxu1 %v2102_v55 }
 0x8cd   : > { %5272 = vmatprep.mubr.msk.bf16.mxu1 %vm463_vm1, %v2265_v52  ;;  %v2273_v31 = vpop.permute.xlu0 %2272 }
 0x8d1   : > { %v2277_v3 = vpop.permute.xlu0 %2276 }
 0x8d4   : > { %5273 = vmatmul.mubr.msk.bf16.vlgmr.msra.gmra.mrb[64].mxu1 %vm463_vm1, %v2267_v10 }
 0x8d5   : > { %5276 = vmatprep.mubr.msk.bf16.mxu1 %vm463_vm1, %v2269_v32  ;;  %v2562_v18 = vpop.permute.xlu0 %2561 }
 0x8d6   : > { %5288 = vmatprep.subr.bf16.mxu0 %v2562_v18 }
 0x8d7   : > { %5289 = vmatpush3.bf16.msra.mxu0 %v2562_v18 }
 0x8d8   : > { %5290 = vmatprep.subr.bf16.mxu0 %v2564_v9 }
 0x8d9   : > { %v2568_v7 = vpop.permute.xlu0 %2567 }
 0x8db   : > { %5291 = vmatpush3.bf16.msra.mxu0 %v2564_v9 }
 0x8dc   : > { %5277 = vmatmul.mubr.msk.bf16.gmra.mrb[68].mxu1 %vm463_vm1, %v2271_v63  ;;  %5292 = vmatprep.subr.bf16.mxu0 %v2566_v41 }
 0x8dd   : > { %5280 = vmatprep.mubr.msk.bf16.mxu1 %vm463_vm1, %v2273_v31  ;;  %v2574_v10 = vpop.permute.xlu0 %2573 }
 0x8df   : > { %5293 = vmatpush3.bf16.msra.mxu0 %v2566_v41 }
 0x8e0   : > { %5294 = vmatprep.subr.bf16.mxu0 %v2568_v7 }
 0x8e1   : > { %v7253_v14 = vpop.permute.xlu0 %2738 }
 0x8e3   : > { %5295 = vmatpush3.bf16.msra.mxu0 %v2568_v7 }
 0x8e4   : > { %5281 = vmatmul.mubr.msk.bf16.gmra.mrb[72].mxu1 %vm463_vm1, %v2275_v28  ;;  %5296 = vmatprep.subr.bf16.mxu0 %v2570_v2 }
 0x8e5   : > { %5284 = vmatprep.mubr.msk.bf16.mxu1 %vm463_vm1, %v2277_v3 }
 0x8e7   : > { %5297 = vmatpush3.bf16.msra.mxu0 %v2570_v2 }
 0x8e8   : > { %5298 = vmatprep.subr.bf16.mxu0 %v2572_v26 }
 0x8eb   : > { %5299 = vmatpush3.bf16.msra.mxu0 %v2572_v26 }
 0x8ec   : > { %5285 = vmatmul.mubr.msk.bf16.gmra.mrb[76].mxu1 %vm463_vm1, %v2279_v37  ;;  %5300 = vmatprep.subr.bf16.mxu0 %v2574_v10 }
 0x8ef   : > { %5301 = vmatpush3.bf16.msra.mxu0 %v2574_v10 }
 0x8f0   : > { %5302 = vmatprep.subr.bf16.mxu0 %v2576_v5 }
 0x8f3   : > { %5303 = vmatpush3.bf16.msra.mxu0 %v2576_v5 }
 0x8f4   : > { %5588 = vmatprep.subr.msk.bf16.mxu0 %vm463_vm1, %v7253_v14 }
 0x958   : > { %v7257_v59 = vpop.f32.mrb[48].mxu1 }
 0x959   : > { %9258 = vst [vmem:[#allocation99_spill] sm:$0xff] %v7257_v59  ;;  %v7259_v63 = vpop.f32.mrb[49].mxu1 }
 0x95a   : > { %9259 = vst [vmem:[#allocation100_spill] sm:$0xff] %v7259_v63  ;;  %v7261_v52 = vpop.f32.mrb[50].mxu1 }
 0x95b   : > { %9260 = vst [vmem:[#allocation101_spill] sm:$0xff] %v7261_v52  ;;  %v7263_v61 = vpop.f32.mrb[51].mxu1 }
 0x95c   : > { %9261 = vst [vmem:[#allocation102_spill] sm:$0xff] %v7263_v61 }
 0x960   : > { %v7265_v28 = vpop.f32.mrb[52].mxu1 }
 0x961   : > { %9262 = vst [vmem:[#allocation103_spill] sm:$0xff] %v7265_v28  ;;  %v7267_v32 = vpop.f32.mrb[53].mxu1 }
 0x962   : > { %9263 = vst [vmem:[#allocation104_spill] sm:$0xff] %v7267_v32  ;;  %v7269_v62 = vpop.f32.mrb[54].mxu1 }
 0x963   : > { %9264 = vst [vmem:[#allocation105_spill] sm:$0xff] %v7269_v62  ;;  %v7271_v55 = vpop.f32.mrb[55].mxu1 }
 0x964   : > { %9265 = vst [vmem:[#allocation106_spill] sm:$0xff] %v7271_v55 }
 0x96d   : > { %v7273_v31 = vpop.f32.mrb[56].mxu1 }
 0x96e   : > { %9266 = vst [vmem:[#allocation107_spill] sm:$0xff] %v7273_v31  ;;  %v7275_v37 = vpop.f32.mrb[57].mxu1 }
 0x96f   : > { %9267 = vst [vmem:[#allocation108_spill] sm:$0xff] %v7275_v37  ;;  %v7277_v3 = vpop.f32.mrb[58].mxu1 }
 0x970   : > { %9268 = vst [vmem:[#allocation109_spill] sm:$0xff] %v7277_v3  ;;  %v7279_v9 = vpop.f32.mrb[59].mxu1 }
 0x971   : > { %9269 = vst [vmem:[#allocation110_spill] sm:$0xff] %v7279_v9 }
 0x99f   : > { %v7281_v18 = vpop.f32.mrb[60].mxu1 }
 0x9a0   : > { %9270 = vst [vmem:[#allocation111_spill] sm:$0xff] %v7281_v18  ;;  %v7283_v41 = vpop.f32.mrb[61].mxu1 }
 0x9a1   : > { %9271 = vst [vmem:[#allocation112_spill] sm:$0xff] %v7283_v41  ;;  %v7285_v7 = vpop.f32.mrb[62].mxu1 }
 0x9a2   : > { %9272 = vst [vmem:[#allocation113_spill] sm:$0xff] %v7285_v7  ;;  %v7287_v2 = vpop.f32.mrb[63].mxu1 }
 0x9a3   : > { %9273 = vst [vmem:[#allocation114_spill] sm:$0xff] %v7287_v2 }
 0x9a7   : > { %v5274_v26 = vpop.f32.mrb[64].mxu1 }
 0x9a8   : > { %v7290_v10 = vadd.f32 %v5274_v26, %v6363_v17  ;;  %v2378_v5 = vpop.f32.mrb[65].mxu1 }
 0x9a9   : > { %v5275_v24 = vpop.f32.mrb[66].mxu1  ;;  %v7297_v18 = vadd.f32 %v2378_v5, %v6363_v17 }
 0x9aa   : > { %2445 = vmax.xlane.f32.xlu0 %v7290_v10  ;;  %v2381_v13 = vpop.f32.mrb[67].mxu1  ;;  %v7302_v2 = vadd.f32 %v5275_v24, %v6363_v17 }
 0x9ab   : > { %v7294_v0 = vadd.f32 %v2381_v13, %v6363_v17 }
 0x9ad   : > { %2443 = vmax.xlane.f32.xlu1 %v7294_v0 }
 0x9ae   : > { %2441 = vmax.xlane.f32.xlu0 %v7297_v18 }
 0x9af   : > { %v5278_v7 = vpop.f32.mrb[68].mxu1 }
 0x9b0   : > { %v7305_v26 = vadd.f32 %v5278_v7, %v6363_v17  ;;  %v2394_v41 = vpop.f32.mrb[69].mxu1 }
 0x9b1   : > { %v5279_v33 = vpop.f32.mrb[70].mxu1  ;;  %v7313_v3 = vadd.f32 %v2394_v41, %v6363_v17 }
 0x9b2   : > { %2447 = vmax.xlane.f32.xlu0 %v7302_v2  ;;  %2453 = vmax.xlane.f32.xlu1 %v7305_v26  ;;  %v2397_v13 = vpop.f32.mrb[71].mxu1  ;;  %v7318_v7 = vadd.f32 %v5279_v33, %v6363_v17 }
 0x9b3   : > { %v7310_v5 = vadd.f32 %v2397_v13, %v6363_v17 }
 0x9b6   : > { %2451 = vmax.xlane.f32.xlu0 %v7310_v5  ;;  %2449 = vmax.xlane.f32.xlu1 %v7313_v3 }
 0x9b7   : > { %v5282_v24 = vpop.f32.mrb[72].mxu1 }
 0x9b8   : > { %v7321_v31 = vadd.f32 %v5282_v24, %v6363_v17  ;;  %v2410_v9 = vpop.f32.mrb[73].mxu1 }
 0x9b9   : > { %v5283_v37 = vpop.f32.mrb[74].mxu1  ;;  %v7326_v41 = vadd.f32 %v2410_v9, %v6363_v17 }
 0x9ba   : > { %2455 = vmax.xlane.f32.xlu1 %v7318_v7  ;;  %2461 = vmax.xlane.f32.xlu0 %v7321_v31  ;;  %v2413_v13 = vpop.f32.mrb[75].mxu1  ;;  %v7330_v28 = vadd.f32 %v5283_v37, %v6363_v17 }
 0x9bb   : > { %v7338_v52 = vadd.f32 %v2413_v13, %v6363_v17  ;;  %v7385_v13 = vpop.permute.xlu1 %2742 }
 0x9be   : > { %2457 = vmax.xlane.f32.xlu1 %v7326_v41 }
 0x9bf   : > { %v5286_v62 = vpop.f32.mrb[76].mxu1 }
 0x9c0   : > { %v2426_v33 = vpop.f32.mrb[77].mxu1  ;;  %v7342_v9 = vadd.f32 %v5286_v62, %v6363_v17 }
 0x9c1   : > { %v7333_v24 = vadd.f32 %v2426_v33, %v6363_v17  ;;  %v5287_v55 = vpop.f32.mrb[78].mxu1 }
 0x9c2   : > { %2463 = vmax.xlane.f32.xlu1 %v7330_v28  ;;  %v2429_v32 = vpop.f32.mrb[79].mxu1  ;;  %v7346_v37 = vadd.f32 %v5287_v55, %v6363_v17 }
 0x9c3   : > { %2465 = vmax.xlane.f32.xlu0 %v7333_v24  ;;  %v7359_v62 = vadd.f32 %v2429_v32, %v6363_v17  ;;  %v7378_v32 = vpop.permute.xlu0 %2740 }
 0x9c6   : > { %2459 = vmax.xlane.f32.xlu1 %v7338_v52 }
 0x9c7   : > { %v7383_v55 = vpop.permute.xlu0 %2744 }
 0x9ca   : > { %2469 = vmax.xlane.f32.xlu1 %v7342_v9 }
 0x9ce   : > { %2471 = vmax.xlane.f32.xlu1 %v7346_v37 }
 0x9d9   : > { %2748 = vrot.lane.b32.xlu0 %v6293_v39, %s6198_s21 }
 0x9df   : > { %2746 = vrot.lane.b32.xlu1 %v6295_v40, %s6198_s21 }
 0x9e3   : > { %2724 = vrot.lane.b32.xlu1 %v6275_v19, %s6199_s22 }
 0x9e7   : > { %2728 = vrot.lane.b32.xlu1 %v6285_v29, %s6199_s22 }
 0x9eb   : > { %2732 = vrot.lane.b32.xlu1 %v6293_v39, %s6199_s22 }
 0x9ef   : > { %2736 = vrot.lane.b32.xlu1 %v6301_v49, %s6199_s22 }
 0x9f3   : > { %3021 = vrot.lane.b32.xlu1 %v6275_v19, %s6200_s23 }
 0x9f7   : > { %3023 = vrot.lane.b32.xlu1 %v6287_v30, %s6200_s23 }
 0x9f8   : > { %2467 = vmax.xlane.f32.xlu0 %v7359_v62 }
 0x9fb   : > { %3027 = vrot.lane.b32.xlu1 %v6295_v40, %s6200_s23 }
 0x9ff   : > { %3029 = vrot.lane.b32.xlu1 %v6293_v39, %s6200_s23 }
 0xa03   : > { %3033 = vrot.lane.b32.xlu1 %v6301_v49, %s6200_s23 }
 0xa07   : > { %3200 = vrot.lane.b32.xlu1 %v6287_v30, %s6201_s24 }
 0xa0e   : > { %2750 = vrot.lane.b32.xlu0 %v6303_v50, %s6198_s21 }
 0xa12   : > { %2752 = vrot.lane.b32.xlu0 %v6301_v49, %s6198_s21 }
 0xa16   : > { %2722 = vrot.lane.b32.xlu0 %v6277_v20, %s6199_s22 }
 0xa1a   : > { %2726 = vrot.lane.b32.xlu0 %v6287_v30, %s6199_s22 }
 0xa1e   : > { %2730 = vrot.lane.b32.xlu0 %v6295_v40, %s6199_s22 }
 0xa22   : > { %2734 = vrot.lane.b32.xlu0 %v6303_v50, %s6199_s22 }
 0xa26   : > { %3019 = vrot.lane.b32.xlu0 %v6277_v20, %s6200_s23 }
 0xa2a   : > { %3025 = vrot.lane.b32.xlu0 %v6285_v29, %s6200_s23 }
 0xa2e   : > { %3031 = vrot.lane.b32.xlu0 %v6303_v50, %s6200_s23  ;;  %s9020_s23 = scalar_lea.vmem %s9062_s5, %s4703_s16 }
 0xa32   : > { %3196 = vrot.lane.b32.xlu0 %v6277_v20, %s6201_s24 }
 0xa36   : > { %3198 = vrot.lane.b32.xlu0 %v6275_v19, %s6201_s24 }
 0xa37   : > { %v2446_v33 = vpop.xlane.xlu0 %2445 }
 0xa38   : > { %v2475_v53 = vsub.f32 %v7290_v10, %v2446_v33 }
 0xa3a   : > { %v2444_v59 = vpop.xlane.xlu1 %2443  ;;  %3202 = vrot.lane.b32.xlu0 %v6285_v29, %s6201_s24  ;;  %v2493_v44 = vmul.f32 1.442695, %v2475_v53 }
 0xa3b   : > { %v2474_v61 = vsub.f32 %v7294_v0, %v2444_v59  ;;  %v2442_v63 = vpop.xlane.xlu0 %2441 }
 0xa3c   : > { %v2473_v48 = vsub.f32 %v7297_v18, %v2442_v63 }
 0xa3d   : > { %v2491_v46 = vmul.f32 1.442695, %v2474_v61 }
 0xa3e   : > { %v2489_v60 = vmul.f32 1.442695, %v2473_v48 }
 0xa3f   : > { %5791 = vpow2.f32 %v2491_v46  ;;  %v2454_v36 = vpop.xlane.xlu1 %2453  ;;  %v2448_v22 = vpop.xlane.xlu0 %2447 }
 0xa40   : > { %5793 = vpow2.f32 %v2489_v60  ;;  %v2476_v8 = vsub.f32 %v7302_v2, %v2448_v22  ;;  %v2479_v6 = vsub.f32 %v7305_v26, %v2454_v36 }
 0xa41   : > { %5795 = vpow2.f32 %v2493_v44 }
 0xa42   : > { %v2495_v57 = vmul.f32 1.442695, %v2476_v8  ;;  %v2501_v46 = vmul.f32 1.442695, %v2479_v6 }
 0xa43   : > { %v2450_v43 = vpop.xlane.xlu1 %2449  ;;  %v2452_v25 = vpop.xlane.xlu0 %2451 }
 0xa44   : > { %v2477_v0 = vsub.f32 %v7313_v3, %v2450_v43  ;;  %v2478_v59 = vsub.f32 %v7310_v5, %v2452_v25  ;;  %5797 = vpow2.f32 %v2495_v57 }
 0xa46   : > { %v2497_v63 = vmul.f32 1.442695, %v2477_v0  ;;  %v2499_v48 = vmul.f32 1.442695, %v2478_v59 }
 0xa47   : > { %v2456_v61 = vpop.xlane.xlu1 %2455  ;;  %v2462_v6 = vpop.xlane.xlu0 %2461 }
 0xa48   : > { %5799 = vpow2.f32 %v2497_v63  ;;  %v2480_v60 = vsub.f32 %v7318_v7, %v2456_v61  ;;  %v2483_v10 = vsub.f32 %v7321_v31, %v2462_v6  ;;  %v2779_v7 = vsel %vm463_vm1, %v7253_v14, 0 }
 0xa49   : > { %v7399_v53 = vpop.eup %5791  ;;  %5801 = vpow2.f32 %v2499_v48 }
 0xa4a   : > { %9274 = vst [vmem:[#allocation115_spill] sm:$0xff] %v7399_v53  ;;  %v7401_v22 = vpop.eup %5793  ;;  %v2503_v36 = vmul.f32 1.442695, %v2480_v60  ;;  %5803 = vpow2.f32 %v2501_v46  ;;  %v2509_v63 = vmul.f32 1.442695, %v2483_v10 }
 0xa4b   : > { %v2458_v44 = vpop.xlane.xlu1 %2457  ;;  %v2553_v43 = vpack.c.bf16 %v7399_v53, %v7401_v22  ;;  %v7405_v25 = vpop.eup %5795 }
 0xa4c   : > { %5805 = vpow2.f32 %v2503_v36  ;;  %v2481_v57 = vsub.f32 %v7326_v41, %v2458_v44 }
 0xa4d   : > { %5304 = vmatprep.mubr.bf16.mxu0 %v2553_v43  ;;  %v2785_v43 = vsel %vm463_vm1, %v7385_v13, 0 }
 0xa4e   : > { %v7408_v8 = vpop.eup %5797  ;;  %v2505_v5 = vmul.f32 1.442695, %v2481_v57 }
 0xa4f   : > { %9275 = vst [vmem:[#allocation116_spill] sm:$0xff] %v7408_v8  ;;  %v2464_v3 = vpop.xlane.xlu1 %2463  ;;  %v2554_v2 = vpack.c.bf16 %v7408_v8, %v7405_v25 }
 0xa50   : > { %v2484_v18 = vsub.f32 %v7330_v28, %v2464_v3  ;;  %5807 = vpow2.f32 %v2505_v5 }
 0xa51   : > { %5305 = vmatmul.mubr.bf16.vlgmr.msra.gmra.mrb[80].mxu0 %v2554_v2 }
 0xa52   : > { %v7414_v26 = vpop.eup %5799  ;;  %v2511_v41 = vmul.f32 1.442695, %v2484_v18  ;;  %5321 = vmatpush3.bf16.xpose.msra.mxu0 %v2779_v7  ;;  %v2788_v18 = vsel %vm463_vm1, %v7383_v55, 0 }
 0xa53   : > { %v7418_v33 = vpop.eup %5801  ;;  %v2460_v0 = vpop.xlane.xlu1 %2459  ;;  %5589 = vmatprep.subr.msk.bf16.mxu0 %vm463_vm1, %v7378_v32 }
 0xa54   : > { %9276 = vst [vmem:[#allocation117_spill] sm:$0xff] %v7418_v33  ;;  %v2482_v28 = vsub.f32 %v7338_v52, %v2460_v0  ;;  %v2555_v31 = vpack.c.bf16 %v7418_v33, %v7414_v26  ;;  %v7425_v59 = vpop.eup %5803  ;;  %5809 = vpow2.f32 %v2511_v41  ;;  %v2782_v52 = vsel %vm463_vm1, %v7378_v32, 0 }
 0xa56   : > { %v7427_v48 = vpop.eup %5805  ;;  %v2507_v14 = vmul.f32 1.442695, %v2482_v28  ;;  %5308 = vmatprep.mubr.bf16.mxu0 %v2555_v31 }
 0xa57   : > { %9277 = vst [vmem:[#allocation118_spill] sm:$0xff] %v7427_v48  ;;  %v2556_v46 = vpack.c.bf16 %v7427_v48, %v7425_v59  ;;  %v2470_v61 = vpop.xlane.xlu1 %2469 }
 0xa58   : > { %5811 = vpow2.f32 %v2507_v14 }
 0xa59   : > { %5813 = vpow2.f32 %v2509_v63  ;;  %5309 = vmatmul.mubr.bf16.gmra.mrb[84].mxu0 %v2556_v46 }
 0xa5a   : > { %5323 = vmatpush3.bf16.xpose.msra.mxu0 %v2782_v52  ;;  %v7435_v60 = vpop.eup %5807 }
 0xa5b   : > { %5590 = vmatprep.subr.msk.bf16.mxu0 %vm463_vm1, %v7385_v13  ;;  %9278 = vst [vmem:[#allocation119_spill] sm:$0xff] %v7435_v60  ;;  %v2472_v3 = vpop.xlane.xlu1 %2471  ;;  %v2466_v13 = vpop.xlane.xlu0 %2465 }
 0xa5c   : > { %v2485_v41 = vsub.f32 %v7333_v24, %v2466_v13  ;;  %v2488_v0 = vsub.f32 %v7346_v37, %v2472_v3 }
 0xa5e   : > { %v7437_v36 = vpop.eup %5809  ;;  %v2513_v28 = vmul.f32 1.442695, %v2485_v41  ;;  %v2519_v31 = vmul.f32 1.442695, %v2488_v0 }
 0xa5f   : > { %9279 = vst [vmem:[#allocation120_spill] sm:$0xff] %v7437_v36  ;;  %v2747_v2 = vpop.permute.xlu1 %2746  ;;  %v2749_v5 = vpop.permute.xlu0 %2748 }
 0xa60   : > { %v2791_v10 = vsel %vm463_vm1, %v2747_v2, 0  ;;  %v2794_v7 = vsel %vm463_vm1, %v2749_v5, 0  ;;  %5815 = vpow2.f32 %v2513_v28 }
 0xa61   : > { %5817 = vpow2.f32 %v2519_v31 }
 0xa62   : > { %v7439_v44 = vpop.eup %5811  ;;  %5325 = vmatpush3.bf16.xpose.msra.mxu0 %v2785_v43 }
 0xa63   : > { %9280 = vst [vmem:[#allocation121_spill] sm:$0xff] %v7439_v44  ;;  %v7443_v6 = vpop.eup %5813  ;;  %v2557_v32 = vpack.c.bf16 %v7439_v44, %v7435_v60  ;;  %5591 = vmatprep.subr.msk.bf16.mxu0 %vm463_vm1, %v7383_v55  ;;  %v2487_v55 = vsub.f32 %v7342_v9, %v2470_v61  ;;  %v2725_v43 = vpop.permute.xlu1 %2724 }
 0xa64   : > { %9281 = vst [vmem:[#allocation122_spill] sm:$0xff] %v7443_v6  ;;  %v2558_v57 = vpack.c.bf16 %v7437_v36, %v7443_v6 }
 0xa65   : > { %5312 = vmatprep.mubr.bf16.mxu0 %v2557_v32  ;;  %v2517_v46 = vmul.f32 1.442695, %v2487_v55 }
 0xa66   : > { %5313 = vmatmul.mubr.bf16.gmra.mrb[88].mxu0 %v2558_v57 }
 0xa67   : > { %v2729_v9 = vpop.permute.xlu1 %2728 }
 0xa6a   : > { %5327 = vmatpush3.bf16.xpose.msra.mxu0 %v2788_v18  ;;  %v7464_v57 = vpop.eup %5815 }
 0xa6b   : > { %5592 = vmatprep.subr.msk.bf16.mxu0 %vm463_vm1, %v2747_v2  ;;  %9282 = vst [vmem:[#allocation123_spill] sm:$0xff] %v7464_v57  ;;  %v7467_v3 = vpop.eup %5817  ;;  %v2733_v13 = vpop.permute.xlu1 %2732 }
 0xa6c   : > { %9283 = vst [vmem:[#allocation124_spill] sm:$0xff] %v7467_v3 }
 0xa6f   : > { %v2737_v0 = vpop.permute.xlu1 %2736 }
 0xa72   : > { %5329 = vmatpush3.bf16.xpose.msra.mxu0 %v2791_v10 }
 0xa73   : > { %5593 = vmatprep.subr.msk.bf16.mxu0 %vm463_vm1, %v2749_v5  ;;  %v3022_v28 = vpop.permute.xlu1 %3021 }
 0xa7a   : > { %5331 = vmatpush3.bf16.xpose.msra.mxu0 %v2794_v7 }
 0xa85   : > { %v2468_v63 = vpop.xlane.xlu0 %2467 }
 0xa86   : > { %v2486_v14 = vsub.f32 %v7359_v62, %v2468_v63  ;;  %v3024_v63 = vpop.permute.xlu1 %3023 }
 0xa88   : > { %v2515_v52 = vmul.f32 1.442695, %v2486_v14 }
 0xa89   : > { %v2751_v32 = vpop.permute.xlu0 %2750 }
 0xa8a   : > { %5819 = vpow2.f32 %v2515_v52  ;;  %5594 = vmatprep.subr.msk.bf16.mxu0 %vm463_vm1, %v2751_v32  ;;  %v2797_v24 = vsel %vm463_vm1, %v2751_v32, 0 }
 0xa8b   : > { %5821 = vpow2.f32 %v2517_v46  ;;  %5333 = vmatpush3.bf16.xpose.msra.mxu0 %v2797_v24  ;;  %v3028_v46 = vpop.permute.xlu1 %3027 }
 0xa8d   : > { %v2753_v37 = vpop.permute.xlu0 %2752 }
 0xa8e   : > { %5595 = vmatprep.subr.msk.bf16.mxu0 %vm463_vm1, %v2753_v37  ;;  %v2800_v62 = vsel %vm463_vm1, %v2753_v37, 0 }
 0xa8f   : > { %v3030_v52 = vpop.permute.xlu1 %3029 }
 0xa91   : > { %v2723_v61 = vpop.permute.xlu0 %2722 }
 0xa93   : > { %5335 = vmatpush3.bf16.xpose.msra.mxu0 %v2800_v62  ;;  %v3034_v32 = vpop.permute.xlu1 %3033 }
 0xa94   : > { %v7469_v18 = vpop.eup %5819 }
 0xa95   : > { %9284 = vst [vmem:[#allocation125_spill] sm:$0xff] %v7469_v18  ;;  %v7471_v2 = vpop.eup %5821  ;;  %v2727_v10 = vpop.permute.xlu0 %2726  ;;  %v2559_v5 = vpack.c.bf16 %v7469_v18, %v7464_v57 }
 0xa96   : > { %9285 = vst [vmem:[#allocation126_spill] sm:$0xff] %v7471_v2  ;;  %v2560_v7 = vpack.c.bf16 %v7467_v3, %v7471_v2 }
 0xa97   : > { %5316 = vmatprep.mubr.bf16.mxu0 %v2559_v5 }
 0xa98   : > { %5317 = vmatmul.mubr.bf16.gmra.mrb[92].mxu0 %v2560_v7 }
 0xa99   : > { %5336 = vmatprep.mubr.msk.bf16.mxu0 %vm463_vm1, %v2723_v61  ;;  %v2731_v41 = vpop.permute.xlu0 %2730 }
 0xa9d   : > { %v2735_v55 = vpop.permute.xlu0 %2734 }
 0xaa0   : > { %5337 = vmatmul.mubr.msk.bf16.vlgmr.msra.gmra.mrb[96].mxu0 %vm463_vm1, %v2725_v43 }
 0xaa1   : > { %5340 = vmatprep.mubr.msk.bf16.mxu0 %vm463_vm1, %v2727_v10  ;;  %v3020_v31 = vpop.permute.xlu0 %3019 }
 0xaa2   : > { %5352 = vmatprep.subr.bf16.mxu1 %v3020_v31 }
 0xaa3   : > { %5353 = vmatpush3.bf16.msra.mxu1 %v3020_v31 }
 0xaa4   : > { %5354 = vmatprep.subr.bf16.mxu1 %v3022_v28 }
 0xaa5   : > { %v3026_v14 = vpop.permute.xlu0 %3025 }
 0xaa7   : > { %5355 = vmatpush3.bf16.msra.mxu1 %v3022_v28 }
 0xaa8   : > { %5341 = vmatmul.mubr.msk.bf16.gmra.mrb[100].mxu0 %vm463_vm1, %v2729_v9  ;;  %5356 = vmatprep.subr.bf16.mxu1 %v3024_v63 }
 0xaa9   : > { %5344 = vmatprep.mubr.msk.bf16.mxu0 %vm463_vm1, %v2731_v41  ;;  %v3032_v43 = vpop.permute.xlu0 %3031 }
 0xaab   : > { %5357 = vmatpush3.bf16.msra.mxu1 %v3024_v63 }
 0xaac   : > { %5358 = vmatprep.subr.bf16.mxu1 %v3026_v14 }
 0xaad   : > { %v7485_v24 = vpop.permute.xlu0 %3196 }
 0xaaf   : > { %5359 = vmatpush3.bf16.msra.mxu1 %v3026_v14 }
 0xab0   : > { %5345 = vmatmul.mubr.msk.bf16.gmra.mrb[104].mxu0 %vm463_vm1, %v2733_v13  ;;  %5360 = vmatprep.subr.bf16.mxu1 %v3028_v46 }
 0xab1   : > { %5348 = vmatprep.mubr.msk.bf16.mxu0 %vm463_vm1, %v2735_v55 }
 0xab3   : > { %5361 = vmatpush3.bf16.msra.mxu1 %v3028_v46 }
 0xab4   : > { %5362 = vmatprep.subr.bf16.mxu1 %v3030_v52 }
 0xab7   : > { %5363 = vmatpush3.bf16.msra.mxu1 %v3030_v52 }
 0xab8   : > { %5349 = vmatmul.mubr.msk.bf16.gmra.mrb[108].mxu0 %vm463_vm1, %v2737_v0  ;;  %5364 = vmatprep.subr.bf16.mxu1 %v3032_v43 }
 0xabb   : > { %5365 = vmatpush3.bf16.msra.mxu1 %v3032_v43 }
 0xabc   : > { %5366 = vmatprep.subr.bf16.mxu1 %v3034_v32 }
 0xabf   : > { %5367 = vmatpush3.bf16.msra.mxu1 %v3034_v32 }
 0xac0   : > { %5596 = vmatprep.subr.msk.bf16.mxu1 %vm463_vm1, %v7485_v24 }
 0xb24   : > { %v7489_v37 = vpop.f32.mrb[80].mxu0 }
 0xb25   : > { %9286 = vst [vmem:[#allocation127_spill] sm:$0xff] %v7489_v37  ;;  %v7491_v9 = vpop.f32.mrb[81].mxu0 }
 0xb26   : > { %9287 = vst [vmem:[#allocation128_spill] sm:$0xff] %v7491_v9  ;;  %v7493_v61 = vpop.f32.mrb[82].mxu0 }
 0xb27   : > { %9288 = vst [vmem:[#allocation129_spill] sm:$0xff] %v7493_v61  ;;  %v7495_v62 = vpop.f32.mrb[83].mxu0 }
 0xb28   : > { %9289 = vst [vmem:[#allocation130_spill] sm:$0xff] %v7495_v62 }
 0xb2c   : > { %v7497_v13 = vpop.f32.mrb[84].mxu0 }
 0xb2d   : > { %9290 = vst [vmem:[#allocation131_spill] sm:$0xff] %v7497_v13  ;;  %v7499_v10 = vpop.f32.mrb[85].mxu0 }
 0xb2e   : > { %9291 = vst [vmem:[#allocation132_spill] sm:$0xff] %v7499_v10  ;;  %v7501_v5 = vpop.f32.mrb[86].mxu0 }
 0xb2f   : > { %9292 = vst [vmem:[#allocation133_spill] sm:$0xff] %v7501_v5  ;;  %v7503_v7 = vpop.f32.mrb[87].mxu0 }
 0xb30   : > { %9293 = vst [vmem:[#allocation134_spill] sm:$0xff] %v7503_v7 }
 0xb39   : > { %v7505_v41 = vpop.f32.mrb[88].mxu0 }
 0xb3a   : > { %9294 = vst [vmem:[#allocation135_spill] sm:$0xff] %v7505_v41  ;;  %v7507_v0 = vpop.f32.mrb[89].mxu0 }
 0xb3b   : > { %9295 = vst [vmem:[#allocation136_spill] sm:$0xff] %v7507_v0  ;;  %v7509_v55 = vpop.f32.mrb[90].mxu0 }
 0xb3c   : > { %9296 = vst [vmem:[#allocation137_spill] sm:$0xff] %v7509_v55  ;;  %v7511_v28 = vpop.f32.mrb[91].mxu0 }
 0xb3d   : > { %9297 = vst [vmem:[#allocation138_spill] sm:$0xff] %v7511_v28 }
 0xb6b   : > { %v7513_v31 = vpop.f32.mrb[92].mxu0 }
 0xb6c   : > { %9298 = vst [vmem:[#allocation139_spill] sm:$0xff] %v7513_v31  ;;  %v7515_v63 = vpop.f32.mrb[93].mxu0 }
 0xb6d   : > { %9299 = vst [vmem:[#allocation140_spill] sm:$0xff] %v7515_v63  ;;  %v7517_v14 = vpop.f32.mrb[94].mxu0 }
 0xb6e   : > { %9300 = vst [vmem:[#allocation141_spill] sm:$0xff] %v7517_v14  ;;  %v7519_v46 = vpop.f32.mrb[95].mxu0 }
 0xb6f   : > { %9301 = vst [vmem:[#allocation142_spill] sm:$0xff] %v7519_v46 }
 0xb73   : > { %v5338_v52 = vpop.f32.mrb[96].mxu0 }
 0xb74   : > { %v7522_v43 = vadd.f32 %v5338_v52, %v6363_v17  ;;  %v2836_v32 = vpop.f32.mrb[97].mxu0 }
 0xb75   : > { %v5339_v41 = vpop.f32.mrb[98].mxu0  ;;  %v7529_v31 = vadd.f32 %v2836_v32, %v6363_v17 }
 0xb76   : > { %2903 = vmax.xlane.f32.xlu0 %v7522_v43  ;;  %v2839_v0 = vpop.f32.mrb[99].mxu0  ;;  %v7534_v14 = vadd.f32 %v5339_v41, %v6363_v17 }
 0xb77   : > { %v7526_v55 = vadd.f32 %v2839_v0, %v6363_v17 }
 0xb79   : > { %2901 = vmax.xlane.f32.xlu1 %v7526_v55 }
 0xb7a   : > { %2899 = vmax.xlane.f32.xlu0 %v7529_v31 }
 0xb7b   : > { %v5342_v63 = vpop.f32.mrb[100].mxu0 }
 0xb7c   : > { %v7537_v52 = vadd.f32 %v5342_v63, %v6363_v17  ;;  %v2852_v46 = vpop.f32.mrb[101].mxu0 }
 0xb7d   : > { %v5343_v28 = vpop.f32.mrb[102].mxu0  ;;  %v7545_v2 = vadd.f32 %v2852_v46, %v6363_v17 }
 0xb7e   : > { %2905 = vmax.xlane.f32.xlu0 %v7534_v14  ;;  %2911 = vmax.xlane.f32.xlu1 %v7537_v52  ;;  %v2855_v0 = vpop.f32.mrb[103].mxu0  ;;  %v7550_v63 = vadd.f32 %v5343_v28, %v6363_v17 }
 0xb7f   : > { %v7542_v32 = vadd.f32 %v2855_v0, %v6363_v17 }
 0xb82   : > { %2909 = vmax.xlane.f32.xlu0 %v7542_v32  ;;  %2907 = vmax.xlane.f32.xlu1 %v7545_v2 }
 0xb83   : > { %v5346_v41 = vpop.f32.mrb[104].mxu0 }
 0xb84   : > { %v7553_v57 = vadd.f32 %v5346_v41, %v6363_v17  ;;  %v2868_v3 = vpop.f32.mrb[105].mxu0 }
 0xb85   : > { %v5347_v18 = vpop.f32.mrb[106].mxu0  ;;  %v7558_v46 = vadd.f32 %v2868_v3, %v6363_v17 }
 0xb86   : > { %2913 = vmax.xlane.f32.xlu1 %v7550_v63  ;;  %2919 = vmax.xlane.f32.xlu0 %v7553_v57  ;;  %v2871_v0 = vpop.f32.mrb[107].mxu0  ;;  %v7562_v44 = vadd.f32 %v5347_v18, %v6363_v17 }
 0xb87   : > { %v7570_v13 = vadd.f32 %v2871_v0, %v6363_v17  ;;  %v7617_v0 = vpop.permute.xlu1 %3200 }
 0xb8a   : > { %2915 = vmax.xlane.f32.xlu1 %v7558_v46 }
 0xb8b   : > { %v5350_v36 = vpop.f32.mrb[108].mxu0 }
 0xb8c   : > { %v2884_v28 = vpop.f32.mrb[109].mxu0  ;;  %v7574_v3 = vadd.f32 %v5350_v36, %v6363_v17 }
 0xb8d   : > { %v7565_v41 = vadd.f32 %v2884_v28, %v6363_v17  ;;  %v5351_v6 = vpop.f32.mrb[110].mxu0 }
 0xb8e   : > { %2921 = vmax.xlane.f32.xlu1 %v7562_v44  ;;  %v2887_v5 = vpop.f32.mrb[111].mxu0  ;;  %v7578_v18 = vadd.f32 %v5351_v6, %v6363_v17  ;;  %v7610_v6 = vpop.permute.xlu0 %3198 }
 0xb8f   : > { %2923 = vmax.xlane.f32.xlu0 %v7565_v41  ;;  %v7591_v36 = vadd.f32 %v2887_v5, %v6363_v17 }
 0xb92   : > { %2917 = vmax.xlane.f32.xlu1 %v7570_v13  ;;  %v7615_v5 = vpop.permute.xlu0 %3202 }
 0xb96   : > { %2927 = vmax.xlane.f32.xlu1 %v7574_v3 }
 0xb9a   : > { %2929 = vmax.xlane.f32.xlu1 %v7578_v18 }
 0xba5   : > { %3206 = vrot.lane.b32.xlu0 %v6293_v39, %s6201_s24 }
 0xbab   : > { %3204 = vrot.lane.b32.xlu1 %v6295_v40, %s6201_s24 }
 0xbaf   : > { %3182 = vrot.lane.b32.xlu1 %v6275_v19, %s6202_s25 }
 0xbb3   : > { %3186 = vrot.lane.b32.xlu1 %v6285_v29, %s6202_s25 }
 0xbb7   : > { %3190 = vrot.lane.b32.xlu1 %v6293_v39, %s6202_s25 }
 0xbbb   : > { %3194 = vrot.lane.b32.xlu1 %v6301_v49, %s6202_s25 }
 0xbbf   : > { %3479 = vrot.lane.b32.xlu1 %v6275_v19, %s6203_s26 }
 0xbc3   : > { %3481 = vrot.lane.b32.xlu1 %v6287_v30, %s6203_s26 }
 0xbc4   : > { %2925 = vmax.xlane.f32.xlu0 %v7591_v36 }
 0xbc7   : > { %3485 = vrot.lane.b32.xlu1 %v6295_v40, %s6203_s26 }
 0xbcb   : > { %3487 = vrot.lane.b32.xlu1 %v6293_v39, %s6203_s26 }
 0xbcf   : > { %3491 = vrot.lane.b32.xlu1 %v6301_v49, %s6203_s26 }
 0xbd3   : > { %3658 = vrot.lane.b32.xlu1 %v6287_v30, %s6204_s27 }
 0xbda   : > { %3208 = vrot.lane.b32.xlu0 %v6303_v50, %s6201_s24 }
 0xbde   : > { %3210 = vrot.lane.b32.xlu0 %v6301_v49, %s6201_s24 }
 0xbe2   : > { %3180 = vrot.lane.b32.xlu0 %v6277_v20, %s6202_s25 }
 0xbe6   : > { %3184 = vrot.lane.b32.xlu0 %v6287_v30, %s6202_s25 }
 0xbea   : > { %3188 = vrot.lane.b32.xlu0 %v6295_v40, %s6202_s25 }
 0xbee   : > { %3192 = vrot.lane.b32.xlu0 %v6303_v50, %s6202_s25 }
 0xbf2   : > { %3477 = vrot.lane.b32.xlu0 %v6277_v20, %s6203_s26 }
 0xbf6   : > { %3483 = vrot.lane.b32.xlu0 %v6285_v29, %s6203_s26 }
 0xbfa   : > { %3489 = vrot.lane.b32.xlu0 %v6303_v50, %s6203_s26 }
 0xbfe   : > { %3654 = vrot.lane.b32.xlu0 %v6277_v20, %s6204_s27 }
 0xc02   : > { %3656 = vrot.lane.b32.xlu0 %v6275_v19, %s6204_s27 }
 0xc03   : > { %v2904_v28 = vpop.xlane.xlu0 %2903 }
 0xc04   : > { %v2933_v37 = vsub.f32 %v7522_v43, %v2904_v28 }
 0xc06   : > { %v2902_v7 = vpop.xlane.xlu1 %2901  ;;  %3660 = vrot.lane.b32.xlu0 %v6285_v29, %s6204_s27  ;;  %v2951_v8 = vmul.f32 1.442695, %v2933_v37 }
 0xc07   : > { %v2932_v10 = vsub.f32 %v7526_v55, %v2902_v7  ;;  %v2900_v61 = vpop.xlane.xlu0 %2899 }
 0xc08   : > { %v2931_v62 = vsub.f32 %v7529_v31, %v2900_v61 }
 0xc09   : > { %v2949_v9 = vmul.f32 1.442695, %v2932_v10 }
 0xc0a   : > { %v2947_v48 = vmul.f32 1.442695, %v2931_v62 }
 0xc0b   : > { %5823 = vpow2.f32 %v2949_v9  ;;  %v2912_v33 = vpop.xlane.xlu1 %2911  ;;  %v2906_v60 = vpop.xlane.xlu0 %2905 }
 0xc0c   : > { %5825 = vpow2.f32 %v2947_v48  ;;  %v2934_v53 = vsub.f32 %v7534_v14, %v2906_v60  ;;  %v2937_v12 = vsub.f32 %v7537_v52, %v2912_v33 }
 0xc0d   : > { %5827 = vpow2.f32 %v2951_v8 }
 0xc0e   : > { %v2953_v35 = vmul.f32 1.442695, %v2934_v53  ;;  %v2959_v9 = vmul.f32 1.442695, %v2937_v12 }
 0xc0f   : > { %v2908_v1 = vpop.xlane.xlu1 %2907  ;;  %v2910_v21 = vpop.xlane.xlu0 %2909 }
 0xc10   : > { %v2935_v7 = vsub.f32 %v7545_v2, %v2908_v1  ;;  %v2936_v55 = vsub.f32 %v7542_v32, %v2910_v21  ;;  %5829 = vpow2.f32 %v2953_v35 }
 0xc12   : > { %v2955_v61 = vmul.f32 1.442695, %v2935_v7  ;;  %v2957_v62 = vmul.f32 1.442695, %v2936_v55 }
 0xc13   : > { %v2914_v10 = vpop.xlane.xlu1 %2913  ;;  %v2920_v12 = vpop.xlane.xlu0 %2919 }
 0xc14   : > { %5831 = vpow2.f32 %v2955_v61  ;;  %v2938_v48 = vsub.f32 %v7550_v63, %v2914_v10  ;;  %v2941_v43 = vsub.f32 %v7553_v57, %v2920_v12  ;;  %v3237_v63 = vsel %vm463_vm1, %v7485_v24, 0 }
 0xc15   : > { %v7631_v37 = vpop.eup %5823  ;;  %5833 = vpow2.f32 %v2957_v62 }
 0xc16   : > { %v7633_v53 = vpop.eup %5825  ;;  %v2961_v33 = vmul.f32 1.442695, %v2938_v48  ;;  %5835 = vpow2.f32 %v2959_v9  ;;  %v2967_v61 = vmul.f32 1.442695, %v2941_v43 }
 0xc17   : > { %v2916_v8 = vpop.xlane.xlu1 %2915  ;;  %v3011_v1 = vpack.c.bf16 %v7631_v37, %v7633_v53  ;;  %v7637_v21 = vpop.eup %5827 }
 0xc18   : > { %5837 = vpow2.f32 %v2961_v33  ;;  %v2939_v35 = vsub.f32 %v7558_v46, %v2916_v8 }
 0xc19   : > { %5368 = vmatprep.mubr.bf16.mxu1 %v3011_v1  ;;  %v3243_v1 = vsel %vm463_vm1, %v7617_v0, 0 }
 0xc1a   : > { %v7640_v60 = vpop.eup %5829  ;;  %v2963_v32 = vmul.f32 1.442695, %v2939_v35 }
 0xc1b   : > { %v2922_v2 = vpop.xlane.xlu1 %2921  ;;  %v3012_v14 = vpack.c.bf16 %v7640_v60, %v7637_v21 }
 0xc1c   : > { %v2942_v31 = vsub.f32 %v7562_v44, %v2922_v2  ;;  %5839 = vpow2.f32 %v2963_v32 }
 0xc1d   : > { %5369 = vmatmul.mubr.bf16.vlgmr.msra.gmra.mrb[80].mxu1 %v3012_v14 }
 0xc1e   : > { %v7646_v52 = vpop.eup %5831  ;;  %v2969_v46 = vmul.f32 1.442695, %v2942_v31  ;;  %5385 = vmatpush3.bf16.xpose.msra.mxu1 %v3237_v63  ;;  %v3246_v31 = vsel %vm463_vm1, %v7615_v5, 0 }
 0xc1f   : > { %v7650_v28 = vpop.eup %5833  ;;  %v2918_v7 = vpop.xlane.xlu1 %2917  ;;  %5597 = vmatprep.subr.msk.bf16.mxu1 %vm463_vm1, %v7610_v6 }
 0xc20   : > { %v2940_v44 = vsub.f32 %v7570_v13, %v2918_v7  ;;  %v3013_v57 = vpack.c.bf16 %v7650_v28, %v7646_v52  ;;  %v7657_v55 = vpop.eup %5835  ;;  %5841 = vpow2.f32 %v2969_v46  ;;  %v3240_v13 = vsel %vm463_vm1, %v7610_v6, 0 }
 0xc22   : > { %v7659_v62 = vpop.eup %5837  ;;  %v2965_v24 = vmul.f32 1.442695, %v2940_v44  ;;  %5372 = vmatprep.mubr.bf16.mxu1 %v3013_v57 }
 0xc23   : > { %v3014_v9 = vpack.c.bf16 %v7659_v62, %v7657_v55  ;;  %v2928_v10 = vpop.xlane.xlu1 %2927 }
 0xc24   : > { %5843 = vpow2.f32 %v2965_v24 }
 0xc25   : > { %5845 = vpow2.f32 %v2967_v61  ;;  %5373 = vmatmul.mubr.bf16.gmra.mrb[84].mxu1 %v3014_v9 }
 0xc26   : > { %5387 = vmatpush3.bf16.xpose.msra.mxu1 %v3240_v13  ;;  %v7667_v48 = vpop.eup %5839 }
 0xc27   : > { %5598 = vmatprep.subr.msk.bf16.mxu1 %vm463_vm1, %v7617_v0  ;;  %9302 = vst [vmem:[#allocation143_spill] sm:$0xff] %v7667_v48  ;;  %v2930_v2 = vpop.xlane.xlu1 %2929  ;;  %v2924_v0 = vpop.xlane.xlu0 %2923 }
 0xc28   : > { %v2943_v46 = vsub.f32 %v7565_v41, %v2924_v0  ;;  %v2946_v7 = vsub.f32 %v7578_v18, %v2930_v2 }
 0xc2a   : > { %v7669_v33 = vpop.eup %5841  ;;  %v2971_v44 = vmul.f32 1.442695, %v2943_v46  ;;  %v2977_v57 = vmul.f32 1.442695, %v2946_v7 }
 0xc2b   : > { %9303 = vst [vmem:[#allocation144_spill] sm:$0xff] %v7669_v33  ;;  %v3205_v14 = vpop.permute.xlu1 %3204  ;;  %v3207_v32 = vpop.permute.xlu0 %3206 }
 0xc2c   : > { %v3249_v43 = vsel %vm463_vm1, %v3205_v14, 0  ;;  %v3252_v63 = vsel %vm463_vm1, %v3207_v32, 0  ;;  %5847 = vpow2.f32 %v2971_v44 }
 0xc2d   : > { %5849 = vpow2.f32 %v2977_v57 }
 0xc2e   : > { %v7671_v8 = vpop.eup %5843  ;;  %5389 = vmatpush3.bf16.xpose.msra.mxu1 %v3243_v1 }
 0xc2f   : > { %9304 = vst [vmem:[#allocation145_spill] sm:$0xff] %v7671_v8  ;;  %v7675_v12 = vpop.eup %5845  ;;  %v3015_v6 = vpack.c.bf16 %v7671_v8, %v7667_v48  ;;  %5599 = vmatprep.subr.msk.bf16.mxu1 %vm463_vm1, %v7615_v5  ;;  %v2945_v5 = vsub.f32 %v7574_v3, %v2928_v10  ;;  %v3183_v1 = vpop.permute.xlu1 %3182 }
 0xc30   : > { %9305 = vst [vmem:[#allocation146_spill] sm:$0xff] %v7675_v12  ;;  %v3016_v35 = vpack.c.bf16 %v7669_v33, %v7675_v12 }
 0xc31   : > { %5376 = vmatprep.mubr.bf16.mxu1 %v3015_v6  ;;  %v2975_v9 = vmul.f32 1.442695, %v2945_v5 }
 0xc32   : > { %5377 = vmatmul.mubr.bf16.gmra.mrb[88].mxu1 %v3016_v35 }
 0xc33   : > { %v3187_v3 = vpop.permute.xlu1 %3186 }
 0xc36   : > { %5391 = vmatpush3.bf16.xpose.msra.mxu1 %v3246_v31  ;;  %v7696_v35 = vpop.eup %5847 }
 0xc37   : > { %5600 = vmatprep.subr.msk.bf16.mxu1 %vm463_vm1, %v3205_v14  ;;  %9306 = vst [vmem:[#allocation147_spill] sm:$0xff] %v7696_v35  ;;  %v7699_v2 = vpop.eup %5849  ;;  %v3191_v0 = vpop.permute.xlu1 %3190 }
 0xc38   : > { %9307 = vst [vmem:[#allocation148_spill] sm:$0xff] %v7699_v2 }
 0xc3b   : > { %v3195_v7 = vpop.permute.xlu1 %3194 }
 0xc3e   : > { %5393 = vmatpush3.bf16.xpose.msra.mxu1 %v3249_v43 }
 0xc3f   : > { %5601 = vmatprep.subr.msk.bf16.mxu1 %vm463_vm1, %v3207_v32  ;;  %v3480_v44 = vpop.permute.xlu1 %3479 }
 0xc46   : > { %5395 = vmatpush3.bf16.xpose.msra.mxu1 %v3252_v63 }
 0xc51   : > { %v2926_v61 = vpop.xlane.xlu0 %2925 }
 0xc52   : > { %v2944_v24 = vsub.f32 %v7591_v36, %v2926_v61  ;;  %v3482_v61 = vpop.permute.xlu1 %3481 }
 0xc54   : > { %v2973_v13 = vmul.f32 1.442695, %v2944_v24 }
 0xc55   : > { %v3209_v6 = vpop.permute.xlu0 %3208 }
 0xc56   : > { %5851 = vpow2.f32 %v2973_v13  ;;  %5602 = vmatprep.subr.msk.bf16.mxu1 %vm463_vm1, %v3209_v6  ;;  %v3255_v41 = vsel %vm463_vm1, %v3209_v6, 0 }
 0xc57   : > { %5853 = vpow2.f32 %v2975_v9  ;;  %5397 = vmatpush3.bf16.xpose.msra.mxu1 %v3255_v41  ;;  %v3486_v9 = vpop.permute.xlu1 %3485 }
 0xc59   : > { %v3211_v18 = vpop.permute.xlu0 %3210 }
 0xc5a   : > { %5603 = vmatprep.subr.msk.bf16.mxu1 %vm463_vm1, %v3211_v18  ;;  %v3258_v36 = vsel %vm463_vm1, %v3211_v18, 0 }
 0xc5b   : > { %v3488_v13 = vpop.permute.xlu1 %3487 }
 0xc5d   : > { %v3181_v10 = vpop.permute.xlu0 %3180 }
 0xc5f   : > { %5399 = vmatpush3.bf16.xpose.msra.mxu1 %v3258_v36  ;;  %v3492_v6 = vpop.permute.xlu1 %3491 }
 0xc60   : > { %v7701_v31 = vpop.eup %5851 }
 0xc61   : > { %9308 = vst [vmem:[#allocation149_spill] sm:$0xff] %v7701_v31  ;;  %v7703_v14 = vpop.eup %5853  ;;  %v3185_v43 = vpop.permute.xlu0 %3184  ;;  %v3017_v32 = vpack.c.bf16 %v7701_v31, %v7696_v35 }
 0xc62   : > { %9309 = vst [vmem:[#allocation150_spill] sm:$0xff] %v7703_v14  ;;  %v3018_v63 = vpack.c.bf16 %v7699_v2, %v7703_v14 }
 0xc63   : > { %5380 = vmatprep.mubr.bf16.mxu1 %v3017_v32 }
 0xc64   : > { %5381 = vmatmul.mubr.bf16.gmra.mrb[92].mxu1 %v3018_v63 }
 0xc65   : > { %5400 = vmatprep.mubr.msk.bf16.mxu1 %vm463_vm1, %v3181_v10  ;;  %v3189_v46 = vpop.permute.xlu0 %3188 }
 0xc69   : > { %v3193_v5 = vpop.permute.xlu0 %3192 }
 0xc6c   : > { %5401 = vmatmul.mubr.msk.bf16.vlgmr.msra.gmra.mrb[96].mxu1 %vm463_vm1, %v3183_v1 }
 0xc6d   : > { %5404 = vmatprep.mubr.msk.bf16.mxu1 %vm463_vm1, %v3185_v43  ;;  %v3478_v57 = vpop.permute.xlu0 %3477 }
 0xc6e   : > { %5416 = vmatprep.subr.bf16.mxu0 %v3478_v57 }
 0xc6f   : > { %5417 = vmatpush3.bf16.msra.mxu0 %v3478_v57 }
 0xc70   : > { %5418 = vmatprep.subr.bf16.mxu0 %v3480_v44 }
 0xc71   : > { %v3484_v24 = vpop.permute.xlu0 %3483 }
 0xc73   : > { %5419 = vmatpush3.bf16.msra.mxu0 %v3480_v44 }
 0xc74   : > { %5405 = vmatmul.mubr.msk.bf16.gmra.mrb[100].mxu1 %vm463_vm1, %v3187_v3  ;;  %5420 = vmatprep.subr.bf16.mxu0 %v3482_v61 }
 0xc75   : > { %5408 = vmatprep.mubr.msk.bf16.mxu1 %vm463_vm1, %v3189_v46  ;;  %v3490_v1 = vpop.permute.xlu0 %3489 }
 0xc77   : > { %5421 = vmatpush3.bf16.msra.mxu0 %v3482_v61 }
 0xc78   : > { %5422 = vmatprep.subr.bf16.mxu0 %v3484_v24 }
 0xc79   : > { %v7717_v41 = vpop.permute.xlu0 %3654 }
 0xc7b   : > { %5423 = vmatpush3.bf16.msra.mxu0 %v3484_v24 }
 0xc7c   : > { %5409 = vmatmul.mubr.msk.bf16.gmra.mrb[104].mxu1 %vm463_vm1, %v3191_v0  ;;  %5424 = vmatprep.subr.bf16.mxu0 %v3486_v9 }
 0xc7d   : > { %5412 = vmatprep.mubr.msk.bf16.mxu1 %vm463_vm1, %v3193_v5 }
 0xc7f   : > { %5425 = vmatpush3.bf16.msra.mxu0 %v3486_v9 }
 0xc80   : > { %5426 = vmatprep.subr.bf16.mxu0 %v3488_v13 }
 0xc83   : > { %5427 = vmatpush3.bf16.msra.mxu0 %v3488_v13 }
 0xc84   : > { %5413 = vmatmul.mubr.msk.bf16.gmra.mrb[108].mxu1 %vm463_vm1, %v3195_v7  ;;  %5428 = vmatprep.subr.bf16.mxu0 %v3490_v1 }
 0xc87   : > { %5429 = vmatpush3.bf16.msra.mxu0 %v3490_v1 }
 0xc88   : > { %5430 = vmatprep.subr.bf16.mxu0 %v3492_v6 }
 0xc8b   : > { %5431 = vmatpush3.bf16.msra.mxu0 %v3492_v6 }
 0xc8c   : > { %5604 = vmatprep.subr.msk.bf16.mxu0 %vm463_vm1, %v7717_v41 }
 0xcf0   : > { %v7721_v18 = vpop.f32.mrb[80].mxu1 }
 0xcf1   : > { %v7723_v3 = vpop.f32.mrb[81].mxu1 }
 0xcf2   : > { %v7725_v10 = vpop.f32.mrb[82].mxu1 }
 0xcf3   : > { %v7727_v36 = vpop.f32.mrb[83].mxu1 }
 0xcf8   : > { %v7729_v0 = vpop.f32.mrb[84].mxu1 }
 0xcf9   : > { %v7731_v43 = vpop.f32.mrb[85].mxu1 }
 0xcfa   : > { %v7733_v32 = vpop.f32.mrb[86].mxu1 }
 0xcfb   : > { %9310 = vst [vmem:[#allocation151_spill] sm:$0xff] %v7733_v32  ;;  %v7735_v63 = vpop.f32.mrb[87].mxu1 }
 0xd05   : > { %v7737_v46 = vpop.f32.mrb[88].mxu1 }
 0xd06   : > { %9311 = vst [vmem:[#allocation152_spill] sm:$0xff] %v7737_v46  ;;  %v7739_v7 = vpop.f32.mrb[89].mxu1 }
 0xd07   : > { %9312 = vst [vmem:[#allocation153_spill] sm:$0xff] %v7739_v7  ;;  %v7741_v5 = vpop.f32.mrb[90].mxu1 }
 0xd08   : > { %9313 = vst [vmem:[#allocation154_spill] sm:$0xff] %v7741_v5  ;;  %v7743_v44 = vpop.f32.mrb[91].mxu1 }
 0xd09   : > { %9314 = vst [vmem:[#allocation155_spill] sm:$0xff] %v7743_v44 }
 0xd37   : > { %v7745_v57 = vpop.f32.mrb[92].mxu1 }
 0xd38   : > { %9315 = vst [vmem:[#allocation156_spill] sm:$0xff] %v7745_v57  ;;  %v7747_v61 = vpop.f32.mrb[93].mxu1 }
 0xd39   : > { %9316 = vst [vmem:[#allocation157_spill] sm:$0xff] %v7747_v61  ;;  %v7749_v24 = vpop.f32.mrb[94].mxu1 }
 0xd3a   : > { %9317 = vst [vmem:[#allocation158_spill] sm:$0xff] %v7749_v24  ;;  %v7751_v9 = vpop.f32.mrb[95].mxu1 }
 0xd3b   : > { %9318 = vst [vmem:[#allocation159_spill] sm:$0xff] %v7751_v9 }
 0xd3f   : > { %v5402_v13 = vpop.f32.mrb[96].mxu1 }
 0xd40   : > { %v7754_v1 = vadd.f32 %v5402_v13, %v6363_v17  ;;  %v3294_v6 = vpop.f32.mrb[97].mxu1 }
 0xd41   : > { %v5403_v46 = vpop.f32.mrb[98].mxu1  ;;  %v7761_v57 = vadd.f32 %v3294_v6, %v6363_v17 }
 0xd42   : > { %3361 = vmax.xlane.f32.xlu0 %v7754_v1  ;;  %v3297_v7 = vpop.f32.mrb[99].mxu1  ;;  %v7766_v24 = vadd.f32 %v5403_v46, %v6363_v17 }
 0xd43   : > { %v7758_v5 = vadd.f32 %v3297_v7, %v6363_v17 }
 0xd45   : > { %3359 = vmax.xlane.f32.xlu1 %v7758_v5 }
 0xd46   : > { %3357 = vmax.xlane.f32.xlu0 %v7761_v57 }
 0xd47   : > { %v5406_v61 = vpop.f32.mrb[100].mxu1 }
 0xd48   : > { %v7769_v13 = vadd.f32 %v5406_v61, %v6363_v17  ;;  %v3310_v9 = vpop.f32.mrb[101].mxu1 }
 0xd49   : > { %v5407_v44 = vpop.f32.mrb[102].mxu1  ;;  %v7777_v14 = vadd.f32 %v3310_v9, %v6363_v17 }
 0xd4a   : > { %3363 = vmax.xlane.f32.xlu0 %v7766_v24  ;;  %3369 = vmax.xlane.f32.xlu1 %v7769_v13  ;;  %v3313_v7 = vpop.f32.mrb[103].mxu1  ;;  %v7782_v61 = vadd.f32 %v5407_v44, %v6363_v17 }
 0xd4b   : > { %v7774_v6 = vadd.f32 %v3313_v7, %v6363_v17 }
 0xd4e   : > { %3367 = vmax.xlane.f32.xlu0 %v7774_v6  ;;  %3365 = vmax.xlane.f32.xlu1 %v7777_v14 }
 0xd4f   : > { %v5410_v46 = vpop.f32.mrb[104].mxu1 }
 0xd50   : > { %v7785_v35 = vadd.f32 %v5410_v46, %v6363_v17  ;;  %v3326_v2 = vpop.f32.mrb[105].mxu1 }
 0xd51   : > { %v5411_v31 = vpop.f32.mrb[106].mxu1  ;;  %v7790_v9 = vadd.f32 %v3326_v2, %v6363_v17 }
 0xd52   : > { %3371 = vmax.xlane.f32.xlu1 %v7782_v61  ;;  %3377 = vmax.xlane.f32.xlu0 %v7785_v35  ;;  %v3329_v7 = vpop.f32.mrb[107].mxu1  ;;  %v7794_v48 = vadd.f32 %v5411_v31, %v6363_v17 }
 0xd53   : > { %v7802_v32 = vadd.f32 %v3329_v7, %v6363_v17 }
 0xd56   : > { %3373 = vmax.xlane.f32.xlu1 %v7790_v9 }
 0xd57   : > { %v5414_v12 = vpop.f32.mrb[108].mxu1 }
 0xd58   : > { %v3342_v44 = vpop.f32.mrb[109].mxu1  ;;  %v7806_v2 = vadd.f32 %v5414_v12, %v6363_v17 }
 0xd59   : > { %v7797_v46 = vadd.f32 %v3342_v44, %v6363_v17  ;;  %v5415_v33 = vpop.f32.mrb[110].mxu1 }
 0xd5a   : > { %3379 = vmax.xlane.f32.xlu1 %v7794_v48  ;;  %v3345_v8 = vpop.f32.mrb[111].mxu1  ;;  %v7810_v31 = vadd.f32 %v5415_v33, %v6363_v17 }
 0xd5b   : > { %3381 = vmax.xlane.f32.xlu0 %v7797_v46  ;;  %v7823_v33 = vadd.f32 %v3345_v8, %v6363_v17 }
 0xd5e   : > { %3375 = vmax.xlane.f32.xlu1 %v7802_v32 }
 0xd62   : > { %3385 = vmax.xlane.f32.xlu1 %v7806_v2 }
 0xd66   : > { %3387 = vmax.xlane.f32.xlu1 %v7810_v31 }
 0xd71   : > { %3664 = vrot.lane.b32.xlu0 %v6293_v39, %s6204_s27 }
 0xd77   : > { %3662 = vrot.lane.b32.xlu1 %v6295_v40, %s6204_s27 }
 0xd7b   : > { %3640 = vrot.lane.b32.xlu1 %v6275_v19, %s6205_s28 }
 0xd7f   : > { %3644 = vrot.lane.b32.xlu1 %v6285_v29, %s6205_s28 }
 0xd83   : > { %3648 = vrot.lane.b32.xlu1 %v6293_v39, %s6205_s28 }
 0xd87   : > { %3652 = vrot.lane.b32.xlu1 %v6301_v49, %s6205_s28 }
 0xd8b   : > { %3937 = vrot.lane.b32.xlu1 %v6275_v19, %s6206_s29  ;;  %v7842_v19 = vpop.permute.xlu0 %3656 }
 0xd8f   : > { %3941 = vrot.lane.b32.xlu1 %v6285_v29, %s6206_s29  ;;  %v7847_v29 = vpop.permute.xlu0 %3660 }
 0xd90   : > { %3383 = vmax.xlane.f32.xlu0 %v7823_v33 }
 0xd93   : > { %3945 = vrot.lane.b32.xlu1 %v6293_v39, %s6206_s29  ;;  %v7850_v39 = vpop.permute.xlu1 %3658 }
 0xd97   : > { %3949 = vrot.lane.b32.xlu1 %v6301_v49, %s6206_s29 }
 0xda6   : > { %3666 = vrot.lane.b32.xlu0 %v6303_v50, %s6204_s27 }
 0xdaa   : > { %3668 = vrot.lane.b32.xlu0 %v6301_v49, %s6204_s27 }
 0xdae   : > { %3638 = vrot.lane.b32.xlu0 %v6277_v20, %s6205_s28 }
 0xdb2   : > { %3642 = vrot.lane.b32.xlu0 %v6287_v30, %s6205_s28 }
 0xdb6   : > { %3646 = vrot.lane.b32.xlu0 %v6295_v40, %s6205_s28 }
 0xdba   : > { %3650 = vrot.lane.b32.xlu0 %v6303_v50, %s6205_s28 }
 0xdbb   : > { %1147 = vadd.xlane.f32.xlu1 %v6705_v15 }
 0xdbe   : > { %3935 = vrot.lane.b32.xlu0 %v6277_v20, %s6206_s29 }
 0xdbf   : > { %2063 = vadd.xlane.f32.xlu1 %v7169_v54 }
 0xdc2   : > { %3939 = vrot.lane.b32.xlu0 %v6287_v30, %s6206_s29 }
 0xdc3   : > { %2067 = vadd.xlane.f32.xlu1 %v7173_v34 }
 0xdc6   : > { %3943 = vrot.lane.b32.xlu0 %v6295_v40, %s6206_s29 }
 0xdc7   : > { %2521 = vadd.xlane.f32.xlu1 %v7401_v22 }
 0xdca   : > { %3947 = vrot.lane.b32.xlu0 %v6303_v50, %s6206_s29 }
 0xdcb   : > { %2525 = vadd.xlane.f32.xlu1 %v7405_v25 }
 0xdcf   : > { %2979 = vadd.xlane.f32.xlu1 %v7633_v53  ;;  %v3362_v20 = vpop.xlane.xlu0 %3361 }
 0xdd0   : > { %v3391_v40 = vsub.f32 %v7754_v1, %v3362_v20 }
 0xdd2   : > { %v3360_v30 = vpop.xlane.xlu1 %3359  ;;  %v3409_v8 = vmul.f32 1.442695, %v3391_v40 }
 0xdd3   : > { %v3390_v49 = vsub.f32 %v7758_v5, %v3360_v30  ;;  %2983 = vadd.xlane.f32.xlu1 %v7637_v21  ;;  %v3358_v15 = vpop.xlane.xlu0 %3357 }
 0xdd4   : > { %v3389_v54 = vsub.f32 %v7761_v57, %v3358_v15 }
 0xdd5   : > { %v3407_v50 = vmul.f32 1.442695, %v3390_v49 }
 0xdd6   : > { %v3405_v34 = vmul.f32 1.442695, %v3389_v54 }
 0xdd7   : > { %5855 = vpow2.f32 %v3407_v50  ;;  %v3370_v22 = vpop.xlane.xlu1 %3369  ;;  %1155 = vadd.xlane.f32.xlu1 %v6718_v4  ;;  %v3364_v25 = vpop.xlane.xlu0 %3363 }
 0xdd8   : > { %5857 = vpow2.f32 %v3405_v34  ;;  %v3392_v53 = vsub.f32 %v7766_v24, %v3364_v25  ;;  %v3395_v5 = vsub.f32 %v7769_v13, %v3370_v22 }
 0xdd9   : > { %5859 = vpow2.f32 %v3409_v8 }
 0xdda   : > { %v3411_v12 = vmul.f32 1.442695, %v3392_v53  ;;  %v3417_v20 = vmul.f32 1.442695, %v3395_v5 }
 0xddb   : > { %v3366_v21 = vpop.xlane.xlu1 %3365  ;;  %1159 = vadd.xlane.f32.xlu1 %v6729_v27  ;;  %v3368_v1 = vpop.xlane.xlu0 %3367 }
 0xddc   : > { %v3393_v57 = vsub.f32 %v7777_v14, %v3366_v21  ;;  %v3394_v7 = vsub.f32 %v7774_v6, %v3368_v1  ;;  %5861 = vpow2.f32 %v3411_v12  ;;  %v9320_v1 = vld [vmem:[#allocation60_spill] sm:$0xff] }
 0xdde   : > { %v3413_v44 = vmul.f32 1.442695, %v3393_v57  ;;  %v3415_v4 = vmul.f32 1.442695, %v3394_v7  ;;  %v9321_v7 = vld [vmem:[#allocation39_spill] sm:$0xff] }
 0xddf   : > { %v3372_v30 = vpop.xlane.xlu1 %3371  ;;  %1613 = vadd.xlane.f32.xlu1 %v6950_v45  ;;  %v3378_v45 = vpop.xlane.xlu0 %3377 }
 0xde0   : > { %5863 = vpow2.f32 %v3413_v44  ;;  %v3396_v24 = vsub.f32 %v7782_v61, %v3372_v30  ;;  %v3399_v34 = vsub.f32 %v7785_v35, %v3378_v45 }
 0xde1   : > { %v7865_v13 = vpop.eup %5855  ;;  %5865 = vpow2.f32 %v3415_v4  ;;  %v9322_v4 = vld [vmem:[#allocation87_spill] sm:$0xff] }
 0xde2   : > { %v7867_v27 = vpop.eup %5857  ;;  %v3419_v49 = vmul.f32 1.442695, %v3396_v24  ;;  %5867 = vpow2.f32 %v3417_v20  ;;  %v3425_v12 = vmul.f32 1.442695, %v3399_v34  ;;  %v9323_v20 = vld [vmem:[#allocation63_spill] sm:$0xff] }
 0xde3   : > { %v3374_v14 = vpop.xlane.xlu1 %3373  ;;  %1617 = vadd.xlane.f32.xlu1 %v6961_v58  ;;  %v3469_v6 = vpack.c.bf16 %v7865_v13, %v7867_v27  ;;  %v7872_v15 = vpop.eup %5859 }
 0xde4   : > { %5869 = vpow2.f32 %v3419_v49  ;;  %v3397_v61 = vsub.f32 %v7790_v9, %v3374_v14  ;;  %v3695_v9 = vsel %vm463_vm1, %v7717_v41, 0  ;;  %v9325_v49 = vld [vmem:[#allocation66_spill] sm:$0xff]  ;;  %v9327_v14 = vld [vmem:[#allocation91_spill] sm:$0xff] }
 0xde5   : > { %5432 = vmatprep.mubr.bf16.mxu0 %v3469_v6  ;;  %v9328_v6 = vld [vmem:[#allocation116_spill] sm:$0xff] }
 0xde6   : > { %v7875_v40 = vpop.eup %5861  ;;  %v3421_v25 = vmul.f32 1.442695, %v3397_v61  ;;  %v9329_v61 = vld [vmem:[#allocation94_spill] sm:$0xff] }
 0xde7   : > { %v3380_v54 = vpop.xlane.xlu1 %3379  ;;  %2071 = vadd.xlane.f32.xlu1 %v7182_v42  ;;  %v3470_v58 = vpack.c.bf16 %v7875_v40, %v7872_v15 }
 0xde8   : > { %v3400_v50 = vsub.f32 %v7794_v48, %v3380_v54  ;;  %5871 = vpow2.f32 %v3421_v25  ;;  %v3382_v44 = vpop.xlane.xlu0 %3381  ;;  %v9330_v54 = vld [vmem:[#allocation119_spill] sm:$0xff] }
 0xde9   : > { %1149 = vadd.xlane.f32.xlu0 %v6703_v23  ;;  %5433 = vmatmul.mubr.bf16.vlgmr.msra.gmra.mrb[112].mxu0 %v3470_v58 }
 0xdea   : > { %v7883_v22 = vpop.eup %5863  ;;  %v3427_v53 = vmul.f32 1.442695, %v3400_v50  ;;  %5449 = vmatpush3.bf16.xpose.msra.mxu0 %v3695_v9  ;;  %v3401_v50 = vsub.f32 %v7797_v46, %v3382_v44 }
 0xdeb   : > { %v7887_v8 = vpop.eup %5865  ;;  %v3376_v42 = vpop.xlane.xlu1 %3375  ;;  %2075 = vadd.xlane.f32.xlu1 %v7193_v51  ;;  %5605 = vmatprep.subr.msk.bf16.mxu0 %vm463_vm1, %v7842_v19 }
 0xdec   : > { %v3398_v48 = vsub.f32 %v7802_v32, %v3376_v42  ;;  %v3471_v23 = vpack.c.bf16 %v7887_v8, %v7883_v22  ;;  %v7895_v35 = vpop.eup %5867  ;;  %5873 = vpow2.f32 %v3427_v53  ;;  %v3698_v32 = vsel %vm463_vm1, %v7842_v19, 0  ;;  %v3665_v24 = vpop.permute.xlu0 %3664  ;;  %v9331_v53 = vld [vmem:[#allocation34_spill] sm:$0xff] }
 0xded   : > { %1151 = vadd.xlane.f32.xlu0 %v6709_v11  ;;  %v3701_v19 = vsel %vm463_vm1, %v7850_v39, 0  ;;  %v3710_v45 = vsel %vm463_vm1, %v3665_v24, 0  ;;  %v3429_v25 = vmul.f32 1.442695, %v3401_v50  ;;  %v9343_v50 = vld [vmem:[#allocation93_spill] sm:$0xff] }
 0xdee   : > { %v7898_v41 = vpop.eup %5869  ;;  %v3423_v5 = vmul.f32 1.442695, %v3398_v48  ;;  %5436 = vmatprep.mubr.bf16.mxu0 %v3471_v23 }
 0xdef   : > { %2529 = vadd.xlane.f32.xlu1 %v7414_v26  ;;  %v3472_v51 = vpack.c.bf16 %v7898_v41, %v7895_v35  ;;  %v3386_v11 = vpop.xlane.xlu1 %3385 }
 0xdf0   : > { %5875 = vpow2.f32 %v3423_v5  ;;  %v3403_v34 = vsub.f32 %v7806_v2, %v3386_v11 }
 0xdf1   : > { %5877 = vpow2.f32 %v3425_v12  ;;  %1153 = vadd.xlane.f32.xlu0 %v6712_v16  ;;  %5437 = vmatmul.mubr.bf16.gmra.mrb[116].mxu0 %v3472_v51  ;;  %v9334_v12 = vld [vmem:[#allocation62_spill] sm:$0xff] }
 0xdf2   : > { %5451 = vmatpush3.bf16.xpose.msra.mxu0 %v3698_v32  ;;  %v7911_v26 = vpop.eup %5871  ;;  %5879 = vpow2.f32 %v3429_v25 }
 0xdf3   : > { %2533 = vadd.xlane.f32.xlu1 %v7425_v59  ;;  %5606 = vmatprep.subr.msk.bf16.mxu0 %vm463_vm1, %v7850_v39  ;;  %v9319_v39 = vld [vmem:[#allocation36_spill] sm:$0xff] }
 0xdf5   : > { %1605 = vadd.xlane.f32.xlu0 %v6937_v38 }
 0xdf6   : > { %v7913_v21 = vpop.eup %5873 }
 0xdf7   : > { %2987 = vadd.xlane.f32.xlu1 %v7646_v52 }
 0xdf9   : > { %1607 = vadd.xlane.f32.xlu0 %v6935_v47  ;;  %v3388_v47 = vpop.xlane.xlu1 %3387 }
 0xdfa   : > { %v7916_v16 = vpop.eup %5875  ;;  %5453 = vmatpush3.bf16.xpose.msra.mxu0 %v3701_v19  ;;  %v3404_v58 = vsub.f32 %v7810_v31, %v3388_v47  ;;  %v9332_v31 = vld [vmem:[#allocation35_spill] sm:$0xff] }
 0xdfb   : > { %v7920_v59 = vpop.eup %5877  ;;  %2991 = vadd.xlane.f32.xlu1 %v7657_v55  ;;  %v3473_v38 = vpack.c.bf16 %v7916_v16, %v7911_v26  ;;  %5607 = vmatprep.subr.msk.bf16.mxu0 %vm463_vm1, %v7847_v29  ;;  %v3704_v55 = vsel %vm463_vm1, %v7847_v29, 0  ;;  %v9326_v29 = vld [vmem:[#allocation115_spill] sm:$0xff] }
 0xdfc   : > { %v3474_v52 = vpack.c.bf16 %v7913_v21, %v7920_v59  ;;  %v3435_v9 = vmul.f32 1.442695, %v3404_v58  ;;  %v7965_v51 = vpop.eup %5879 }
 0xdfd   : > { %1609 = vadd.xlane.f32.xlu0 %v6941_v56  ;;  %5440 = vmatprep.mubr.bf16.mxu0 %v3473_v38  ;;  %v3663_v57 = vpop.permute.xlu1 %3662  ;;  %v9324_v56 = vld [vmem:[#allocation88_spill] sm:$0xff]  ;;  %v9335_v38 = vld [vmem:[#allocation89_spill] sm:$0xff] }
 0xdfe   : > { %5441 = vmatmul.mubr.bf16.gmra.mrb[120].mxu0 %v3474_v52  ;;  %v3707_v30 = vsel %vm463_vm1, %v3663_v57, 0  ;;  %5881 = vpow2.f32 %v3435_v9 }
 0xdff   : > { %1163 = vadd.xlane.f32.xlu1 %v9319_v39 }
 0xe01   : > { %1611 = vadd.xlane.f32.xlu0 %v9320_v1  ;;  %v9336_v1 = vld [vmem:[#allocation90_spill] sm:$0xff] }
 0xe02   : > { %5455 = vmatpush3.bf16.xpose.msra.mxu0 %v3704_v55 }
 0xe03   : > { %1167 = vadd.xlane.f32.xlu1 %v9321_v7  ;;  %5608 = vmatprep.subr.msk.bf16.mxu0 %vm463_vm1, %v3663_v57  ;;  %v9337_v7 = vld [vmem:[#allocation117_spill] sm:$0xff] }
 0xe05   : > { %2065 = vadd.xlane.f32.xlu0 %v9322_v4  ;;  %v9338_v4 = vld [vmem:[#allocation118_spill] sm:$0xff] }
 0xe07   : > { %1621 = vadd.xlane.f32.xlu1 %v9323_v20 }
 0xe08   : > { %v7968_v11 = vpop.eup %5881 }
 0xe09   : > { %2069 = vadd.xlane.f32.xlu0 %v9324_v56 }
 0xe0a   : > { %5457 = vmatpush3.bf16.xpose.msra.mxu0 %v3707_v30 }
 0xe0b   : > { %1625 = vadd.xlane.f32.xlu1 %v9325_v49  ;;  %5609 = vmatprep.subr.msk.bf16.mxu0 %vm463_vm1, %v3665_v24  ;;  %v9339_v49 = vld [vmem:[#allocation38_spill] sm:$0xff] }
 0xe0d   : > { %2523 = vadd.xlane.f32.xlu0 %v9326_v29 }
 0xe0f   : > { %2079 = vadd.xlane.f32.xlu1 %v9327_v14  ;;  %v9340_v14 = vld [vmem:[#allocation37_spill] sm:$0xff] }
 0xe11   : > { %2527 = vadd.xlane.f32.xlu0 %v9328_v6  ;;  %v9341_v6 = vld [vmem:[#allocation65_spill] sm:$0xff] }
 0xe12   : > { %5459 = vmatpush3.bf16.xpose.msra.mxu0 %v3710_v45 }
 0xe13   : > { %2083 = vadd.xlane.f32.xlu1 %v9329_v61 }
 0xe15   : > { %2981 = vadd.xlane.f32.xlu0 %v7631_v37  ;;  %v3433_v37 = vmul.f32 1.442695, %v3403_v34  ;;  %v9344_v34 = vld [vmem:[#allocation92_spill] sm:$0xff] }
 0xe17   : > { %2537 = vadd.xlane.f32.xlu1 %v9330_v54  ;;  %v9342_v54 = vld [vmem:[#allocation64_spill] sm:$0xff] }
 0xe19   : > { %2985 = vadd.xlane.f32.xlu0 %v7640_v60 }
 0xe1b   : > { %3441 = vadd.xlane.f32.xlu1 %v7872_v15  ;;  %v3641_v15 = vpop.permute.xlu1 %3640 }
 0xe1d   : > { %1157 = vadd.xlane.f32.xlu0 %v9331_v53  ;;  %v3384_v42 = vpop.xlane.xlu0 %3383 }
 0xe1e   : > { %v3402_v48 = vsub.f32 %v7823_v33, %v3384_v42  ;;  %v9333_v33 = vld [vmem:[#allocation61_spill] sm:$0xff] }
 0xe1f   : > { %3437 = vadd.xlane.f32.xlu1 %v7867_v27  ;;  %v3645_v27 = vpop.permute.xlu1 %3644 }
 0xe20   : > { %v3431_v46 = vmul.f32 1.442695, %v3402_v48 }
 0xe21   : > { %1161 = vadd.xlane.f32.xlu0 %v9332_v31  ;;  %v3667_v60 = vpop.permute.xlu0 %3666 }
 0xe22   : > { %5883 = vpow2.f32 %v3431_v46  ;;  %5610 = vmatprep.subr.msk.bf16.mxu0 %vm463_vm1, %v3667_v60  ;;  %v3713_v2 = vsel %vm463_vm1, %v3667_v60, 0 }
 0xe23   : > { %5885 = vpow2.f32 %v3433_v37  ;;  %3449 = vadd.xlane.f32.xlu1 %v7895_v35  ;;  %5461 = vmatpush3.bf16.xpose.msra.mxu0 %v3713_v2  ;;  %v3649_v39 = vpop.permute.xlu1 %3648 }
 0xe25   : > { %1615 = vadd.xlane.f32.xlu0 %v9333_v33  ;;  %v3669_v23 = vpop.permute.xlu0 %3668 }
 0xe26   : > { %5611 = vmatprep.subr.msk.bf16.mxu0 %vm463_vm1, %v3669_v23  ;;  %v3716_v32 = vsel %vm463_vm1, %v3669_v23, 0 }
 0xe27   : > { %3445 = vadd.xlane.f32.xlu1 %v7883_v22  ;;  %v3653_v57 = vpop.permute.xlu1 %3652 }
 0xe29   : > { %1619 = vadd.xlane.f32.xlu0 %v9334_v12  ;;  %v3639_v5 = vpop.permute.xlu0 %3638 }
 0xe2b   : > { %5463 = vmatpush3.bf16.xpose.msra.mxu0 %v3716_v32  ;;  %v3938_v56 = vpop.permute.xlu1 %3937 }
 0xe2c   : > { %v7970_v35 = vpop.eup %5883 }
 0xe2d   : > { %v7972_v19 = vpop.eup %5885  ;;  %2073 = vadd.xlane.f32.xlu0 %v9335_v38  ;;  %v3643_v52 = vpop.permute.xlu0 %3642  ;;  %v3475_v22 = vpack.c.bf16 %v7970_v35, %v7965_v51 }
 0xe2e   : > { %v3476_v47 = vpack.c.bf16 %v7968_v11, %v7972_v19 }
 0xe2f   : > { %5444 = vmatprep.mubr.bf16.mxu0 %v3475_v22  ;;  %v3942_v24 = vpop.permute.xlu1 %3941  ;;  %v9347_v22 = vld [vmem:[#allocation44_spill] sm:$0xff] }
 0xe30   : > { %5445 = vmatmul.mubr.bf16.gmra.mrb[124].mxu0 %v3476_v47 }
 0xe31   : > { %2077 = vadd.xlane.f32.xlu0 %v9336_v1  ;;  %5464 = vmatprep.mubr.msk.bf16.mxu0 %vm463_vm1, %v3639_v5  ;;  %v3647_v55 = vpop.permute.xlu0 %3646 }
 0xe33   : > { %v3946_v29 = vpop.permute.xlu1 %3945 }
 0xe35   : > { %2531 = vadd.xlane.f32.xlu0 %v9337_v7  ;;  %v3651_v44 = vpop.permute.xlu0 %3650 }
 0xe38   : > { %5465 = vmatmul.mubr.msk.bf16.vlgmr.msra.gmra.mrb[128].mxu0 %vm463_vm1, %v3641_v15  ;;  %v9345_v15 = vld [vmem:[#allocation45_spill] sm:$0xff] }
 0xe39   : > { %2535 = vadd.xlane.f32.xlu0 %v9338_v4  ;;  %5468 = vmatprep.mubr.msk.bf16.mxu0 %vm463_vm1, %v3643_v52  ;;  %v3936_v20 = vpop.permute.xlu0 %3935 }
 0xe3a   : > { %5480 = vmatprep.subr.bf16.mxu0 %v3936_v20  ;;  %5532 = vmatprep.subr.bf16.mxu1 %v3936_v20 }
 0xe3b   : > { %5481 = vmatpush3.bf16.msra.mxu0 %v3936_v20  ;;  %5540 = vmatpush3.bf16.msra.mxu1 %v3936_v20 }
 0xe3c   : > { %5482 = vmatprep.subr.bf16.mxu0 %v3938_v56  ;;  %5533 = vmatprep.subr.bf16.mxu1 %v3938_v56 }
 0xe3d   : > { %2989 = vadd.xlane.f32.xlu0 %v7650_v28  ;;  %v3940_v30 = vpop.permute.xlu0 %3939 }
 0xe3f   : > { %5483 = vmatpush3.bf16.msra.mxu0 %v3938_v56  ;;  %5541 = vmatpush3.bf16.msra.mxu1 %v3938_v56  ;;  %v9349_v56 = vld [vmem:[#allocation72_spill] sm:$0xff] }
 0xe40   : > { %5469 = vmatmul.mubr.msk.bf16.gmra.mrb[132].mxu0 %vm463_vm1, %v3645_v27  ;;  %5484 = vmatprep.subr.bf16.mxu0 %v3940_v30 }
 0xe41   : > { %5534 = vmatprep.subr.bf16.mxu1 %v3940_v30  ;;  %2993 = vadd.xlane.f32.xlu0 %v7659_v62  ;;  %v3944_v28 = vpop.permute.xlu0 %3943  ;;  %v3950_v62 = vpop.permute.xlu1 %3949 }
 0xe42   : > { %5472 = vmatprep.mubr.msk.bf16.mxu0 %vm463_vm1, %v3647_v55 }
 0xe43   : > { %5485 = vmatpush3.bf16.msra.mxu0 %v3940_v30  ;;  %5542 = vmatpush3.bf16.msra.mxu1 %v3940_v30 }
 0xe44   : > { %5486 = vmatprep.subr.bf16.mxu0 %v3942_v24  ;;  %5535 = vmatprep.subr.bf16.mxu1 %v3942_v24 }
 0xe45   : > { %1165 = vadd.xlane.f32.xlu0 %v9339_v49  ;;  %v3948_v45 = vpop.permute.xlu0 %3947 }
 0xe47   : > { %5487 = vmatpush3.bf16.msra.mxu0 %v3942_v24  ;;  %5543 = vmatpush3.bf16.msra.mxu1 %v3942_v24  ;;  %v9350_v24 = vld [vmem:[#allocation74_spill] sm:$0xff] }
 0xe48   : > { %5473 = vmatmul.mubr.msk.bf16.gmra.mrb[136].mxu0 %vm463_vm1, %v3649_v39  ;;  %5488 = vmatprep.subr.bf16.mxu0 %v3944_v28  ;;  %v1148_v61 = vpop.xlane.xlu1 %1147  ;;  %v9348_v39 = vld [vmem:[#allocation46_spill] sm:$0xff] }
 0xe49   : > { %5536 = vmatprep.subr.bf16.mxu1 %v3944_v28  ;;  %1169 = vadd.xlane.f32.xlu0 %v9340_v14  ;;  %5887 = vrcp.f32 %v1148_v61 }
 0xe4a   : > { %5476 = vmatprep.mubr.msk.bf16.mxu0 %vm463_vm1, %v3651_v44 }
 0xe4b   : > { %5489 = vmatpush3.bf16.msra.mxu0 %v3944_v28  ;;  %5544 = vmatpush3.bf16.msra.mxu1 %v3944_v28 }
 0xe4c   : > { %5490 = vmatprep.subr.bf16.mxu0 %v3946_v29  ;;  %5537 = vmatprep.subr.bf16.mxu1 %v3946_v29  ;;  %v2064_v58 = vpop.xlane.xlu1 %2063 }
 0xe4d   : > { %1623 = vadd.xlane.f32.xlu0 %v9341_v6 }
 0xe4f   : > { %5491 = vmatpush3.bf16.msra.mxu0 %v3946_v29  ;;  %5545 = vmatpush3.bf16.msra.mxu1 %v3946_v29 }
 0xe50   : > { %5477 = vmatmul.mubr.msk.bf16.gmra.mrb[140].mxu0 %vm463_vm1, %v3653_v57  ;;  %5492 = vmatprep.subr.bf16.mxu0 %v3948_v45  ;;  %v2068_v25 = vpop.xlane.xlu1 %2067 }
 0xe51   : > { %5538 = vmatprep.subr.bf16.mxu1 %v3948_v45  ;;  %1627 = vadd.xlane.f32.xlu0 %v9342_v54  ;;  %v9351_v54 = vld [vmem:[#allocation71_spill] sm:$0xff] }
 0xe53   : > { %5493 = vmatpush3.bf16.msra.mxu0 %v3948_v45  ;;  %5546 = vmatpush3.bf16.msra.mxu1 %v3948_v45 }
 0xe54   : > { %5494 = vmatprep.subr.bf16.mxu0 %v3950_v62  ;;  %5539 = vmatprep.subr.bf16.mxu1 %v3950_v62  ;;  %v2522_v9 = vpop.xlane.xlu1 %2521 }
 0xe55   : > { %2081 = vadd.xlane.f32.xlu0 %v9343_v50 }
 0xe57   : > { %5495 = vmatpush3.bf16.msra.mxu0 %v3950_v62  ;;  %5547 = vmatpush3.bf16.msra.mxu1 %v3950_v62 }
 0xe58   : > { %v2526_v53 = vpop.xlane.xlu1 %2525 }
 0xe59   : > { %2085 = vadd.xlane.f32.xlu0 %v9344_v34 }
 0xe5c   : > { %v2980_v42 = vpop.xlane.xlu1 %2979 }
 0xe5d   : > { %3443 = vadd.xlane.f32.xlu0 %v7875_v40  ;;  %v5888_v40 = vpop.eup %5887 }
 0xe5e   : > { %v8009_v33 = vmul.f32 %v5888_v40, %v9345_v15  ;;  %v9353_v40 = vld [vmem:[#allocation100_spill] sm:$0xff] }
 0xe60   : > { %v8002_v48 = vpop.xlane.xlu1 %2983 }
 0xe61   : > { %3439 = vadd.xlane.f32.xlu0 %v7865_v13 }
 0xe64   : > { %v8004_v31 = vpop.xlane.xlu1 %1155 }
 0xe65   : > { %3451 = vadd.xlane.f32.xlu0 %v7898_v41 }
 0xe68   : > { %v8006_v2 = vpop.xlane.xlu1 %1159 }
 0xe69   : > { %3447 = vadd.xlane.f32.xlu0 %v7887_v8  ;;  %v9346_v8 = vld [vmem:[#allocation47_spill] sm:$0xff] }
 0xe6c   : > { %v8016_v32 = vpop.xlane.xlu1 %1613 }
 0xe70   : > { %v8026_v57 = vpop.xlane.xlu1 %1617 }
 0xe74   : > { %v8034_v29 = vpop.xlane.xlu1 %2071 }
 0xe76   : > { %v1150_v37 = vpop.xlane.xlu0 %1149 }
 0xe77   : > { %5889 = vrcp.f32 %v1150_v37 }
 0xe78   : > { %v8038_v45 = vpop.xlane.xlu1 %2075 }
 0xe7a   : > { %v1152_v46 = vpop.xlane.xlu0 %1151 }
 0xe7b   : > { %5891 = vrcp.f32 %v1152_v46 }
 0xe7e   : > { %v1154_v60 = vpop.xlane.xlu0 %1153 }
 0xe7f   : > { %5893 = vrcp.f32 %v1154_v60 }
 0xe81   : > { %v5890_v13 = vpop.eup %5889 }
 0xe82   : > { %v1606_v41 = vpop.xlane.xlu0 %1605  ;;  %v8012_v23 = vmul.f32 %v5890_v13, %v9346_v8  ;;  %v8054_v8 = vpop.xlane.xlu1 %2529 }
 0xe83   : > { %5895 = vrcp.f32 %v1606_v41 }
 0xe85   : > { %v5892_v5 = vpop.eup %5891 }
 0xe86   : > { %v1608_v12 = vpop.xlane.xlu0 %1607  ;;  %v8019_v47 = vmul.f32 %v5892_v5, %v9347_v22 }
 0xe87   : > { %5897 = vrcp.f32 %v1608_v12  ;;  %v9373_v12 = vld [vmem:[#allocation104_spill] sm:$0xff] }
 0xe89   : > { %v5894_v38 = vpop.eup %5893 }
 0xe8a   : > { %v1610_v52 = vpop.xlane.xlu0 %1609  ;;  %v8022_v1 = vmul.f32 %v5894_v38, %v9348_v39 }
 0xe8b   : > { %5899 = vrcp.f32 %v1610_v52  ;;  %v9355_v52 = vld [vmem:[#allocation99_spill] sm:$0xff] }
 0xe8d   : > { %v5896_v44 = vpop.eup %5895 }
 0xe8e   : > { %v1612_v7 = vpop.xlane.xlu0 %1611  ;;  %v8029_v30 = vmul.f32 %v5896_v44, %v9349_v56 }
 0xe8f   : > { %5901 = vrcp.f32 %v1612_v7 }
 0xe90   : > { %5903 = vrcp.f32 %v2064_v58  ;;  %v9352_v58 = vld [vmem:[#allocation73_spill] sm:$0xff] }
 0xe91   : > { %v5898_v4 = vpop.eup %5897 }
 0xe92   : > { %v2066_v20 = vpop.xlane.xlu0 %2065  ;;  %v8032_v49 = vmul.f32 %v5898_v4, %v9350_v24  ;;  %v9357_v24 = vld [vmem:[#allocation128_spill] sm:$0xff] }
 0xe93   : > { %5905 = vrcp.f32 %v2066_v20  ;;  %v8067_v20 = vpop.xlane.xlu1 %2533 }
 0xe94   : > { %5907 = vrcp.f32 %v2068_v25 }
 0xe95   : > { %v5900_v62 = vpop.eup %5899 }
 0xe96   : > { %v2070_v14 = vpop.xlane.xlu0 %2069  ;;  %v8041_v50 = vmul.f32 %v5900_v62, %v9351_v54 }
 0xe97   : > { %5909 = vrcp.f32 %v2070_v14  ;;  %v9358_v14 = vld [vmem:[#allocation130_spill] sm:$0xff] }
 0xe98   : > { %5911 = vrcp.f32 %v2522_v9  ;;  %v9354_v9 = vld [vmem:[#allocation102_spill] sm:$0xff] }
 0xe99   : > { %v5902_v6 = vpop.eup %5901 }
 0xe9a   : > { %v2524_v61 = vpop.xlane.xlu0 %2523  ;;  %v8044_v34 = vmul.f32 %v5902_v6, %v9352_v58  ;;  %v5904_v37 = vpop.eup %5903 }
 0xe9b   : > { %5913 = vrcp.f32 %v2524_v61  ;;  %v8049_v13 = vmul.f32 %v5904_v37, %v9353_v40  ;;  %v9359_v37 = vld [vmem:[#allocation127_spill] sm:$0xff] }
 0xe9c   : > { %5915 = vrcp.f32 %v2526_v53  ;;  %v9356_v53 = vld [vmem:[#allocation101_spill] sm:$0xff] }
 0xe9d   : > { %v5906_v25 = vpop.eup %5905 }
 0xe9e   : > { %v2528_v60 = vpop.xlane.xlu0 %2527  ;;  %v8052_v41 = vmul.f32 %v5906_v25, %v9354_v9  ;;  %v5908_v15 = vpop.eup %5907  ;;  %v9360_v25 = vld [vmem:[#allocation129_spill] sm:$0xff] }
 0xe9f   : > { %5917 = vrcp.f32 %v2528_v60  ;;  %v8059_v22 = vmul.f32 %v5908_v15, %v9355_v52  ;;  %v8084_v9 = vpop.xlane.xlu1 %2987 }
 0xea0   : > { %5919 = vrcp.f32 %v2980_v42 }
 0xea1   : > { %v5910_v5 = vpop.eup %5909 }
 0xea2   : > { %v2982_v38 = vpop.xlane.xlu0 %2981  ;;  %v8062_v39 = vmul.f32 %v5910_v5, %v9356_v53  ;;  %v5912_v7 = vpop.eup %5911 }
 0xea3   : > { %5921 = vrcp.f32 %v2982_v38  ;;  %v8070_v42 = vmul.f32 %v5912_v7, %v9357_v24  ;;  %v9369_v7 = vld [vmem:[#allocation75_spill] sm:$0xff] }
 0xea4   : > { %5923 = vrcp.f32 %v8002_v48 }
 0xea5   : > { %v5914_v4 = vpop.eup %5913 }
 0xea6   : > { %v2986_v56 = vpop.xlane.xlu0 %2985  ;;  %v8073_v62 = vmul.f32 %v5914_v4, %v9358_v14  ;;  %v5916_v6 = vpop.eup %5915 }
 0xea7   : > { %5925 = vrcp.f32 %v2986_v56  ;;  %v8079_v48 = vmul.f32 %v5916_v6, %v9359_v37  ;;  %v8098_v56 = vpop.xlane.xlu1 %2991  ;;  %v9362_v37 = vld [vmem:[#allocation51_spill] sm:$0xff] }
 0xea8   : > { %5927 = vrcp.f32 %v8004_v31 }
 0xea9   : > { %v5918_v54 = vpop.eup %5917 }
 0xeaa   : > { %v1158_v58 = vpop.xlane.xlu0 %1157  ;;  %v8082_v60 = vmul.f32 %v5918_v54, %v9360_v25  ;;  %v5920_v40 = vpop.eup %5919 }
 0xeab   : > { %5929 = vrcp.f32 %v1158_v58  ;;  %v8090_v31 = vmul.f32 %v5920_v40, %v7723_v3  ;;  %v9361_v58 = vld [vmem:[#allocation49_spill] sm:$0xff]  ;;  %v8115_v40 = vpop.xlane.xlu1 %1163 }
 0xeac   : > { %5931 = vrcp.f32 %v8006_v2 }
 0xead   : > { %v5922_v5 = vpop.eup %5921 }
 0xeae   : > { %v1162_v38 = vpop.xlane.xlu0 %1161  ;;  %v8093_v52 = vmul.f32 %v5922_v5, %v7727_v36  ;;  %v5924_v53 = vpop.eup %5923 }
 0xeaf   : > { %5933 = vrcp.f32 %v1162_v38  ;;  %v8101_v2 = vmul.f32 %v5924_v53, %v7721_v18  ;;  %v9363_v53 = vld [vmem:[#allocation48_spill] sm:$0xff] }
 0xeb0   : > { %5935 = vrcp.f32 %v8016_v32 }
 0xeb1   : > { %v5926_v4 = vpop.eup %5925 }
 0xeb2   : > { %v1616_v24 = vpop.xlane.xlu0 %1615  ;;  %v8104_v3 = vmul.f32 %v5926_v4, %v7725_v10  ;;  %v5928_v14 = vpop.eup %5927  ;;  %v9365_v4 = vld [vmem:[#allocation50_spill] sm:$0xff]  ;;  %v9367_v10 = vld [vmem:[#allocation76_spill] sm:$0xff] }
 0xeb3   : > { %5937 = vrcp.f32 %v1616_v24  ;;  %v8110_v32 = vmul.f32 %v5928_v14, %v9361_v58 }
 0xeb4   : > { %5939 = vrcp.f32 %v8026_v57 }
 0xeb5   : > { %v5930_v6 = vpop.eup %5929 }
 0xeb6   : > { %v1620_v54 = vpop.xlane.xlu0 %1619  ;;  %v8113_v25 = vmul.f32 %v5930_v6, %v9362_v37  ;;  %v5932_v18 = vpop.eup %5931 }
 0xeb7   : > { %5941 = vrcp.f32 %v1620_v54  ;;  %v8121_v57 = vmul.f32 %v5932_v18, %v9363_v53  ;;  %v1168_v54 = vpop.xlane.xlu1 %1167  ;;  %v9368_v53 = vld [vmem:[#allocation78_spill] sm:$0xff] }
 0xeb8   : > { %5943 = vrcp.f32 %v8034_v29 }
 0xeb9   : > { %v5934_v5 = vpop.eup %5933  ;;  %9364 = vst [vmem:[#allocation36_spill] sm:$0xff] %v8121_v57 }
 0xeba   : > { %v2074_v38 = vpop.xlane.xlu0 %2073  ;;  %v8124_v24 = vmul.f32 %v5934_v5, %v9365_v4  ;;  %v5936_v14 = vpop.eup %5935 }
 0xebb   : > { %5945 = vrcp.f32 %v2074_v38  ;;  %v8134_v18 = vmul.f32 %v5936_v14, %v9367_v10  ;;  %v9371_v10 = vld [vmem:[#allocation77_spill] sm:$0xff] }
 0xebc   : > { %9366 = vst [vmem:[#allocation60_spill] sm:$0xff] %v8124_v24  ;;  %5947 = vrcp.f32 %v8038_v45  ;;  %v8129_v37 = vpop.f32.mrb[112].mxu0  ;;  %v9381_v24 = vld [vmem:[#allocation132_spill] sm:$0xff] }
 0xebd   : > { %v5938_v58 = vpop.eup %5937  ;;  %v8131_v36 = vpop.f32.mrb[113].mxu0 }
 0xebe   : > { %v2078_v29 = vpop.xlane.xlu0 %2077  ;;  %v8137_v5 = vmul.f32 %v5938_v58, %v9368_v53  ;;  %v5940_v4 = vpop.eup %5939 }
 0xebf   : > { %v8139_v38 = vpop.f32.mrb[114].mxu0  ;;  %5949 = vrcp.f32 %v2078_v29  ;;  %v8147_v46 = vmul.f32 %v5940_v4, %v9369_v7  ;;  %v1622_v53 = vpop.xlane.xlu1 %1621  ;;  %v9375_v4 = vld [vmem:[#allocation106_spill] sm:$0xff] }
 0xec0   : > { %v8141_v6 = vpop.f32.mrb[115].mxu0  ;;  %5951 = vrcp.f32 %v8054_v8 }
 0xec1   : > { %v5942_v15 = vpop.eup %5941  ;;  %9370 = vst [vmem:[#allocation39_spill] sm:$0xff] %v8147_v46 }
 0xec2   : > { %v2532_v44 = vpop.xlane.xlu0 %2531  ;;  %v8150_v14 = vmul.f32 %v5942_v15, %v9371_v10  ;;  %v5944_v58 = vpop.eup %5943 }
 0xec3   : > { %5953 = vrcp.f32 %v2532_v44  ;;  %v8160_v7 = vmul.f32 %v5944_v58, %v9373_v12  ;;  %v1626_v55 = vpop.xlane.xlu1 %1625  ;;  %v9379_v58 = vld [vmem:[#allocation105_spill] sm:$0xff] }
 0xec4   : > { %9372 = vst [vmem:[#allocation87_spill] sm:$0xff] %v8150_v14  ;;  %5955 = vrcp.f32 %v8067_v20  ;;  %v8155_v45 = vpop.f32.mrb[116].mxu0  ;;  %v9377_v14 = vld [vmem:[#allocation103_spill] sm:$0xff] }
 0xec5   : > { %v5946_v61 = vpop.eup %5945  ;;  %v8157_v28 = vpop.f32.mrb[117].mxu0  ;;  %9374 = vst [vmem:[#allocation63_spill] sm:$0xff] %v8160_v7 }
 0xec6   : > { %v2536_v8 = vpop.xlane.xlu0 %2535  ;;  %v8163_v15 = vmul.f32 %v5946_v61, %v9375_v4  ;;  %v5948_v10 = vpop.eup %5947 }
 0xec7   : > { %v8165_v27 = vpop.f32.mrb[118].mxu0  ;;  %5957 = vrcp.f32 %v2536_v8  ;;  %v8173_v12 = vmul.f32 %v5948_v10, %v9377_v14  ;;  %v2080_v10 = vpop.xlane.xlu1 %2079 }
 0xec8   : > { %9376 = vst [vmem:[#allocation88_spill] sm:$0xff] %v8163_v15  ;;  %v8167_v44 = vpop.f32.mrb[119].mxu0  ;;  %5959 = vrcp.f32 %v8084_v9  ;;  %v9383_v9 = vld [vmem:[#allocation134_spill] sm:$0xff] }
 0xec9   : > { %v5950_v29 = vpop.eup %5949  ;;  %9378 = vst [vmem:[#allocation66_spill] sm:$0xff] %v8173_v12  ;;  %v9386_v12 = vld [vmem:[#allocation131_spill] sm:$0xff] }
 0xeca   : > { %v2990_v46 = vpop.xlane.xlu0 %2989  ;;  %v8176_v61 = vmul.f32 %v5950_v29, %v9379_v58  ;;  %v5952_v4 = vpop.eup %5951 }
 0xecb   : > { %5961 = vrcp.f32 %v2990_v46  ;;  %v8182_v7 = vmul.f32 %v5952_v4, %v9381_v24  ;;  %v9388_v4 = vld [vmem:[#allocation133_spill] sm:$0xff] }
 0xecc   : > { %9380 = vst [vmem:[#allocation115_spill] sm:$0xff] %v8176_v61  ;;  %5963 = vrcp.f32 %v8098_v56 }
 0xecd   : > { %v5954_v57 = vpop.eup %5953  ;;  %9382 = vst [vmem:[#allocation91_spill] sm:$0xff] %v8182_v7 }
 0xece   : > { %v2994_v20 = vpop.xlane.xlu0 %2993  ;;  %v8185_v15 = vmul.f32 %v5954_v57, %v9383_v9  ;;  %v5956_v14 = vpop.eup %5955 }
 0xecf   : > { %5965 = vrcp.f32 %v2994_v20  ;;  %v8195_v24 = vmul.f32 %v5956_v14, %v9386_v12 }
 0xed0   : > { %5967 = vrcp.f32 %v8115_v40 }
 0xed1   : > { %v5958_v46 = vpop.eup %5957  ;;  %v8190_v58 = vpop.f32.mrb[120].mxu0  ;;  %9387 = vst [vmem:[#allocation119_spill] sm:$0xff] %v8195_v24 }
 0xed2   : > { %9384 = vst [vmem:[#allocation116_spill] sm:$0xff] %v8190_v58  ;;  %v8192_v8 = vpop.f32.mrb[121].mxu0  ;;  %v1166_v56 = vpop.xlane.xlu0 %1165  ;;  %v8198_v57 = vmul.f32 %v5958_v46, %v9388_v4 }
 0xed3   : > { %9385 = vst [vmem:[#allocation94_spill] sm:$0xff] %v8192_v8  ;;  %v5960_v9 = vpop.eup %5959  ;;  %5969 = vrcp.f32 %v1166_v56  ;;  %v8200_v20 = vpop.f32.mrb[122].mxu0 }
 0xed4   : > { %9389 = vst [vmem:[#allocation34_spill] sm:$0xff] %v8198_v57  ;;  %9390 = vst [vmem:[#allocation35_spill] sm:$0xff] %v8200_v20  ;;  %v8202_v61 = vpop.f32.mrb[123].mxu0  ;;  %5971 = vrcp.f32 %v1168_v54  ;;  %v2084_v58 = vpop.xlane.xlu1 %2083  ;;  %v8207_v7 = vmul.f32 %v5960_v9, %v7731_v43  ;;  %v9393_v54 = vld [vmem:[#allocation151_spill] sm:$0xff]  ;;  %v9395_v9 = vld [vmem:[#allocation53_spill] sm:$0xff] }
 0xed5   : > { %9391 = vst [vmem:[#allocation61_spill] sm:$0xff] %v8202_v61  ;;  %v5962_v29 = vpop.eup %5961  ;;  %v9399_v57 = vld [vmem:[#allocation52_spill] sm:$0xff] }
 0xed6   : > { %v1170_v8 = vpop.xlane.xlu0 %1169  ;;  %v8210_v12 = vmul.f32 %v5962_v29, %v7735_v63  ;;  %v5964_v14 = vpop.eup %5963 }
 0xed7   : > { %5973 = vrcp.f32 %v1170_v8  ;;  %v8215_v40 = vmul.f32 %v5964_v14, %v7729_v0 }
 0xed8   : > { %5975 = vrcp.f32 %v1622_v53  ;;  %v8220_v43 = vpop.xlane.xlu1 %2537  ;;  %v9397_v53 = vld [vmem:[#allocation55_spill] sm:$0xff] }
 0xed9   : > { %v5966_v56 = vpop.eup %5965  ;;  %9392 = vst [vmem:[#allocation62_spill] sm:$0xff] %v8215_v40 }
 0xeda   : > { %v1624_v4 = vpop.xlane.xlu0 %1623  ;;  %v8218_v20 = vmul.f32 %v5966_v56, %v9393_v54  ;;  %v5968_v61 = vpop.eup %5967 }
 0xedb   : > { %5977 = vrcp.f32 %v1624_v4  ;;  %v8225_v46 = vmul.f32 %v5968_v61, %v9395_v9 }
 0xedc   : > { %9394 = vst [vmem:[#allocation89_spill] sm:$0xff] %v8218_v20  ;;  %5979 = vrcp.f32 %v1626_v55  ;;  %v3442_v4 = vpop.xlane.xlu1 %3441  ;;  %v9401_v55 = vld [vmem:[#allocation54_spill] sm:$0xff] }
 0xedd   : > { %v5970_v8 = vpop.eup %5969  ;;  %9396 = vst [vmem:[#allocation90_spill] sm:$0xff] %v8225_v46 }
 0xede   : > { %v1628_v29 = vpop.xlane.xlu0 %1627  ;;  %v8228_v24 = vmul.f32 %v5970_v8, %v9397_v53  ;;  %v5972_v0 = vpop.eup %5971  ;;  %v9403_v53 = vld [vmem:[#allocation80_spill] sm:$0xff] }
 0xedf   : > { %5981 = vrcp.f32 %v1628_v29  ;;  %v8233_v63 = vmul.f32 %v5972_v0, %v9399_v57 }
 0xee0   : > { %9398 = vst [vmem:[#allocation117_spill] sm:$0xff] %v8228_v24  ;;  %5983 = vrcp.f32 %v2080_v10  ;;  %v9405_v10 = vld [vmem:[#allocation82_spill] sm:$0xff]  ;;  %v3438_v57 = vpop.xlane.xlu1 %3437  ;;  %v9429_v24 = vld [vmem:[#allocation120_spill] sm:$0xff] }
 0xee1   : > { %v5974_v56 = vpop.eup %5973  ;;  %9400 = vst [vmem:[#allocation118_spill] sm:$0xff] %v8233_v63 }
 0xee2   : > { %v2082_v54 = vpop.xlane.xlu0 %2081  ;;  %v8236_v40 = vmul.f32 %v5974_v56, %v9401_v55  ;;  %v5976_v61 = vpop.eup %5975  ;;  %v9407_v55 = vld [vmem:[#allocation79_spill] sm:$0xff] }
 0xee3   : > { %5985 = vrcp.f32 %v2082_v54  ;;  %v8241_v14 = vmul.f32 %v5976_v61, %v9403_v53 }
 0xee4   : > { %9402 = vst [vmem:[#allocation38_spill] sm:$0xff] %v8236_v40  ;;  %5987 = vrcp.f32 %v2084_v58  ;;  %v9409_v58 = vld [vmem:[#allocation81_spill] sm:$0xff]  ;;  %v9411_v40 = vld [vmem:[#allocation108_spill] sm:$0xff] }
 0xee5   : > { %v5978_v9 = vpop.eup %5977  ;;  %9404 = vst [vmem:[#allocation37_spill] sm:$0xff] %v8241_v14 }
 0xee6   : > { %v2086_v29 = vpop.xlane.xlu0 %2085  ;;  %v8244_v20 = vmul.f32 %v5978_v9, %v9405_v10  ;;  %v5980_v46 = vpop.eup %5979 }
 0xee7   : > { %5989 = vrcp.f32 %v2086_v29  ;;  %v8249_v8 = vmul.f32 %v5980_v46, %v9407_v55  ;;  %v3450_v10 = vpop.xlane.xlu1 %3449 }
 0xee8   : > { %9406 = vst [vmem:[#allocation65_spill] sm:$0xff] %v8244_v20  ;;  %5991 = vrcp.f32 %v3442_v4  ;;  %v9413_v4 = vld [vmem:[#allocation110_spill] sm:$0xff] }
 0xee9   : > { %v5982_v56 = vpop.eup %5981  ;;  %9408 = vst [vmem:[#allocation64_spill] sm:$0xff] %v8249_v8  ;;  %v9417_v8 = vld [vmem:[#allocation109_spill] sm:$0xff] }
 0xeea   : > { %v3444_v54 = vpop.xlane.xlu0 %3443  ;;  %v8252_v63 = vmul.f32 %v5982_v56, %v9409_v58  ;;  %v5984_v61 = vpop.eup %5983  ;;  %v9415_v58 = vld [vmem:[#allocation107_spill] sm:$0xff] }
 0xeeb   : > { %5993 = vrcp.f32 %v3444_v54  ;;  %v8257_v0 = vmul.f32 %v5984_v61, %v9411_v40 }
 0xeec   : > { %9410 = vst [vmem:[#allocation93_spill] sm:$0xff] %v8252_v63  ;;  %5995 = vrcp.f32 %v3438_v57  ;;  %v3446_v63 = vpop.xlane.xlu1 %3445 }
 0xeed   : > { %v5986_v53 = vpop.eup %5985  ;;  %9412 = vst [vmem:[#allocation92_spill] sm:$0xff] %v8257_v0 }
 0xeee   : > { %v3440_v29 = vpop.xlane.xlu0 %3439  ;;  %v8260_v14 = vmul.f32 %v5986_v53, %v9413_v4  ;;  %v5988_v46 = vpop.eup %5987 }
 0xeef   : > { %5997 = vrcp.f32 %v3440_v29  ;;  %v8265_v9 = vmul.f32 %v5988_v46, %v9415_v58 }
 0xef0   : > { %9414 = vst [vmem:[#allocation45_spill] sm:$0xff] %v8260_v14  ;;  %5999 = vrcp.f32 %v3450_v10 }
 0xef1   : > { %v5990_v55 = vpop.eup %5989  ;;  %9416 = vst [vmem:[#allocation47_spill] sm:$0xff] %v8265_v9 }
 0xef2   : > { %v3452_v54 = vpop.xlane.xlu0 %3451  ;;  %v8268_v57 = vmul.f32 %v5990_v55, %v9417_v8  ;;  %v5992_v40 = vpop.eup %5991  ;;  %v9427_v8 = vld [vmem:[#allocation122_spill] sm:$0xff] }
 0xef3   : > { %6001 = vrcp.f32 %v3452_v54  ;;  %v8273_v29 = vmul.f32 %v5992_v40, %v8129_v37 }
 0xef4   : > { %9418 = vst [vmem:[#allocation44_spill] sm:$0xff] %v8268_v57  ;;  %6003 = vrcp.f32 %v3446_v63 }
 0xef5   : > { %v5994_v53 = vpop.eup %5993 }
 0xef6   : > { %v3448_v4 = vpop.xlane.xlu0 %3447  ;;  %v8276_v10 = vmul.f32 %v5994_v53, %v8139_v38  ;;  %v5996_v46 = vpop.eup %5995 }
 0xef7   : > { %6005 = vrcp.f32 %v3448_v4  ;;  %v8281_v54 = vmul.f32 %v5996_v46, %v8131_v36 }
 0xef8   : > { %6007 = vrcp.f32 %v8220_v43  ;;  %v9471_v43 = vpack.c.bf16 %v8012_v23, %v8009_v33  ;;  %v9473_v33 = vpack.c.bf16 %v8032_v49, %v8029_v30  ;;  %v9477_v49 = vpack.c.bf16 %v8044_v34, %v8041_v50 }
 0xef9   : > { %v5998_v55 = vpop.eup %5997  ;;  %v9479_v50 = vpack.c.bf16 %v8062_v39, %v8059_v22 }
 0xefa   : > { %v8284_v58 = vmul.f32 %v5998_v55, %v8141_v6  ;;  %v6000_v63 = vpop.eup %5999 }
 0xefb   : > { %v8289_v38 = vmul.f32 %v6000_v63, %v8155_v45  ;;  %v9428_v45 = vld [vmem:[#allocation121_spill] sm:$0xff] }
 0xefc   : > { %v9480_v22 = vpack.c.bf16 %v8284_v58, %v8281_v54 }
 0xefd   : > { %v6002_v40 = vpop.eup %6001  ;;  %9419 = vst [vmem:[#allocation46_spill] sm:$0xff] %v8289_v38 }
 0xefe   : > { %v8292_v53 = vmul.f32 %v6002_v40, %v8165_v27  ;;  %v6004_v4 = vpop.eup %6003 }
 0xeff   : > { %v8297_v46 = vmul.f32 %v6004_v4, %v8157_v28 }
 0xf00   : > { %9420 = vst [vmem:[#allocation72_spill] sm:$0xff] %v8292_v53 }
 0xf01   : > { %v6006_v36 = vpop.eup %6005  ;;  %9421 = vst [vmem:[#allocation74_spill] sm:$0xff] %v8297_v46  ;;  %v9432_v46 = vld [vmem:[#allocation143_spill] sm:$0xff] }
 0xf02   : > { %v8300_v6 = vmul.f32 %v6006_v36, %v8167_v44 }
 0xf03   : > { %v8302_v55 = vpop.f32.mrb[124].mxu0 }
 0xf04   : > { %9422 = vst [vmem:[#allocation71_spill] sm:$0xff] %v8300_v6  ;;  %9423 = vst [vmem:[#allocation73_spill] sm:$0xff] %v8302_v55  ;;  %v8304_v56 = vpop.f32.mrb[125].mxu0  ;;  %v9433_v6 = vld [vmem:[#allocation146_spill] sm:$0xff] }
 0xf05   : > { %9424 = vst [vmem:[#allocation100_spill] sm:$0xff] %v8304_v56  ;;  %v8308_v27 = vpop.f32.mrb[126].mxu0 }
 0xf06   : > { %9425 = vst [vmem:[#allocation102_spill] sm:$0xff] %v8308_v27  ;;  %v8310_v63 = vpop.f32.mrb[127].mxu0 }
 0xf07   : > { %9426 = vst [vmem:[#allocation99_spill] sm:$0xff] %v8310_v63 }
 0xf0b   : > { %v5466_v40 = vpop.f32.mrb[128].mxu0 }
 0xf0c   : > { %v8313_v61 = vadd.f32 %v5466_v40, %v6363_v17  ;;  %v3752_v28 = vpop.f32.mrb[129].mxu0 }
 0xf0d   : > { %v8316_v4 = vadd.f32 %v3752_v28, %v6363_v17  ;;  %v5467_v44 = vpop.f32.mrb[130].mxu0 }
 0xf0e   : > { %3819 = vmax.xlane.f32.xlu1 %v8313_v61  ;;  %v3755_v36 = vpop.f32.mrb[131].mxu0  ;;  %v8323_v9 = vadd.f32 %v5467_v44, %v6363_v17 }
 0xf0f   : > { %3815 = vmax.xlane.f32.xlu0 %v8316_v4  ;;  %v8331_v14 = vadd.f32 %v3755_v36, %v6363_v17 }
 0xf12   : > { %2541 = vadd.xlane.f32.xlu1 %v9427_v8 }
 0xf13   : > { %2539 = vadd.xlane.f32.xlu0 %v9428_v45  ;;  %v5470_v37 = vpop.f32.mrb[132].mxu0 }
 0xf14   : > { %v3768_v40 = vpop.f32.mrb[133].mxu0  ;;  %v8335_v45 = vadd.f32 %v5470_v37, %v6363_v17 }
 0xf15   : > { %v8326_v57 = vadd.f32 %v3768_v40, %v6363_v17  ;;  %v5471_v28 = vpop.f32.mrb[134].mxu0 }
 0xf16   : > { %3821 = vmax.xlane.f32.xlu1 %v8323_v9  ;;  %v3771_v0 = vpop.f32.mrb[135].mxu0  ;;  %v8343_v56 = vadd.f32 %v5471_v28, %v6363_v17 }
 0xf17   : > { %3823 = vmax.xlane.f32.xlu0 %v8326_v57 }
 0xf1a   : > { %3817 = vmax.xlane.f32.xlu1 %v8331_v14 }
 0xf1b   : > { %v5474_v8 = vpop.f32.mrb[136].mxu0 }
 0xf1c   : > { %v3784_v44 = vpop.f32.mrb[137].mxu0  ;;  %v8358_v53 = vadd.f32 %v5474_v8, %v6363_v17 }
 0xf1d   : > { %v8338_v20 = vadd.f32 %v3784_v44, %v6363_v17  ;;  %v5475_v40 = vpop.f32.mrb[138].mxu0  ;;  %v8351_v44 = vadd.f32 %v3771_v0, %v6363_v17 }
 0xf1e   : > { %3827 = vmax.xlane.f32.xlu1 %v8335_v45  ;;  %v3787_v55 = vpop.f32.mrb[139].mxu0  ;;  %v8346_v36 = vadd.f32 %v5475_v40, %v6363_v17 }
 0xf1f   : > { %3831 = vmax.xlane.f32.xlu0 %v8338_v20  ;;  %v8366_v0 = vadd.f32 %v3787_v55, %v6363_v17  ;;  %v9431_v55 = vld [vmem:[#allocation144_spill] sm:$0xff] }
 0xf22   : > { %3829 = vmax.xlane.f32.xlu1 %v8343_v56 }
 0xf23   : > { %3837 = vmax.xlane.f32.xlu0 %v8346_v36  ;;  %v5478_v37 = vpop.f32.mrb[140].mxu0 }
 0xf24   : > { %v3800_v27 = vpop.f32.mrb[141].mxu0 }
 0xf25   : > { %v5479_v63 = vpop.f32.mrb[142].mxu0  ;;  %v8376_v8 = vadd.f32 %v3800_v27, %v6363_v17  ;;  %v9436_v27 = vld [vmem:[#allocation40_spill] sm:$0xff] }
 0xf26   : > { %v8354_v38 = vadd.f32 %v5479_v63, %v6363_v17  ;;  %3825 = vmax.xlane.f32.xlu1 %v8351_v44  ;;  %v3803_v28 = vpop.f32.mrb[143].mxu0  ;;  %v8371_v63 = vadd.f32 %v5478_v37, %v6363_v17  ;;  %v9437_v37 = vld [vmem:[#allocation69_spill] sm:$0xff] }
 0xf27   : > { %v8362_v40 = vadd.f32 %v3803_v28, %v6363_v17  ;;  %v9430_v28 = vld [vmem:[#allocation145_spill] sm:$0xff] }
 0xf28   : > { %3845 = vmax.xlane.f32.xlu0 %v8354_v38  ;;  %v9435_v17 = vld [vmem:[#allocation41_spill] sm:$0xff] }
 0xf2a   : > { %3835 = vmax.xlane.f32.xlu1 %v8358_v53 }
 0xf2c   : > { %3841 = vmax.xlane.f32.xlu0 %v8362_v40 }
 0xf2e   : > { %3833 = vmax.xlane.f32.xlu1 %v8366_v0 }
 0xf30   : > { %2543 = vadd.xlane.f32.xlu0 %v9429_v24  ;;  %v9434_v24 = vld [vmem:[#allocation42_spill] sm:$0xff] }
 0xf32   : > { %3843 = vmax.xlane.f32.xlu1 %v8371_v63 }
 0xf34   : > { %2997 = vadd.xlane.f32.xlu0 %v9430_v28  ;;  %v9438_v28 = vld [vmem:[#allocation43_spill] sm:$0xff] }
 0xf36   : > { %3839 = vmax.xlane.f32.xlu1 %v8376_v8 }
 0xf38   : > { %3001 = vadd.xlane.f32.xlu0 %v9431_v55  ;;  %v9444_v55 = vld [vmem:[#allocation95_spill] sm:$0xff] }
 0xf3a   : > { %2995 = vadd.xlane.f32.xlu1 %v9432_v46  ;;  %v9439_v46 = vld [vmem:[#allocation68_spill] sm:$0xff] }
 0xf3c   : > { %3455 = vadd.xlane.f32.xlu0 %v7916_v16  ;;  %v9440_v16 = vld [vmem:[#allocation67_spill] sm:$0xff] }
 0xf3e   : > { %2999 = vadd.xlane.f32.xlu1 %v9433_v6  ;;  %v9441_v6 = vld [vmem:[#allocation97_spill] sm:$0xff] }
 0xf40   : > { %3459 = vadd.xlane.f32.xlu0 %v7913_v21  ;;  %v9442_v21 = vld [vmem:[#allocation70_spill] sm:$0xff] }
 0xf42   : > { %3453 = vadd.xlane.f32.xlu1 %v7911_v26  ;;  %v9443_v26 = vld [vmem:[#allocation96_spill] sm:$0xff] }
 0xf44   : > { %1173 = vadd.xlane.f32.xlu0 %v9434_v24  ;;  %v9446_v24 = vld [vmem:[#allocation98_spill] sm:$0xff] }
 0xf46   : > { %3457 = vadd.xlane.f32.xlu1 %v7920_v59  ;;  %v9445_v59 = vld [vmem:[#allocation125_spill] sm:$0xff] }
 0xf48   : > { %1177 = vadd.xlane.f32.xlu0 %v9435_v17  ;;  %v9447_v17 = vld [vmem:[#allocation124_spill] sm:$0xff] }
 0xf4a   : > { %1171 = vadd.xlane.f32.xlu1 %v9436_v27  ;;  %v9448_v27 = vld [vmem:[#allocation123_spill] sm:$0xff] }
 0xf4c   : > { %1631 = vadd.xlane.f32.xlu0 %v9437_v37  ;;  %v9449_v37 = vld [vmem:[#allocation149_spill] sm:$0xff] }
 0xf4e   : > { %1175 = vadd.xlane.f32.xlu1 %v9438_v28  ;;  %v9450_v28 = vld [vmem:[#allocation126_spill] sm:$0xff] }
 0xf50   : > { %1635 = vadd.xlane.f32.xlu0 %v9439_v46  ;;  %v9451_v46 = vld [vmem:[#allocation148_spill] sm:$0xff] }
 0xf52   : > { %1629 = vadd.xlane.f32.xlu1 %v9440_v16  ;;  %v9452_v16 = vld [vmem:[#allocation147_spill] sm:$0xff] }
 0xf54   : > { %2089 = vadd.xlane.f32.xlu0 %v9441_v6  ;;  %v9453_v6 = vld [vmem:[#allocation150_spill] sm:$0xff] }
 0xf56   : > { %1633 = vadd.xlane.f32.xlu1 %v9442_v21  ;;  %v9454_v21 = vld [vmem:[#allocation2_spill] sm:$0xff] }
 0xf58   : > { %2093 = vadd.xlane.f32.xlu0 %v9443_v26  ;;  %v9455_v26 = vld [vmem:[#allocation5_spill] sm:$0xff] }
 0xf5a   : > { %2087 = vadd.xlane.f32.xlu1 %v9444_v55  ;;  %v9456_v55 = vld [vmem:[#allocation3_spill] sm:$0xff] }
 0xf5c   : > { %2547 = vadd.xlane.f32.xlu0 %v9445_v59  ;;  %v9457_v59 = vld [vmem:[#allocation7_spill] sm:$0xff] }
 0xf5e   : > { %2091 = vadd.xlane.f32.xlu1 %v9446_v24  ;;  %v9458_v24 = vld [vmem:[#allocation4_spill] sm:$0xff] }
 0xf60   : > { %2551 = vadd.xlane.f32.xlu0 %v9447_v17  ;;  %v9459_v17 = vld [vmem:[#allocation9_spill] sm:$0xff] }
 0xf62   : > { %2545 = vadd.xlane.f32.xlu1 %v9448_v27  ;;  %v9461_v27 = vld [vmem:[#allocation12_spill] sm:$0xff] }
 0xf64   : > { %3005 = vadd.xlane.f32.xlu0 %v9449_v37  ;;  %v9464_v37 = vld [vmem:[#allocation10_spill] sm:$0xff] }
 0xf66   : > { %2549 = vadd.xlane.f32.xlu1 %v9450_v28  ;;  %v9466_v28 = vld [vmem:[#allocation13_spill] sm:$0xff] }
 0xf68   : > { %3009 = vadd.xlane.f32.xlu0 %v9451_v46  ;;  %v9467_v46 = vld [vmem:[#allocation15_spill] sm:$0xff] }
 0xf6a   : > { %3003 = vadd.xlane.f32.xlu1 %v9452_v16  ;;  %v9468_v16 = vld [vmem:[#allocation14_spill] sm:$0xff] }
 0xf6c   : > { %3463 = vadd.xlane.f32.xlu0 %v7970_v35  ;;  %v9460_v35 = vld [vmem:[#allocation6_spill] sm:$0xff] }
 0xf6e   : > { %3007 = vadd.xlane.f32.xlu1 %v9453_v6  ;;  %v9469_v6 = vld [vmem:[#allocation17_spill] sm:$0xff] }
 0xf70   : > { %3467 = vadd.xlane.f32.xlu0 %v7968_v11  ;;  %v9462_v11 = vld [vmem:[#allocation8_spill] sm:$0xff] }
 0xf72   : > { %3461 = vadd.xlane.f32.xlu1 %v7965_v51  ;;  %v9463_v51 = vld [vmem:[#allocation11_spill] sm:$0xff] }
 0xf74   : > { %691 = vadd.xlane.f32.xlu0 %v9454_v21 }
 0xf76   : > { %3465 = vadd.xlane.f32.xlu1 %v7972_v19  ;;  %v9465_v19 = vld [vmem:[#allocation16_spill] sm:$0xff] }
 0xf78   : > { %695 = vadd.xlane.f32.xlu0 %v9455_v26 }
 0xf7a   : > { %689 = vadd.xlane.f32.xlu1 %v9456_v55 }
 0xf7c   : > { %699 = vadd.xlane.f32.xlu0 %v9457_v59 }
 0xf7e   : > { %693 = vadd.xlane.f32.xlu1 %v9458_v24 }
 0xf80   : > { %703 = vadd.xlane.f32.xlu0 %v9459_v17 }
 0xf82   : > { %697 = vadd.xlane.f32.xlu1 %v9460_v35 }
 0xf84   : > { %707 = vadd.xlane.f32.xlu0 %v9461_v27 }
 0xf86   : > { %701 = vadd.xlane.f32.xlu1 %v9462_v11 }
 0xf88   : > { %711 = vadd.xlane.f32.xlu0 %v9463_v51  ;;  %v9470_v51 = vpack.c.bf16 %v8022_v1, %v8019_v47  ;;  %v6008_v47 = vpop.eup %6007 }
 0xf8a   : > { %705 = vadd.xlane.f32.xlu1 %v9464_v37 }
 0xf8c   : > { %715 = vadd.xlane.f32.xlu0 %v9465_v19 }
 0xf8e   : > { %709 = vadd.xlane.f32.xlu1 %v9466_v28 }
 0xf90   : > { %719 = vadd.xlane.f32.xlu0 %v9467_v46  ;;  %v9472_v46 = vpack.c.bf16 %v8052_v41, %v8049_v13  ;;  %v9474_v13 = vpack.c.bf16 %v8073_v62, %v8070_v42  ;;  %v9475_v41 = vld [vmem:[#allocation136_spill] sm:$0xff] }
 0xf92   : > { %713 = vadd.xlane.f32.xlu1 %v9468_v16 }
 0xf96   : > { %717 = vadd.xlane.f32.xlu1 %v9469_v6  ;;  %v8456_v6 = vmul.f32 %v6008_v47, %v9475_v41  ;;  %v9489_v41 = vld [vmem:[#allocation60_spill] sm:$0xff] }
 0xf9b   : > { %v3820_v21 = vpop.xlane.xlu1 %3819 }
 0xf9c   : > { %v3816_v26 = vpop.xlane.xlu0 %3815  ;;  %v3849_v27 = vsub.f32 %v8313_v61, %v3820_v21  ;;  %v9476_v21 = vld [vmem:[#allocation138_spill] sm:$0xff] }
 0xf9d   : > { %v3847_v24 = vsub.f32 %v8316_v4, %v3816_v26 }
 0xf9f   : > { %v8427_v55 = vpop.xlane.xlu1 %2541  ;;  %v3863_v11 = vmul.f32 1.442695, %v3847_v24 }
 0xfa0   : > { %v2540_v59 = vpop.xlane.xlu0 %2539 }
 0xfa1   : > { %6009 = vrcp.f32 %v2540_v59 }
 0xfa2   : > { %6011 = vpow2.f32 %v3863_v11 }
 0xfa3   : > { %v3822_v17 = vpop.xlane.xlu1 %3821 }
 0xfa4   : > { %v3850_v35 = vsub.f32 %v8323_v9, %v3822_v17  ;;  %v3824_v4 = vpop.xlane.xlu0 %3823  ;;  %v3867_v9 = vmul.f32 1.442695, %v3849_v27  ;;  %v9478_v17 = vpack.c.bf16 %v8093_v52, %v8090_v31 }
 0xfa5   : > { %v3851_v16 = vsub.f32 %v8326_v57, %v3824_v4 }
 0xfa6   : > { %4106 = vrot.lane.b32.xlu0 %v9470_v51, %s6207_s30  ;;  %v3869_v37 = vmul.f32 1.442695, %v3850_v35 }
 0xfa7   : > { %v3818_v19 = vpop.xlane.xlu1 %3817  ;;  %4104 = vrot.lane.b32.xlu1 %v9471_v43, %s6207_s30  ;;  %v3871_v62 = vmul.f32 1.442695, %v3851_v16 }
 0xfa8   : > { %v3848_v28 = vsub.f32 %v8331_v14, %v3818_v19  ;;  %6013 = vpow2.f32 %v3869_v37 }
 0xfaa   : > { %v3865_v61 = vmul.f32 1.442695, %v3848_v28  ;;  %4152 = vrot.lane.b32.xlu0 %v9472_v46, %s6208_s6 }
 0xfab   : > { %v3828_v1 = vpop.xlane.xlu1 %3827  ;;  %4128 = vrot.lane.b32.xlu1 %v9473_v33, %s6209_s7  ;;  %v6010_v14 = vpop.eup %6009 }
 0xfac   : > { %6015 = vpow2.f32 %v3865_v61  ;;  %v3832_v23 = vpop.xlane.xlu0 %3831  ;;  %v8459_v26 = vmul.f32 %v6010_v14, %v9476_v21  ;;  %v3853_v42 = vsub.f32 %v8335_v45, %v3828_v1  ;;  %v8477_v34 = vpop.eup %6011  ;;  %v9487_v14 = vld [vmem:[#allocation63_spill] sm:$0xff]  ;;  %v9490_v21 = vld [vmem:[#allocation36_spill] sm:$0xff] }
 0xfad   : > { %6017 = vpow2.f32 %v3867_v9  ;;  %v3855_v51 = vsub.f32 %v8338_v20, %v3832_v23 }
 0xfae   : > { %4176 = vrot.lane.b32.xlu0 %v9474_v13, %s6210_s8  ;;  %v2718_v24 = vpack.c.bf16 %v8459_v26, %v8456_v6  ;;  %v3875_v45 = vmul.f32 1.442695, %v3853_v42  ;;  %6019 = vpow2.f32 %v3871_v62 }
 0xfaf   : > { %v3830_v30 = vpop.xlane.xlu1 %3829  ;;  %4130 = vrot.lane.b32.xlu1 %v9477_v49, %s6209_s7  ;;  %v3879_v54 = vmul.f32 1.442695, %v3855_v51 }
 0xfb0   : > { %v3854_v57 = vsub.f32 %v8343_v56, %v3830_v30  ;;  %v3838_v59 = vpop.xlane.xlu0 %3837 }
 0xfb1   : > { %v3858_v58 = vsub.f32 %v8346_v36, %v3838_v59 }
 0xfb2   : > { %4200 = vrot.lane.b32.xlu0 %v9478_v17, %s6211_s9  ;;  %v3877_v35 = vmul.f32 1.442695, %v3854_v57  ;;  %v8480_v11 = vpop.eup %6013  ;;  %v9492_v17 = vld [vmem:[#allocation91_spill] sm:$0xff] }
 0xfb3   : > { %v3826_v27 = vpop.xlane.xlu1 %3825  ;;  %4154 = vrot.lane.b32.xlu1 %v9479_v50, %s6208_s6  ;;  %v3885_v46 = vmul.f32 1.442695, %v3858_v58  ;;  %v9500_v58 = vld [vmem:[#allocation115_spill] sm:$0xff] }
 0xfb4   : > { %v3852_v56 = vsub.f32 %v8351_v44, %v3826_v27  ;;  %6021 = vpow2.f32 %v3877_v35  ;;  %v9481_v44 = vpack.c.bf16 %v8082_v60, %v8079_v48  ;;  %v9482_v48 = vpack.c.bf16 %v8113_v25, %v8110_v32 }
 0xfb5   : > { %v3846_v37 = vpop.xlane.xlu0 %3845  ;;  %v9484_v25 = vpack.c.bf16 %v8137_v5, %v8134_v18  ;;  %v9486_v5 = vld [vmem:[#allocation88_spill] sm:$0xff]  ;;  %v9493_v35 = vpack.c.bf16 %v8185_v15, %v9492_v17  ;;  %v9497_v15 = vpack.c.bf16 %v8210_v12, %v8207_v7 }
 0xfb6   : > { %v8483_v19 = vpop.eup %6015  ;;  %v3873_v31 = vmul.f32 1.442695, %v3852_v56  ;;  %4224 = vrot.lane.b32.xlu0 %v9480_v22, %s6212_s10  ;;  %v3862_v61 = vsub.f32 %v8354_v38, %v3846_v37  ;;  %v9488_v16 = vpack.c.bf16 %v9486_v5, %v9487_v14  ;;  %v9495_v56 = vld [vmem:[#allocation39_spill] sm:$0xff]  ;;  %v9510_v5 = vld [vmem:[#allocation90_spill] sm:$0xff] }
 0xfb7   : > { %v8489_v39 = vpop.eup %6017  ;;  %v3836_v52 = vpop.xlane.xlu1 %3835  ;;  %4178 = vrot.lane.b32.xlu1 %v9481_v44, %s6210_s8  ;;  %v3927_v20 = vpack.c.bf16 %v8483_v19, %v8477_v34 }
 0xfb8   : > { %6023 = vpow2.f32 %v3873_v31  ;;  %v3857_v43 = vsub.f32 %v8358_v53, %v3836_v52  ;;  %v3928_v4 = vpack.c.bf16 %v8480_v11, %v8489_v39  ;;  %v9483_v53 = vpack.c.bf16 %v8104_v3, %v8101_v2  ;;  %v8521_v38 = vpop.eup %6019  ;;  %v9498_v52 = vld [vmem:[#allocation135_spill] sm:$0xff] }
 0xfb9   : > { %6025 = vpow2.f32 %v3875_v45  ;;  %5496 = vmatprep.mubr.bf16.mxu0 %v3927_v20  ;;  %v3842_v28 = vpop.xlane.xlu0 %3841  ;;  %v9485_v3 = vpack.c.bf16 %v8276_v10, %v8273_v29  ;;  %v9499_v20 = vld [vmem:[#allocation137_spill] sm:$0xff] }
 0xfba   : > { %v3883_v9 = vmul.f32 1.442695, %v3857_v43  ;;  %4108 = vrot.lane.b32.xlu0 %v9482_v48, %s6207_s30  ;;  %5497 = vmatmul.mubr.bf16.vlgmr.msra.gmra.mrb[144].mxu0 %v3928_v4  ;;  %6027 = vrcp.f32 %v8427_v55  ;;  %v3860_v47 = vsub.f32 %v8362_v40, %v3842_v28  ;;  %v9501_v28 = vld [vmem:[#allocation66_spill] sm:$0xff] }
 0xfbb   : > { %v3834_v60 = vpop.xlane.xlu1 %3833  ;;  %4202 = vrot.lane.b32.xlu1 %v9483_v53, %s6211_s9  ;;  %6029 = vpow2.f32 %v3879_v54 }
 0xfbc   : > { %v3856_v36 = vsub.f32 %v8366_v0, %v3834_v60  ;;  %6031 = vpow2.f32 %v3883_v9  ;;  %v3893_v0 = vmul.f32 1.442695, %v3862_v61  ;;  %v3889_v33 = vmul.f32 1.442695, %v3860_v47  ;;  %v9503_v61 = vld [vmem:[#allocation71_spill] sm:$0xff] }
 0xfbd   : > { %v2544_v1 = vpop.xlane.xlu0 %2543  ;;  %v9502_v9 = vpack.c.bf16 %v9500_v58, %v9501_v28  ;;  %v9569_v28 = vld [vmem:[#allocation92_spill] sm:$0xff] }
 0xfbe   : > { %v3881_v32 = vmul.f32 1.442695, %v3856_v36  ;;  %4132 = vrot.lane.b32.xlu0 %v9484_v25, %s6209_s7  ;;  %6033 = vrcp.f32 %v2544_v1  ;;  %v8524_v55 = vpop.eup %6021  ;;  %v9504_v36 = vld [vmem:[#allocation74_spill] sm:$0xff]  ;;  %v9507_v25 = vld [vmem:[#allocation119_spill] sm:$0xff] }
 0xfbf   : > { %v3844_v2 = vpop.xlane.xlu1 %3843  ;;  %4226 = vrot.lane.b32.xlu1 %v9485_v3, %s6212_s10 }
 0xfc0   : > { %6035 = vpow2.f32 %v3881_v32  ;;  %v3861_v40 = vsub.f32 %v8371_v63, %v3844_v2  ;;  %v9491_v63 = vpack.c.bf16 %v9489_v41, %v9490_v21  ;;  %v9506_v32 = vld [vmem:[#allocation34_spill] sm:$0xff] }
 0xfc1   : > { %6037 = vpow2.f32 %v3885_v46  ;;  %v2998_v23 = vpop.xlane.xlu0 %2997  ;;  %v9505_v46 = vpack.c.bf16 %v9503_v61, %v9504_v36  ;;  %v9508_v2 = vpack.c.bf16 %v9506_v32, %v9507_v25  ;;  %v9513_v41 = vld [vmem:[#allocation62_spill] sm:$0xff] }
 0xfc2   : > { %v8526_v18 = vpop.eup %6023  ;;  %4156 = vrot.lane.b32.xlu0 %v9488_v16, %s6208_s6  ;;  %v3891_v10 = vmul.f32 1.442695, %v3861_v40  ;;  %6039 = vpow2.f32 %v3893_v0  ;;  %v9525_v36 = vld [vmem:[#allocation94_spill] sm:$0xff] }
 0xfc3   : > { %v8532_v29 = vpop.eup %6025  ;;  %v3840_v13 = vpop.xlane.xlu1 %3839  ;;  %4110 = vrot.lane.b32.xlu1 %v9491_v63, %s6207_s30  ;;  %v3929_v30 = vpack.c.bf16 %v8526_v18, %v8521_v38  ;;  %6041 = vpow2.f32 %v3889_v33 }
 0xfc4   : > { %v3859_v49 = vsub.f32 %v8376_v8, %v3840_v13  ;;  %v3930_v57 = vpack.c.bf16 %v8524_v55, %v8532_v29  ;;  %v6028_v42 = vpop.eup %6027  ;;  %6043 = vrcp.f32 %v2998_v23  ;;  %v9494_v8 = vld [vmem:[#allocation87_spill] sm:$0xff]  ;;  %v9509_v23 = vld [vmem:[#allocation117_spill] sm:$0xff] }
 0xfc5   : > { %5500 = vmatprep.mubr.bf16.mxu1 %v3929_v30  ;;  %v3002_v59 = vpop.xlane.xlu0 %3001  ;;  %v8547_v27 = vpop.eup %6029  ;;  %6045 = vpow2.f32 %v3891_v10  ;;  %v9496_v45 = vpack.c.bf16 %v9494_v8, %v9495_v56  ;;  %v8562_v44 = vmul.f32 %v6028_v42, %v9498_v52  ;;  %v9511_v14 = vpack.c.bf16 %v9509_v23, %v9510_v5  ;;  %v9512_v13 = vld [vmem:[#allocation89_spill] sm:$0xff]  ;;  %v9516_v42 = vld [vmem:[#allocation155_spill] sm:$0xff]  ;;  %v9517_v56 = vld [vmem:[#allocation72_spill] sm:$0xff] }
 0xfc6   : > { %v3887_v62 = vmul.f32 1.442695, %v3859_v49  ;;  %4180 = vrot.lane.b32.xlu0 %v9493_v35, %s6210_s8  ;;  %5501 = vmatmul.mubr.bf16.vlgmr.msra.gmra.mrb[112].mxu1 %v3930_v57  ;;  %v8553_v51 = vpop.eup %6031  ;;  %v9514_v21 = vpack.c.bf16 %v9512_v13, %v9513_v41  ;;  %v9515_v57 = vld [vmem:[#allocation153_spill] sm:$0xff]  ;;  %v9521_v52 = vld [vmem:[#allocation154_spill] sm:$0xff]  ;;  %v9527_v5 = vld [vmem:[#allocation116_spill] sm:$0xff] }
 0xfc7   : > { %v2996_v50 = vpop.xlane.xlu1 %2995  ;;  %4134 = vrot.lane.b32.xlu1 %v9496_v45, %s6209_s7  ;;  %v9518_v45 = vld [vmem:[#allocation46_spill] sm:$0xff] }
 0xfc8   : > { %6047 = vpow2.f32 %v3887_v62  ;;  %v6034_v37 = vpop.eup %6033 }
 0xfc9   : > { %6049 = vrcp.f32 %v2996_v50  ;;  %v3456_v31 = vpop.xlane.xlu0 %3455  ;;  %v8565_v43 = vmul.f32 %v6034_v37, %v9499_v20  ;;  %v9519_v37 = vpack.c.bf16 %v9517_v56, %v9518_v45 }
 0xfca   : > { %v8555_v22 = vpop.eup %6035  ;;  %6051 = vrcp.f32 %v3002_v59  ;;  %4204 = vrot.lane.b32.xlu0 %v9497_v15, %s6211_s9 }
 0xfcb   : > { %v8567_v4 = vpop.eup %6037  ;;  %v3000_v54 = vpop.xlane.xlu1 %2999  ;;  %4158 = vrot.lane.b32.xlu1 %v9502_v9, %s6208_s6  ;;  %v3931_v48 = vpack.c.bf16 %v8555_v22, %v8547_v27 }
 0xfcc   : > { %6053 = vrcp.f32 %v3000_v54  ;;  %v3932_v7 = vpack.c.bf16 %v8567_v4, %v8553_v51  ;;  %v8579_v53 = vpop.eup %6039 }
 0xfcd   : > { %5504 = vmatprep.mubr.bf16.mxu1 %v3931_v48  ;;  %v3460_v60 = vpop.xlane.xlu0 %3459  ;;  %6055 = vrcp.f32 %v3456_v31  ;;  %v8585_v47 = vpop.eup %6041  ;;  %v9520_v31 = vld [vmem:[#allocation152_spill] sm:$0xff] }
 0xfce   : > { %4228 = vrot.lane.b32.xlu0 %v9505_v46, %s6212_s10  ;;  %5505 = vmatmul.mubr.bf16.gmra.mrb[116].mxu1 %v3932_v7  ;;  %v6044_v3 = vpop.eup %6043  ;;  %v9522_v7 = vld [vmem:[#allocation38_spill] sm:$0xff] }
 0xfcf   : > { %v3454_v1 = vpop.xlane.xlu1 %3453  ;;  %4182 = vrot.lane.b32.xlu1 %v9508_v2, %s6210_s8  ;;  %v8591_v0 = vpop.eup %6045  ;;  %v8611_v62 = vmul.f32 %v6044_v3, %v9516_v42  ;;  %v9530_v42 = vld [vmem:[#allocation59_spill] sm:$0xff] }
 0xfd0   : > { %6057 = vrcp.f32 %v3454_v1  ;;  %v3934_v49 = vpack.c.bf16 %v8579_v53, %v8591_v0  ;;  %v9526_v1 = vld [vmem:[#allocation61_spill] sm:$0xff] }
 0xfd1   : > { %v1174_v40 = vpop.xlane.xlu0 %1173  ;;  %6059 = vrcp.f32 %v3460_v60  ;;  %v9523_v60 = vld [vmem:[#allocation118_spill] sm:$0xff] }
 0xfd2   : > { %v8593_v33 = vpop.eup %6047  ;;  %4112 = vrot.lane.b32.xlu0 %v9511_v14, %s6207_s30  ;;  %v9524_v61 = vpack.c.bf16 %v9522_v7, %v9523_v60 }
 0xfd3   : > { %v6050_v16 = vpop.eup %6049  ;;  %v3458_v10 = vpop.xlane.xlu1 %3457  ;;  %4206 = vrot.lane.b32.xlu1 %v9514_v21, %s6211_s9  ;;  %v3933_v63 = vpack.c.bf16 %v8585_v47, %v8593_v33 }
 0xfd4   : > { %v6052_v30 = vpop.eup %6051  ;;  %6061 = vrcp.f32 %v3458_v10  ;;  %v8608_v59 = vmul.f32 %v6050_v16, %v9515_v57  ;;  %v9528_v16 = vld [vmem:[#allocation35_spill] sm:$0xff] }
 0xfd5   : > { %5508 = vmatprep.mubr.bf16.mxu1 %v3933_v63  ;;  %v1178_v17 = vpop.xlane.xlu0 %1177  ;;  %6063 = vrcp.f32 %v1174_v40  ;;  %v8623_v20 = vmul.f32 %v6052_v30, %v9521_v52 }
 0xfd6   : > { %v6054_v35 = vpop.eup %6053  ;;  %5509 = vmatmul.mubr.bf16.gmra.mrb[120].mxu1 %v3934_v49  ;;  %v3176_v50 = vpack.c.bf16 %v8611_v62, %v8608_v59  ;;  %v9529_v49 = vld [vmem:[#allocation57_spill] sm:$0xff] }
 0xfd7   : > { %v1172_v8 = vpop.xlane.xlu1 %1171  ;;  %4230 = vrot.lane.b32.xlu1 %v9519_v37, %s6212_s10  ;;  %v8620_v15 = vmul.f32 %v6054_v35, %v9520_v31  ;;  %v6056_v54 = vpop.eup %6055  ;;  %v9531_v31 = vld [vmem:[#allocation56_spill] sm:$0xff] }
 0xfd8   : > { %6065 = vrcp.f32 %v1172_v8  ;;  %v8635_v32 = vmul.f32 %v6056_v54, %v9526_v1  ;;  %v9532_v54 = vld [vmem:[#allocation58_spill] sm:$0xff] }
 0xfd9   : > { %v1632_v58 = vpop.xlane.xlu0 %1631  ;;  %6067 = vrcp.f32 %v1178_v17 }
 0xfda   : > { %v6058_v9 = vpop.eup %6057 }
 0xfdb   : > { %v1176_v48 = vpop.xlane.xlu1 %1175  ;;  %4114 = vrot.lane.b32.xlu1 %v9524_v61, %s6207_s30  ;;  %v8632_v46 = vmul.f32 %v6058_v9, %v9525_v36  ;;  %v6060_v25 = vpop.eup %6059  ;;  %v9533_v36 = vld [vmem:[#allocation84_spill] sm:$0xff] }
 0xfdc   : > { %6069 = vrcp.f32 %v1176_v48  ;;  %v8643_v10 = vmul.f32 %v6060_v25, %v9528_v16  ;;  %v9534_v25 = vld [vmem:[#allocation86_spill] sm:$0xff] }
 0xfdd   : > { %v1636_v2 = vpop.xlane.xlu0 %1635  ;;  %v3634_v3 = vpack.c.bf16 %v8635_v32, %v8632_v46  ;;  %6071 = vrcp.f32 %v1632_v58  ;;  %v9583_v46 = vpack.c.bf16 %v8623_v20, %v8620_v15 }
 0xfde   : > { %v6062_v40 = vpop.eup %6061 }
 0xfdf   : > { %v1630_v23 = vpop.xlane.xlu1 %1629  ;;  %v8640_v14 = vmul.f32 %v6062_v40, %v9527_v5  ;;  %v6064_v13 = vpop.eup %6063 }
 0xfe0   : > { %6073 = vrcp.f32 %v1630_v23  ;;  %v8651_v17 = vmul.f32 %v6064_v13, %v9530_v42 }
 0xfe1   : > { %v2090_v41 = vpop.xlane.xlu0 %2089  ;;  %6075 = vrcp.f32 %v1636_v2 }
 0xfe2   : > { %v6066_v63 = vpop.eup %6065 }
 0xfe3   : > { %v1634_v30 = vpop.xlane.xlu1 %1633  ;;  %v8648_v57 = vmul.f32 %v6066_v63, %v9529_v49  ;;  %v6068_v35 = vpop.eup %6067 }
 0xfe4   : > { %6077 = vrcp.f32 %v1634_v30  ;;  %v8659_v58 = vmul.f32 %v6068_v35, %v9532_v54  ;;  %v9536_v30 = vld [vmem:[#allocation85_spill] sm:$0xff]  ;;  %v9537_v54 = vld [vmem:[#allocation112_spill] sm:$0xff] }
 0xfe5   : > { %v2094_v8 = vpop.xlane.xlu0 %2093  ;;  %6079 = vrcp.f32 %v2090_v41  ;;  %v9535_v41 = vld [vmem:[#allocation83_spill] sm:$0xff] }
 0xfe6   : > { %v6070_v45 = vpop.eup %6069 }
 0xfe7   : > { %v2088_v37 = vpop.xlane.xlu1 %2087  ;;  %v8656_v52 = vmul.f32 %v6070_v45, %v9531_v31  ;;  %v6072_v9 = vpop.eup %6071 }
 0xfe8   : > { %6081 = vrcp.f32 %v2088_v37  ;;  %v8667_v2 = vmul.f32 %v6072_v9, %v9534_v25  ;;  %v9539_v25 = vld [vmem:[#allocation142_spill] sm:$0xff] }
 0xfe9   : > { %6083 = vrcp.f32 %v2094_v8  ;;  %v2548_v48 = vpop.xlane.xlu0 %2547 }
 0xfea   : > { %v6074_v60 = vpop.eup %6073  ;;  %6085 = vrcp.f32 %v2548_v48  ;;  %v9538_v48 = vld [vmem:[#allocation114_spill] sm:$0xff] }
 0xfeb   : > { %v2092_v61 = vpop.xlane.xlu1 %2091  ;;  %v8664_v1 = vmul.f32 %v6074_v60, %v9533_v36  ;;  %v6076_v40 = vpop.eup %6075 }
 0xfec   : > { %6087 = vrcp.f32 %v2092_v61  ;;  %v8675_v49 = vmul.f32 %v6076_v40, %v9536_v30  ;;  %v9541_v30 = vld [vmem:[#allocation113_spill] sm:$0xff] }
 0xfed   : > { %v2552_v23 = vpop.xlane.xlu0 %2551 }
 0xfee   : > { %v6078_v16 = vpop.eup %6077  ;;  %6089 = vrcp.f32 %v2552_v23 }
 0xfef   : > { %v2546_v13 = vpop.xlane.xlu1 %2545  ;;  %v8672_v63 = vmul.f32 %v6078_v16, %v9535_v41  ;;  %v6080_v42 = vpop.eup %6079 }
 0xff0   : > { %6091 = vrcp.f32 %v2546_v13  ;;  %v8684_v60 = vmul.f32 %v6080_v42, %v9538_v48  ;;  %v9540_v13 = vld [vmem:[#allocation111_spill] sm:$0xff] }
 0xff1   : > { %3901 = vadd.xlane.f32.xlu0 %v8480_v11  ;;  %v3006_v35 = vpop.xlane.xlu0 %3005 }
 0xff2   : > { %v6082_v45 = vpop.eup %6081  ;;  %6093 = vrcp.f32 %v3006_v35 }
 0xff3   : > { %v6084_v37 = vpop.eup %6083  ;;  %v2550_v31 = vpop.xlane.xlu1 %2549  ;;  %v8681_v9 = vmul.f32 %v6082_v45, %v9537_v54 }
 0xff4   : > { %v6086_v61 = vpop.eup %6085  ;;  %6095 = vrcp.f32 %v2550_v31  ;;  %v8696_v42 = vmul.f32 %v6084_v37, %v9541_v30  ;;  %v9542_v31 = vld [vmem:[#allocation141_spill] sm:$0xff] }
 0xff5   : > { %3897 = vadd.xlane.f32.xlu0 %v8483_v19  ;;  %v3010_v36 = vpop.xlane.xlu0 %3009  ;;  %v8690_v40 = vmul.f32 %v6086_v61, %v9539_v25 }
 0xff6   : > { %v6088_v23 = vpop.eup %6087  ;;  %6097 = vrcp.f32 %v3010_v36  ;;  %v9543_v36 = vld [vmem:[#allocation140_spill] sm:$0xff] }
 0xff7   : > { %v3004_v16 = vpop.xlane.xlu1 %3003  ;;  %v8693_v41 = vmul.f32 %v6088_v23, %v9540_v13 }
 0xff8   : > { %v6090_v35 = vpop.eup %6089  ;;  %6099 = vrcp.f32 %v3004_v16  ;;  %v9544_v16 = vld [vmem:[#allocation159_spill] sm:$0xff] }
 0xff9   : > { %3909 = vadd.xlane.f32.xlu0 %v8524_v55  ;;  %v3464_v19 = vpop.xlane.xlu0 %3463  ;;  %v8702_v54 = vmul.f32 %v6090_v35, %v9542_v31 }
 0xffa   : > { %v6092_v48 = vpop.eup %6091  ;;  %6101 = vrcp.f32 %v3464_v19  ;;  %v9545_v19 = vld [vmem:[#allocation139_spill] sm:$0xff] }
 0xffb   : > { %v3008_v61 = vpop.xlane.xlu1 %3007  ;;  %v8705_v25 = vmul.f32 %v6092_v48, %v9543_v36  ;;  %v9546_v36 = vld [vmem:[#allocation158_spill] sm:$0xff] }
 0xffc   : > { %v6094_v23 = vpop.eup %6093  ;;  %6103 = vrcp.f32 %v3008_v61 }
 0xffd   : > { %3905 = vadd.xlane.f32.xlu0 %v8526_v18  ;;  %v3468_v37 = vpop.xlane.xlu0 %3467  ;;  %v8711_v13 = vmul.f32 %v6094_v23, %v9544_v16 }
 0xffe   : > { %v6096_v30 = vpop.eup %6095  ;;  %6105 = vrcp.f32 %v3468_v37 }
 0xfff   : > { %v3462_v35 = vpop.xlane.xlu1 %3461  ;;  %3899 = vadd.xlane.f32.xlu1 %v8489_v39  ;;  %v8715_v31 = vmul.f32 %v6096_v30, %v9545_v19  ;;  %v9547_v39 = vld [vmem:[#allocation157_spill] sm:$0xff]  ;;  %v9548_v19 = vld [vmem:[#allocation99_spill] sm:$0xff] }
0x1000   : > { %v6098_v48 = vpop.eup %6097  ;;  %6107 = vrcp.f32 %v3462_v35 }
0x1001   : > { %3917 = vadd.xlane.f32.xlu0 %v8567_v4  ;;  %v692_v18 = vpop.xlane.xlu0 %691  ;;  %v8721_v55 = vmul.f32 %v6098_v48, %v9546_v36 }
0x1002   : > { %v6100_v23 = vpop.eup %6099  ;;  %6109 = vrcp.f32 %v692_v18 }
0x1003   : > { %v3466_v37 = vpop.xlane.xlu1 %3465  ;;  %3895 = vadd.xlane.f32.xlu1 %v8477_v34  ;;  %v8725_v16 = vmul.f32 %v6100_v23, %v9547_v39  ;;  %v9549_v34 = vld [vmem:[#allocation156_spill] sm:$0xff]  ;;  %v9550_v39 = vld [vmem:[#allocation102_spill] sm:$0xff] }
0x1004   : > { %v6102_v30 = vpop.eup %6101  ;;  %6111 = vrcp.f32 %v3466_v37 }
0x1005   : > { %3913 = vadd.xlane.f32.xlu0 %v8555_v22  ;;  %v696_v4 = vpop.xlane.xlu0 %695  ;;  %v8731_v61 = vmul.f32 %v6102_v30, %v9548_v19 }
0x1006   : > { %v6104_v48 = vpop.eup %6103  ;;  %6113 = vrcp.f32 %v696_v4 }
0x1007   : > { %v690_v18 = vpop.xlane.xlu1 %689  ;;  %3907 = vadd.xlane.f32.xlu1 %v8532_v29  ;;  %v8735_v36 = vmul.f32 %v6104_v48, %v9549_v34  ;;  %v9551_v29 = vld [vmem:[#allocation100_spill] sm:$0xff] }
0x1008   : > { %v6106_v23 = vpop.eup %6105  ;;  %6115 = vrcp.f32 %v690_v18  ;;  %v9552_v18 = vld [vmem:[#allocation21_spill] sm:$0xff] }
0x1009   : > { %3925 = vadd.xlane.f32.xlu0 %v8579_v53  ;;  %v700_v22 = vpop.xlane.xlu0 %699  ;;  %v8741_v35 = vmul.f32 %v6106_v23, %v9550_v39 }
0x100a   : > { %v6108_v30 = vpop.eup %6107  ;;  %6117 = vrcp.f32 %v700_v22 }
0x100b   : > { %v694_v4 = vpop.xlane.xlu1 %693  ;;  %3903 = vadd.xlane.f32.xlu1 %v8521_v38  ;;  %v8745_v19 = vmul.f32 %v6108_v30, %v9551_v29  ;;  %v9553_v38 = vld [vmem:[#allocation73_spill] sm:$0xff]  ;;  %v9554_v29 = vld [vmem:[#allocation20_spill] sm:$0xff] }
0x100c   : > { %v6110_v48 = vpop.eup %6109  ;;  %6119 = vrcp.f32 %v694_v4 }
0x100d   : > { %3921 = vadd.xlane.f32.xlu0 %v8585_v47  ;;  %v704_v53 = vpop.xlane.xlu0 %703  ;;  %v8749_v34 = vmul.f32 %v6110_v48, %v9552_v18 }
0x100e   : > { %v6112_v39 = vpop.eup %6111  ;;  %6121 = vrcp.f32 %v704_v53  ;;  %v9555_v53 = vld [vmem:[#allocation19_spill] sm:$0xff] }
0x100f   : > { %v698_v22 = vpop.xlane.xlu1 %697  ;;  %3915 = vadd.xlane.f32.xlu1 %v8553_v51  ;;  %v8755_v37 = vmul.f32 %v6112_v39, %v9553_v38  ;;  %v9556_v38 = vld [vmem:[#allocation25_spill] sm:$0xff] }
0x1010   : > { %v6114_v30 = vpop.eup %6113  ;;  %6123 = vrcp.f32 %v698_v22 }
0x1011   : > { %v708_v4 = vpop.xlane.xlu0 %707  ;;  %v869_v47 = vmul.f32 %v6114_v30, %v9554_v29  ;;  %v9557_v29 = vld [vmem:[#allocation18_spill] sm:$0xff] }
0x1012   : > { %v6116_v18 = vpop.eup %6115  ;;  %6125 = vrcp.f32 %v708_v4 }
0x1013   : > { %v702_v45 = vpop.xlane.xlu1 %701  ;;  %3911 = vadd.xlane.f32.xlu1 %v8547_v27  ;;  %v866_v23 = vmul.f32 %v6116_v18, %v9555_v53  ;;  %v9558_v18 = vld [vmem:[#allocation24_spill] sm:$0xff] }
0x1014   : > { %v6118_v8 = vpop.eup %6117  ;;  %6127 = vrcp.f32 %v702_v45 }
0x1015   : > { %v712_v51 = vpop.xlane.xlu0 %711  ;;  %v882_v39 = vpack.c.bf16 %v8749_v34, %v866_v23  ;;  %v8764_v22 = vmul.f32 %v6118_v8, %v9556_v38  ;;  %v9559_v8 = vld [vmem:[#allocation23_spill] sm:$0xff]  ;;  %v9560_v38 = vld [vmem:[#allocation29_spill] sm:$0xff] }
0x1016   : > { %v6120_v7 = vpop.eup %6119  ;;  %6129 = vrcp.f32 %v712_v51 }
0x1017   : > { %v706_v30 = vpop.xlane.xlu1 %705  ;;  %3923 = vadd.xlane.f32.xlu1 %v8591_v0  ;;  %v868_v4 = vmul.f32 %v6120_v7, %v9557_v29  ;;  %v9561_v29 = vld [vmem:[#allocation22_spill] sm:$0xff] }
0x1018   : > { %v6122_v48 = vpop.eup %6121  ;;  %6131 = vrcp.f32 %v706_v30 }
0x1019   : > { %v716_v27 = vpop.xlane.xlu0 %715  ;;  %v883_v11 = vpack.c.bf16 %v869_v47, %v868_v4  ;;  %v8769_v53 = vmul.f32 %v6122_v48, %v9558_v18 }
0x101a   : > { %v6124_v45 = vpop.eup %6123  ;;  %6133 = vrcp.f32 %v716_v27 }
0x101b   : > { %v710_v34 = vpop.xlane.xlu1 %709  ;;  %3919 = vadd.xlane.f32.xlu1 %v8593_v33  ;;  %v8773_v23 = vmul.f32 %v6124_v45, %v9559_v8  ;;  %v9562_v45 = vld [vmem:[#allocation28_spill] sm:$0xff] }
0x101c   : > { %v6126_v51 = vpop.eup %6125  ;;  %6135 = vrcp.f32 %v710_v34 }
0x101d   : > { %v720_v0 = vpop.xlane.xlu0 %719  ;;  %v884_v7 = vpack.c.bf16 %v8764_v22, %v8773_v23  ;;  %v8778_v30 = vmul.f32 %v6126_v51, %v9560_v38  ;;  %v9563_v51 = vld [vmem:[#allocation65_spill] sm:$0xff] }
0x101e   : > { %v6128_v47 = vpop.eup %6127  ;;  %6137 = vrcp.f32 %v720_v0  ;;  %v9564_v0 = vld [vmem:[#allocation37_spill] sm:$0xff] }
0x101f   : > { %v714_v48 = vpop.xlane.xlu1 %713  ;;  %v8781_v4 = vmul.f32 %v6128_v47, %v9561_v29  ;;  %v9565_v38 = vpack.c.bf16 %v9563_v51, %v9564_v0  ;;  %v9566_v47 = vld [vmem:[#allocation27_spill] sm:$0xff]  ;;  %v9571_v51 = vld [vmem:[#allocation26_spill] sm:$0xff] }
0x1020   : > { %v6130_v27 = vpop.eup %6129  ;;  %6139 = vrcp.f32 %v714_v48 }
0x1021   : > { %v4107_v33 = vpop.permute.xlu0 %4106  ;;  %v8786_v34 = vmul.f32 %v6130_v27, %v9562_v45  ;;  %v9567_v27 = vld [vmem:[#allocation33_spill] sm:$0xff] }
0x1022   : > { %v6132_v8 = vpop.eup %6131  ;;  %v4269_v22 = vsel %vm463_vm1, %v883_v11, %v4107_v33  ;;  %v9568_v33 = vld [vmem:[#allocation45_spill] sm:$0xff] }
0x1023   : > { %v718_v23 = vpop.xlane.xlu1 %717  ;;  %4136 = vrot.lane.b32.xlu0 %v9565_v38, %s6209_s7  ;;  %v8794_v29 = vmul.f32 %v6132_v8, %v9566_v47  ;;  %v9570_v56 = vpack.c.bf16 %v9568_v33, %v9569_v28  ;;  %v9573_v28 = vld [vmem:[#allocation31_spill] sm:$0xff] }
0x1024   : > { %v6134_v48 = vpop.eup %6133  ;;  %6141 = vrcp.f32 %v718_v23 }
0x1025   : > { %v4153_v21 = vpop.permute.xlu0 %4152  ;;  %v8799_v45 = vmul.f32 %v6134_v48, %v9567_v27  ;;  %v9572_v48 = vld [vmem:[#allocation32_spill] sm:$0xff] }
0x1026   : > { %v6136_v5 = vpop.eup %6135 }
0x1027   : > { %v4105_v11 = vpop.permute.xlu1 %4104  ;;  %4160 = vrot.lane.b32.xlu0 %v9570_v56, %s6208_s6  ;;  %v8806_v0 = vmul.f32 %v6136_v5, %v9571_v51 }
0x1028   : > { %v6138_v8 = vpop.eup %6137  ;;  %v4266_v23 = vsel %vm463_vm1, %v882_v39, %v4105_v11  ;;  %v9574_v39 = vld [vmem:[#allocation93_spill] sm:$0xff]  ;;  %v9575_v11 = vld [vmem:[#allocation64_spill] sm:$0xff] }
0x1029   : > { %v4177_v38 = vpop.permute.xlu0 %4176  ;;  %v887_v47 = vpack.c.bf16 %v8786_v34, %v8806_v0  ;;  %v8812_v27 = vmul.f32 %v6138_v8, %v9572_v48  ;;  %v9576_v33 = vpack.c.bf16 %v9574_v39, %v9575_v11 }
0x102a   : > { %v6140_v18 = vpop.eup %6139 }
0x102b   : > { %v4129_v12 = vpop.permute.xlu1 %4128  ;;  %4184 = vrot.lane.b32.xlu0 %v2718_v24, %s6210_s8  ;;  %v8819_v56 = vmul.f32 %v6140_v18, %v9573_v28  ;;  %v9578_v28 = vld [vmem:[#allocation44_spill] sm:$0xff] }
0x102c   : > { %v4290_v5 = vsel %vm4288_vm3, %v4266_v23, %v4129_v12  ;;  %4138 = vrot.lane.b32.xlu1 %v9576_v33, %s6209_s7  ;;  %v9577_v12 = vld [vmem:[#allocation30_spill] sm:$0xff] }
0x102d   : > { %v4307_v51 = vsel %vm4305_vm4, %v4290_v5, %v4153_v21  ;;  %v4201_v8 = vpop.permute.xlu0 %4200  ;;  %v888_v48 = vpack.c.bf16 %v8799_v45, %v8819_v56  ;;  %v9579_v5 = vld [vmem:[#allocation47_spill] sm:$0xff] }
0x102e   : > { %v6142_v6 = vpop.eup %6141  ;;  %v4324_v26 = vsel %vm4322_vm5, %v4307_v51, %v4177_v38  ;;  %v9580_v39 = vpack.c.bf16 %v9578_v28, %v9579_v5 }
0x102f   : > { %v4341_v24 = vsel %vm4339_vm6, %v4324_v26, %v4201_v8  ;;  %v4131_v18 = vpop.permute.xlu1 %4130  ;;  %4208 = vrot.lane.b32.xlu0 %v3176_v50, %s6211_s9  ;;  %v8836_v23 = vmul.f32 %v6142_v6, %v9577_v12  ;;  %v9581_v50 = vpack.c.bf16 %v8565_v43, %v8562_v44  ;;  %v9582_v6 = vpack.c.bf16 %v8651_v17, %v8648_v57 }
0x1030   : > { %v4292_v21 = vsel %vm4288_vm3, %v4269_v22, %v4131_v18  ;;  %4162 = vrot.lane.b32.xlu1 %v9580_v39, %s6208_s6  ;;  %v9585_v57 = vpack.c.bf16 %v8643_v10, %v8640_v14  ;;  %v9588_v12 = vpack.c.bf16 %v8769_v53, %v8781_v4  ;;  %v5661_v53 = vld [vmem:[%s9060_s3] sm:$0xff]  }
0x1031   : > { %v4225_v38 = vpop.permute.xlu0 %4224  ;;  %v889_v11 = vpack.c.bf16 %v8812_v27, %v8836_v23  ;;  %5512 = vmatprep.subr.bf16.mxu1 %v5661_v53 }
0x1032   : > { %v8846_v33 = vsel %vm4356_vm7, %v4341_v24, %v4225_v38  ;;  %v9586_v24 = vpack.c.bf16 %v8684_v60, %v8681_v9  ;;  %v9589_v9 = vpack.c.bf16 %v8675_v49, %v8672_v63  ;;  %v5662_v63 = vld [vmem:[%s9060_s3 + $0x8] sm:$0xff]   ;;  %5513 = vmatpush3.bf16.msra.mxu1 %v5661_v53 }
0x1033   : > { %v4155_v59 = vpop.permute.xlu1 %4154  ;;  %4232 = vrot.lane.b32.xlu0 %v3634_v3, %s6212_s10  ;;  %v9584_v3 = vpack.c.bf16 %v8667_v2, %v8664_v1  ;;  %v9587_v1 = vpack.c.bf16 %v8659_v58, %v8656_v52  ;;  %v9590_v58 = vpack.c.bf16 %v8696_v42, %v8693_v41  ;;  %5514 = vmatprep.subr.bf16.mxu1 %v5662_v63 }
0x1034   : > { %v4309_v62 = vsel %vm4305_vm4, %v4292_v21, %v4155_v59  ;;  %4186 = vrot.lane.b32.xlu1 %v9581_v50, %s6210_s8  ;;  %v9591_v41 = vpack.c.bf16 %v8778_v30, %v8794_v29 }
0x1035   : > { %v4109_v22 = vpop.permute.xlu0 %4108 }
0x1036   : > { %v4272_v51 = vsel %vm463_vm1, %v884_v7, %v4109_v22  ;;  %5515 = vmatpush3.bf16.msra.mxu1 %v5662_v63 }
0x1037   : > { %v4179_v8 = vpop.permute.xlu1 %4178  ;;  %4116 = vrot.lane.b32.xlu0 %v9582_v6, %s6207_s30 }
0x1038   : > { %v4326_v26 = vsel %vm4322_vm5, %v4309_v62, %v4179_v8  ;;  %4210 = vrot.lane.b32.xlu1 %v9583_v46, %s6211_s9 }
0x1039   : > { %v4133_v32 = vpop.permute.xlu0 %4132 }
0x103a   : > { %v4294_v44 = vsel %vm4288_vm3, %v4272_v51, %v4133_v32 }
0x103b   : > { %v4203_v43 = vpop.permute.xlu1 %4202  ;;  %4140 = vrot.lane.b32.xlu0 %v9584_v3, %s6209_s7 }
0x103c   : > { %v4343_v7 = vsel %vm4339_vm6, %v4326_v26, %v4203_v43  ;;  %4234 = vrot.lane.b32.xlu1 %v9585_v57, %s6212_s10 }
0x103d   : > { %v4157_v17 = vpop.permute.xlu0 %4156 }
0x103e   : > { %v4311_v15 = vsel %vm4305_vm4, %v4294_v44, %v4157_v17 }
0x103f   : > { %v4227_v20 = vpop.permute.xlu1 %4226  ;;  %4164 = vrot.lane.b32.xlu0 %v9586_v24, %s6208_s6 }
0x1040   : > { %v8883_v18 = vsel %vm4356_vm7, %v4343_v7, %v4227_v20  ;;  %4118 = vrot.lane.b32.xlu1 %v9587_v1, %s6207_s30 }
0x1041   : > { %v4181_v2 = vpop.permute.xlu0 %4180 }
0x1042   : > { %v4328_v14 = vsel %vm4322_vm5, %v4311_v15, %v4181_v2 }
0x1043   : > { %v4111_v10 = vpop.permute.xlu1 %4110 }
0x1044   : > { %v4275_v21 = vsel %vm463_vm1, %v9588_v12, %v4111_v10  ;;  %4142 = vrot.lane.b32.xlu1 %v9589_v9, %s6209_s7 }
0x1045   : > { %v4205_v60 = vpop.permute.xlu0 %4204 }
0x1046   : > { %v4345_v28 = vsel %vm4339_vm6, %v4328_v14, %v4205_v60 }
0x1047   : > { %v4135_v5 = vpop.permute.xlu1 %4134 }
0x1048   : > { %v4296_v52 = vsel %vm4288_vm3, %v4275_v21, %v4135_v5  ;;  %4166 = vrot.lane.b32.xlu1 %v9590_v58, %s6208_s6 }
0x1049   : > { %v4229_v39 = vpop.permute.xlu0 %4228 }
0x104a   : > { %v8911_v49 = vsel %vm4356_vm7, %v4345_v28, %v4229_v39 }
0x104b   : > { %v4159_v4 = vpop.permute.xlu1 %4158 }
0x104c   : > { %v4313_v38 = vsel %vm4305_vm4, %v4296_v52, %v4159_v4 }
0x104d   : > { %v4113_v59 = vpop.permute.xlu0 %4112 }
0x104e   : > { %v8918_v42 = vsel %vm463_vm1, %v9591_v41, %v4113_v59 }
0x104f   : > { %v4183_v62 = vpop.permute.xlu1 %4182 }
0x1050   : > { %v4330_v50 = vsel %vm4322_vm5, %v4313_v38, %v4183_v62 }
0x1053   : > { %v4207_v22 = vpop.permute.xlu1 %4206 }
0x1054   : > { %v4347_v51 = vsel %vm4339_vm6, %v4330_v50, %v4207_v22  ;;  %v9592_v50 = vpack.c.bf16 %v8702_v54, %v8715_v31 }
0x1057   : > { %v4231_v8 = vpop.permute.xlu1 %4230 }
0x1058   : > { %v8923_v6 = vsel %vm4356_vm7, %v4347_v51, %v4231_v8 }
0x105b   : > { %v4115_v26 = vpop.permute.xlu1 %4114 }
0x105c   : > { %v8929_v30 = vsel %vm463_vm1, %v887_v47, %v4115_v26 }
0x107e   : > { %v3902_v29 = vpop.xlane.xlu0 %3901 }
0x107f   : > { %6143 = vrcp.f32 %v3902_v29 }
0x1082   : > { %v3898_v46 = vpop.xlane.xlu0 %3897 }
0x1086   : > { %v3910_v32 = vpop.xlane.xlu0 %3909 }
0x1089   : > { %v6144_v0 = vpop.eup %6143 }
0x108a   : > { %v3906_v43 = vpop.xlane.xlu0 %3905 }
0x108c   : > { %v3900_v44 = vpop.xlane.xlu1 %3899 }
0x108d   : > { %6145 = vrcp.f32 %v3900_v44  ;;  %v5498_v3 = vpop.f32.mrb[144].mxu0 }
0x108e   : > { %v3993_v7 = vpop.f32.mrb[145].mxu0  ;;  %6147 = vrcp.f32 %v3898_v46  ;;  %v3918_v20 = vpop.xlane.xlu0 %3917 }
0x108f   : > { %v5499_v57 = vpop.f32.mrb[146].mxu0 }
0x1090   : > { %v3896_v17 = vpop.xlane.xlu1 %3895  ;;  %v3996_v15 = vpop.f32.mrb[147].mxu0  ;;  %v4075_v1 = vmul.f32 %v6144_v0, %v5499_v57  ;;  %v9594_v0 = vpack.c.bf16 %v8721_v55, %v8735_v36 }
0x1091   : > { %6149 = vrcp.f32 %v3896_v17 }
0x1092   : > { %6151 = vrcp.f32 %v3910_v32  ;;  %v3914_v14 = vpop.xlane.xlu0 %3913 }
0x1094   : > { %v3908_v34 = vpop.xlane.xlu1 %3907 }
0x1095   : > { %6153 = vrcp.f32 %v3908_v34 }
0x1096   : > { %6155 = vrcp.f32 %v3906_v43  ;;  %v3926_v38 = vpop.xlane.xlu0 %3925 }
0x1097   : > { %v6146_v47 = vpop.eup %6145 }
0x1098   : > { %v4074_v24 = vmul.f32 %v6146_v47, %v5498_v3  ;;  %v3904_v2 = vpop.xlane.xlu1 %3903  ;;  %v6148_v12 = vpop.eup %6147 }
0x1099   : > { %6157 = vrcp.f32 %v3904_v2  ;;  %v5502_v10 = vpop.f32.mrb[112].mxu1  ;;  %v4073_v52 = vmul.f32 %v6148_v12, %v3996_v15 }
0x109a   : > { %v4089_v21 = vpack.c.bf16 %v4075_v1, %v4074_v24  ;;  %v4009_v9 = vpop.f32.mrb[113].mxu1  ;;  %6159 = vrcp.f32 %v3918_v20  ;;  %v3922_v54 = vpop.xlane.xlu0 %3921 }
0x109b   : > { %v6150_v60 = vpop.eup %6149  ;;  %v5503_v28 = vpop.f32.mrb[114].mxu1 }
0x109c   : > { %v4072_v5 = vmul.f32 %v6150_v60, %v3993_v7  ;;  %v3916_v58 = vpop.xlane.xlu1 %3915  ;;  %v4012_v39 = vpop.f32.mrb[115].mxu1  ;;  %4250 = vrot.lane.b32.xlu1 %v4089_v21, %s6213_s15  ;;  %v9593_v7 = vpack.c.bf16 %v8690_v40, %v8705_v25  ;;  %v9595_v21 = vpack.c.bf16 %v8711_v13, %v8725_v16  ;;  %v9597_v16 = vpack.c.bf16 %v8731_v61, %v8745_v19 }
0x109d   : > { %6161 = vrcp.f32 %v3916_v58  ;;  %v6152_v53 = vpop.eup %6151 }
0x109e   : > { %v4088_v63 = vpack.c.bf16 %v4073_v52, %v4072_v5  ;;  %6163 = vrcp.f32 %v3914_v14  ;;  %v4079_v41 = vmul.f32 %v6152_v53, %v5503_v28  ;;  %v9596_v5 = vpack.c.bf16 %v8741_v35, %v8755_v37  ;;  %v4137_v35 = vpop.permute.xlu0 %4136 }
0x109f   : > { %v6154_v4 = vpop.eup %6153 }
0x10a0   : > { %v4078_v59 = vmul.f32 %v6154_v4, %v5502_v10  ;;  %v3912_v62 = vpop.xlane.xlu1 %3911  ;;  %4190 = vrot.lane.b32.xlu1 %v9592_v50, %s6210_s8  ;;  %4248 = vrot.lane.b32.xlu0 %v4088_v63, %s6213_s15  ;;  %v6156_v51 = vpop.eup %6155 }
0x10a1   : > { %6165 = vrcp.f32 %v3912_v62  ;;  %v5506_v22 = vpop.f32.mrb[116].mxu1  ;;  %v4077_v44 = vmul.f32 %v6156_v51, %v4012_v39 }
0x10a2   : > { %v4091_v8 = vpack.c.bf16 %v4079_v41, %v4078_v59  ;;  %v4025_v26 = vpop.f32.mrb[117].mxu1  ;;  %6167 = vrcp.f32 %v3926_v38  ;;  %v4161_v38 = vpop.permute.xlu0 %4160 }
0x10a3   : > { %v6158_v29 = vpop.eup %6157  ;;  %v5507_v46 = vpop.f32.mrb[118].mxu1 }
0x10a4   : > { %v4076_v32 = vmul.f32 %v6158_v29, %v4009_v9  ;;  %v3924_v43 = vpop.xlane.xlu1 %3923  ;;  %v4028_v3 = vpop.f32.mrb[119].mxu1  ;;  %4188 = vrot.lane.b32.xlu0 %v9593_v7, %s6210_s8  ;;  %4254 = vrot.lane.b32.xlu1 %v4091_v8, %s6213_s15 }
0x10a5   : > { %6169 = vrcp.f32 %v3924_v43  ;;  %v6160_v31 = vpop.eup %6159 }
0x10a6   : > { %v4090_v57 = vpack.c.bf16 %v4077_v44, %v4076_v32  ;;  %6171 = vrcp.f32 %v3922_v54  ;;  %v4083_v20 = vmul.f32 %v6160_v31, %v5507_v46  ;;  %v4185_v41 = vpop.permute.xlu0 %4184 }
0x10a7   : > { %v6162_v17 = vpop.eup %6161 }
0x10a8   : > { %v4082_v15 = vmul.f32 %v6162_v17, %v5506_v22  ;;  %v3920_v34 = vpop.xlane.xlu1 %3919  ;;  %4214 = vrot.lane.b32.xlu1 %v9594_v0, %s6211_s9  ;;  %4252 = vrot.lane.b32.xlu0 %v4090_v57, %s6213_s15  ;;  %v6164_v25 = vpop.eup %6163 }
0x10a9   : > { %6173 = vrcp.f32 %v3920_v34  ;;  %v5510_v40 = vpop.f32.mrb[120].mxu1  ;;  %v4081_v10 = vmul.f32 %v6164_v25, %v4028_v3 }
0x10aa   : > { %v4093_v47 = vpack.c.bf16 %v4083_v20, %v4082_v15  ;;  %v4041_v24 = vpop.f32.mrb[121].mxu1  ;;  %v4209_v50 = vpop.permute.xlu0 %4208 }
0x10ab   : > { %v6166_v1 = vpop.eup %6165  ;;  %v5511_v2 = vpop.f32.mrb[122].mxu1 }
0x10ac   : > { %v4080_v14 = vmul.f32 %v6166_v1, %v4025_v26  ;;  %v4044_v12 = vpop.f32.mrb[123].mxu1  ;;  %4212 = vrot.lane.b32.xlu0 %v9595_v21, %s6211_s9  ;;  %4258 = vrot.lane.b32.xlu1 %v4093_v47, %s6213_s15  ;;  %v6168_v55 = vpop.eup %6167 }
0x10ad   : > { %v4087_v28 = vmul.f32 %v6168_v55, %v5511_v2  ;;  %v4139_v4 = vpop.permute.xlu1 %4138 }
0x10ae   : > { %v4092_v36 = vpack.c.bf16 %v4081_v10, %v4080_v14  ;;  %v4233_v51 = vpop.permute.xlu0 %4232 }
0x10af   : > { %v6170_v9 = vpop.eup %6169 }
0x10b0   : > { %v4086_v60 = vmul.f32 %v6170_v9, %v5510_v40  ;;  %4238 = vrot.lane.b32.xlu1 %v9596_v5, %s6212_s10  ;;  %4256 = vrot.lane.b32.xlu0 %v4092_v36, %s6213_s15  ;;  %v6172_v52 = vpop.eup %6171  ;;  %v4300_v40 = vsel %vm4288_vm3, %v8929_v30, %v4139_v4 }
0x10b1   : > { %v4085_v13 = vmul.f32 %v6172_v52, %v4044_v12  ;;  %v4163_v37 = vpop.permute.xlu1 %4162 }
0x10b2   : > { %v4095_v58 = vpack.c.bf16 %v4087_v28, %v4086_v60  ;;  %v4117_v26 = vpop.permute.xlu0 %4116 }
0x10b3   : > { %v6174_v39 = vpop.eup %6173  ;;  %v4284_v12 = vsel %vm463_vm1, %v888_v48, %v4117_v26 }
0x10b4   : > { %v4084_v53 = vmul.f32 %v6174_v39, %v4041_v24  ;;  %4236 = vrot.lane.b32.xlu0 %v9597_v16, %s6212_s10  ;;  %4262 = vrot.lane.b32.xlu1 %v4095_v58, %s6213_s15 }
0x10b5   : > { %v4187_v59 = vpop.permute.xlu1 %4186 }
0x10b6   : > { %v4094_v63 = vpack.c.bf16 %v4085_v13, %v4084_v53  ;;  %v4141_v61 = vpop.permute.xlu0 %4140  ;;  %v4689_v53 = vld [vmem:[%s9061_s4] ss:$0 sm:$0xff] }
0x10b7   : > { %v4302_v21 = vsel %vm4288_vm3, %v4284_v12, %v4141_v61 }
0x10b8   : > { %4260 = vrot.lane.b32.xlu0 %v4094_v63, %s6213_s15 }
0x10b9   : > { %v4211_v62 = vpop.permute.xlu1 %4210 }
0x10ba   : > { %v4165_v46 = vpop.permute.xlu0 %4164 }
0x10bb   : > { %v4319_v9 = vsel %vm4305_vm4, %v4302_v21, %v4165_v46 }
0x10bd   : > { %v4235_v22 = vpop.permute.xlu1 %4234 }
0x10c1   : > { %v4119_v8 = vpop.permute.xlu1 %4118 }
0x10c2   : > { %v4287_v55 = vsel %vm463_vm1, %v889_v11, %v4119_v8 }
0x10c5   : > { %v4143_v29 = vpop.permute.xlu1 %4142 }
0x10c6   : > { %v4304_v60 = vsel %vm4288_vm3, %v4287_v55, %v4143_v29 }
0x10c9   : > { %v4167_v19 = vpop.permute.xlu1 %4166 }
0x10ca   : > { %v4321_v28 = vsel %vm4305_vm4, %v4304_v60, %v4167_v19 }
0x110e   : > { %v4251_v32 = vpop.permute.xlu1 %4250 }
0x110f   : > { %v4377_v7 = vsel %vm4373_vm8, %v8883_v18, %v4251_v32 }
0x1112   : > { %v4191_v44 = vpop.permute.xlu1 %4190  ;;  %v4249_v43 = vpop.permute.xlu0 %4248 }
0x1113   : > { %v4375_v3 = vsel %vm4373_vm8, %v8846_v33, %v4249_v43  ;;  %v4298_v33 = vsel %vm4288_vm3, %v8918_v42, %v4137_v35  ;;  %v4338_v56 = vsel %vm4322_vm5, %v4321_v28, %v4191_v44 }
0x1114   : > { %5516 = vmatprep.mubr.msk.bf16.mxu1 %vm305_vm0, %v4375_v3  ;;  %v4315_v0 = vsel %vm4305_vm4, %v4298_v33, %v4161_v38 }
0x1115   : > { %5517 = vmatmul.mubr.msk.bf16.vlgmr.msra.gmra.mrb[124].mxu1 %vm305_vm0, %v4377_v7  ;;  %v4332_v25 = vsel %vm4322_vm5, %v4315_v0, %v4185_v41 }
0x1116   : > { %v4255_v54 = vpop.permute.xlu1 %4254  ;;  %v4189_v31 = vpop.permute.xlu0 %4188 }
0x1117   : > { %v4381_v20 = vsel %vm4373_vm8, %v8923_v6, %v4255_v54  ;;  %v4349_v6 = vsel %vm4339_vm6, %v4332_v25, %v4209_v50  ;;  %v4336_v45 = vsel %vm4322_vm5, %v4319_v9, %v4189_v31 }
0x1118   : > { %v4366_v24 = vsel %vm4356_vm7, %v4349_v6, %v4233_v51 }
0x111a   : > { %v4215_v57 = vpop.permute.xlu1 %4214  ;;  %v4253_v17 = vpop.permute.xlu0 %4252 }
0x111b   : > { %v4379_v15 = vsel %vm4373_vm8, %v8911_v49, %v4253_v17  ;;  %v4317_v49 = vsel %vm4305_vm4, %v4300_v40, %v4163_v37  ;;  %v4355_v52 = vsel %vm4339_vm6, %v4338_v56, %v4215_v57 }
0x111c   : > { %5520 = vmatprep.mubr.msk.bf16.mxu1 %vm305_vm0, %v4379_v15  ;;  %v4334_v47 = vsel %vm4322_vm5, %v4317_v49, %v4187_v59 }
0x111d   : > { %5521 = vmatmul.mubr.msk.bf16.gmra.mrb[128].mxu1 %vm305_vm0, %v4381_v20  ;;  %v4351_v1 = vsel %vm4339_vm6, %v4334_v47, %v4211_v62 }
0x111e   : > { %v4259_v18 = vpop.permute.xlu1 %4258  ;;  %v4213_v34 = vpop.permute.xlu0 %4212  ;;  %v4368_v2 = vsel %vm4356_vm7, %v4351_v1, %v4235_v22 }
0x111f   : > { %v4385_v30 = vsel %vm4373_vm8, %v4368_v2, %v4259_v18  ;;  %v4353_v48 = vsel %vm4339_vm6, %v4336_v45, %v4213_v34 }
0x1122   : > { %v4257_v42 = vpop.permute.xlu0 %4256  ;;  %v4239_v14 = vpop.permute.xlu1 %4238 }
0x1123   : > { %v4383_v10 = vsel %vm4373_vm8, %v4366_v24, %v4257_v42  ;;  %v4372_v11 = vsel %vm4356_vm7, %v4355_v52, %v4239_v14 }
0x1124   : > { %5524 = vmatprep.mubr.msk.bf16.mxu1 %vm305_vm0, %v4383_v10 }
0x1125   : > { %5525 = vmatmul.mubr.msk.bf16.gmra.mrb[132].mxu1 %vm305_vm0, %v4385_v30 }
0x1126   : > { %v4237_v36 = vpop.permute.xlu0 %4236  ;;  %v4263_v5 = vpop.permute.xlu1 %4262 }
0x1127   : > { %v4370_v27 = vsel %vm4356_vm7, %v4353_v48, %v4237_v36  ;;  %v4389_v39 = vsel %vm4373_vm8, %v4372_v11, %v4263_v5 }
0x112a   : > { %v4261_v23 = vpop.permute.xlu0 %4260 }
0x112b   : > { %v4387_v58 = vsel %vm4373_vm8, %v4370_v27, %v4261_v23 }
0x112c   : > { %5528 = vmatprep.mubr.msk.bf16.mxu1 %vm305_vm0, %v4387_v58 }
0x112d   : > { %5529 = vmatmul.mubr.msk.bf16.gmra.mrb[136].mxu1 %vm305_vm0, %v4389_v39 }
0x11e8   : > { %v5518_v13 = vpop.f32.mrb[124].mxu1 }
0x11e9   : > { %v4472_v16 = vadd.f32 %v5518_v13, %v4689_v53  ;;  %v4463_v63 = vpop.f32.mrb[125].mxu1 }
0x11ea   : > { %v4464_v4 = vadd.f32 %v4689_v53, %v4463_v63  ;;  %v5519_v35 = vpop.f32.mrb[126].mxu1 }
0x11eb   : > { %4528 = vst.msk [vmem:[%s9020_s23 + $0x10] sm:$0xff] %vm305_vm0, %v4472_v16  ;;  %v4475_v37 = vadd.f32 %v5519_v35, %v4689_v53  ;;  %v4466_v38 = vpop.f32.mrb[127].mxu1 }
0x11ec   : > { %4526 = vst.msk [vmem:[%s9020_s23] sm:$0xff] %vm305_vm0, %v4464_v4  ;;  %v4467_v59 = vadd.f32 %v4689_v53, %v4466_v38 }
0x11ed   : > { %4529 = vst.msk [vmem:[%s9020_s23 + $0x18] sm:$0xff] %vm305_vm0, %v4475_v37 }
0x11ee   : > { %4527 = vst.msk [vmem:[%s9020_s23 + $0x8] sm:$0xff] %vm305_vm0, %v4467_v59 }
0x11f0   : > { %v5522_v41 = vpop.f32.mrb[128].mxu1 }
0x11f1   : > { %v4488_v62 = vadd.f32 %v5522_v41, %v4689_v53  ;;  %v4479_v50 = vpop.f32.mrb[129].mxu1 }
0x11f2   : > { %v4480_v22 = vadd.f32 %v4689_v53, %v4479_v50  ;;  %v5523_v51 = vpop.f32.mrb[130].mxu1 }
0x11f3   : > { %4532 = vst.msk [vmem:[%s9020_s23 + $0x30] sm:$0xff] %vm305_vm0, %v4488_v62  ;;  %v4491_v8 = vadd.f32 %v5523_v51, %v4689_v53  ;;  %v4482_v26 = vpop.f32.mrb[131].mxu1 }
0x11f4   : > { %4530 = vst.msk [vmem:[%s9020_s23 + $0x20] sm:$0xff] %vm305_vm0, %v4480_v22  ;;  %v4483_v29 = vadd.f32 %v4689_v53, %v4482_v26 }
0x11f5   : > { %4533 = vst.msk [vmem:[%s9020_s23 + $0x38] sm:$0xff] %vm305_vm0, %v4491_v8 }
0x11f6   : > { %4531 = vst.msk [vmem:[%s9020_s23 + $0x28] sm:$0xff] %vm305_vm0, %v4483_v29 }
0x11f8   : > { %v5526_v61 = vpop.f32.mrb[132].mxu1 }
0x11f9   : > { %v4504_v19 = vadd.f32 %v5526_v61, %v4689_v53  ;;  %v4495_v46 = vpop.f32.mrb[133].mxu1 }
0x11fa   : > { %v4496_v32 = vadd.f32 %v4689_v53, %v4495_v46  ;;  %v5527_v44 = vpop.f32.mrb[134].mxu1 }
0x11fb   : > { %4536 = vst.msk [vmem:[%s9020_s23 + $0x50] sm:$0xff] %vm305_vm0, %v4504_v19  ;;  %v4507_v43 = vadd.f32 %v5527_v44, %v4689_v53  ;;  %v4498_v3 = vpop.f32.mrb[135].mxu1 }
0x11fc   : > { %4534 = vst.msk [vmem:[%s9020_s23 + $0x40] sm:$0xff] %vm305_vm0, %v4496_v32  ;;  %v4499_v7 = vadd.f32 %v4689_v53, %v4498_v3 }
0x11fd   : > { %4537 = vst.msk [vmem:[%s9020_s23 + $0x58] sm:$0xff] %vm305_vm0, %v4507_v43 }
0x11fe   : > { %4535 = vst.msk [vmem:[%s9020_s23 + $0x48] sm:$0xff] %vm305_vm0, %v4499_v7 }
0x1200   : > { %v5530_v54 = vpop.f32.mrb[136].mxu1 }
0x1201   : > { %v4520_v31 = vadd.f32 %v5530_v54, %v4689_v53  ;;  %v4511_v57 = vpop.f32.mrb[137].mxu1 }
0x1202   : > { %v4512_v17 = vadd.f32 %v4689_v53, %v4511_v57  ;;  %v5531_v15 = vpop.f32.mrb[138].mxu1 }
0x1203   : > { %4540 = vst.msk [vmem:[%s9020_s23 + $0x70] sm:$0xff] %vm305_vm0, %v4520_v31  ;;  %v4523_v20 = vadd.f32 %v5531_v15, %v4689_v53  ;;  %v4514_v33 = vpop.f32.mrb[139].mxu1 }
0x1204   : > { %4538 = vst.msk [vmem:[%s9020_s23 + $0x60] sm:$0xff] %vm305_vm0, %v4512_v17  ;;  %v4515_v18 = vadd.f32 %v4689_v53, %v4514_v33 }
0x1205   : > { %4541 = vst.msk [vmem:[%s9020_s23 + $0x78] sm:$0xff] %vm305_vm0, %v4523_v20 }
0x1206   : > { %4539 = vst.msk [vmem:[%s9020_s23 + $0x68] sm:$0xff] %vm305_vm0, %v4515_v18 }
0x1207 PF: > { %s15_s18 = sadd.s32 1, %s6181_s18  }
0x1208   : > { %p12_p4 = scmp.ge.s32.totalorder %s15_s18, 4  }
0x120a   :  { %14 = sbr.rel (!%p12_p4) target bundleno = 1 (0x1), region = 70 }

</bundles_post_ra>
